<compile_context>
chip_gen: v6e
topology: v6e:2x2x1
jax: 0.10.0
libtpu: 0.0.40
codegen_flags: <defaults>
</compile_context>

<pallas_src>
import jax
import jax.numpy as jnp
from jax.experimental import pallas as pl
from jax.experimental.pallas import tpu as pltpu

_EPS = 1e-5


# ----------------------------------------------------------------------------
# Fused kernel: entire DNN forward in one invocation (gridless, all in VMEM).
# Operand order (48 inputs + 1 output) must match dnn_forward below.
# ----------------------------------------------------------------------------
def fused_dnn_kernel(*refs):
    (d11_ref, d21_ref, d12_ref, d22_ref, c1_ref, c2_ref) = refs[0:6]
    (a_w1, a_b1, a_g, a_be, a_w2, a_b2) = refs[6:12]     # drug_network1 (shared)
    (b_w1, b_b1, b_g, b_be, b_w2, b_b2) = refs[12:18]    # drug_network2 (shared)
    (c_w1, c_b1, c_g, c_be, c_w2, c_b2) = refs[18:24]    # cell nets, block-diag packed
    (g0_a, g0_b, g0_c, g0_d, g0_e) = refs[24:29]         # fc BN0 gamma, split by feat piece
    (be0_a, be0_b, be0_c, be0_d, be0_e) = refs[29:34]    # fc BN0 beta, split
    (w1_a, w1_b, w1_c, w1_d, w1_e) = refs[34:39]         # fc Linear1 weight rows, split
    (f_b1, f_g1, f_be1, f_w2, f_b2, f_g2, f_be2, f_w3, f_b3) = refs[39:48]
    o_ref = refs[48]

    B = d11_ref.shape[0]
    f32 = jnp.float32

    def bn(h, g, be):
        # training-mode BatchNorm1d, fused into a single scale/shift:
        # one pass for mean & E[x^2]; rsqrt goes to the EUP slot.
        mean = jnp.mean(h, axis=0, keepdims=True)
        msq = jnp.mean(h * h, axis=0, keepdims=True)
        var = jnp.maximum(msq - mean * mean, 0.0)
        scale = g * jax.lax.rsqrt(var + _EPS)
        return h * scale + (be - mean * scale)

    def drug_pair(xa_ref, xb_ref, w1, b1, g, be, w2, b2):
        # Shared-weight sub-network applied to two inputs: one stacked (2B, d)
        # matmul per Linear, but BatchNorm statistics kept per original call
        # (matching two separate PyTorch forward calls exactly).
        x = jnp.concatenate([xa_ref[...], xb_ref[...]], axis=0)          # (2B, d)
        h = jnp.dot(x, w1[...], preferred_element_type=f32) + b1[...]
        h = jnp.maximum(h, 0.0)
        h = jnp.concatenate([bn(h[:B], g[...], be[...]),
                             bn(h[B:], g[...], be[...])], axis=0)
        y = jnp.dot(h, w2[...], preferred_element_type=f32) + b2[...]
        return y[:B], y[B:]

    v11, v21 = drug_pair(d11_ref, d21_ref, a_w1, a_b1, a_g, a_be, a_w2, a_b2)
    v12, v22 = drug_pair(d12_ref, d22_ref, b_w1, b_b1, b_g, b_be, b_w2, b_b2)

    # cell_network / cell_network2 as one block-diagonal matmul (256-wide
    # contraction fills the 256x256 MXU on v6e/v7x). BN is per-feature over the
    # same batch, so the packed BN is numerically identical to two separate BNs.
    xc = jnp.concatenate([c1_ref[...], c2_ref[...]], axis=1)             # (B, 256)
    hc = jnp.dot(xc, c_w1[...], preferred_element_type=f32) + c_b1[...]
    hc = jnp.maximum(hc, 0.0)
    hc = bn(hc, c_g[...], c_be[...])
    vc = jnp.dot(hc, c_w2[...], preferred_element_type=f32) + c_b2[...]  # (B, 768) = [cell | cell2]

    # fc_network: BN0 + Linear1 distributed over feat = [v11 | v12 | v21 | v22 | vc]
    # (per-feature BN and row-block matmuls are exactly equivalent to the concat).
    h = (jnp.dot(bn(v11, g0_a[...], be0_a[...]), w1_a[...], preferred_element_type=f32)
         + jnp.dot(bn(v12, g0_b[...], be0_b[...]), w1_b[...], preferred_element_type=f32)
         + jnp.dot(bn(v21, g0_c[...], be0_c[...]), w1_c[...], preferred_element_type=f32)
         + jnp.dot(bn(v22, g0_d[...], be0_d[...]), w1_d[...], preferred_element_type=f32)
         + jnp.dot(bn(vc, g0_e[...], be0_e[...]), w1_e[...], preferred_element_type=f32)
         + f_b1[...])
    h = jnp.maximum(h, 0.0)
    h = bn(h, f_g1[...], f_be1[...])
    h = jnp.dot(h, f_w2[...], preferred_element_type=f32) + f_b2[...]
    h = jnp.maximum(h, 0.0)
    h = bn(h, f_g2[...], f_be2[...])
    # Final Linear padded to 128 output lanes -> single unmasked, lane-dense store;
    # the real scalar lives in lane 0, lanes 1..127 are exact zeros.
    o_ref[...] = jnp.dot(h, f_w3[...], preferred_element_type=f32) + f_b3[...]


# ----------------------------------------------------------------------------
# Parameter construction (PyTorch-style init; weights stored pre-transposed as
# (in_features, out_features), biases / BN params as (1, features)).
# ----------------------------------------------------------------------------
def _linear_params(key, in_dim, out_dim):
    kw, kb = jax.random.split(key)
    bound = 1.0 / jnp.sqrt(jnp.float32(in_dim))
    w = jax.random.uniform(kw, (in_dim, out_dim), jnp.float32, -bound, bound)
    b = jax.random.uniform(kb, (1, out_dim), jnp.float32, -bound, bound)
    return w, b


def _bn_params(dim):
    return jnp.ones((1, dim), jnp.float32), jnp.zeros((1, dim), jnp.float32)


def make_dnn_params(key, d1, d2, c1, c2, hidden):
    keys = jax.random.split(key, 10)

    def two_layer(k1, k2, in_dim, mid_dim, out_dim):
        w1, b1 = _linear_params(k1, in_dim, mid_dim)
        g, be = _bn_params(mid_dim)
        w2, b2 = _linear_params(k2, mid_dim, out_dim)
        return (w1, b1, g, be, w2, b2)

    drug_net1 = two_layer(keys[0], keys[1], d1, d1 * 2, d1)
    drug_net2 = two_layer(keys[2], keys[3], d2, d2 * 2, d2)
    cell_net = two_layer(keys[4], keys[5], c1, c1, 384)
    cell_net2 = two_layer(keys[6], keys[7], c2, c2, 384)

    fc_in = 2 * (d1 + d2) + 768
    g0, be0 = _bn_params(fc_in)
    w1, b1 = _linear_params(keys[8], fc_in, hidden)
    g1, be1 = _bn_params(hidden)
    kw2, kw3 = jax.random.split(keys[9])
    w2, b2 = _linear_params(kw2, hidden, hidden // 2)
    g2, be2 = _bn_params(hidden // 2)
    w3, b3 = _linear_params(kw3, hidden // 2, 1)
    fc_net = (g0, be0, w1, b1, g1, be1, w2, b2, g2, be2, w3, b3)

    return dict(drug1=drug_net1, drug2=drug_net2, cell=cell_net,
                cell2=cell_net2, fc=fc_net)


def pack_params(params, d1, d2):
    """One-time repack of PyTorch-structured params into the fused-kernel operand tuple."""
    drug1 = tuple(params["drug1"])
    drug2 = tuple(params["drug2"])

    # Block-diagonal packing of the two structurally identical cell networks.
    cw1, cb1, cg, cbe, cw2, cb2 = params["cell"]
    ew1, eb1, eg, ebe, ew2, eb2 = params["cell2"]
    W1 = jnp.zeros((cw1.shape[0] + ew1.shape[0], cw1.shape[1] + ew1.shape[1]), jnp.float32)
    W1 = W1.at[:cw1.shape[0], :cw1.shape[1]].set(cw1)
    W1 = W1.at[cw1.shape[0]:, cw1.shape[1]:].set(ew1)
    W2 = jnp.zeros((cw2.shape[0] + ew2.shape[0], cw2.shape[1] + ew2.shape[1]), jnp.float32)
    W2 = W2.at[:cw2.shape[0], :cw2.shape[1]].set(cw2)
    W2 = W2.at[cw2.shape[0]:, cw2.shape[1]:].set(ew2)
    cell_packed = (W1,
                   jnp.concatenate([cb1, eb1], axis=1),
                   jnp.concatenate([cg, eg], axis=1),
                   jnp.concatenate([cbe, ebe], axis=1),
                   W2,
                   jnp.concatenate([cb2, eb2], axis=1))

    # fc_network: split BN0/Linear1 along feat = [v11(d1) | v12(d2) | v21(d1) | v22(d2) | vc(768)]
    (g0, be0, w1, b1, g1, be1, w2, b2, g2, be2, w3, b3) = params["fc"]
    offs = [0, d1, d1 + d2, 2 * d1 + d2, 2 * (d1 + d2), 2 * (d1 + d2) + 768]
    g0_s = tuple(g0[:, offs[i]:offs[i + 1]] for i in range(5))
    be0_s = tuple(be0[:, offs[i]:offs[i + 1]] for i in range(5))
    w1_s = tuple(w1[offs[i]:offs[i + 1], :] for i in range(5))

    # Pad the final 1-wide Linear to 128 output lanes -> lane-dense store in-kernel.
    w3p = jnp.zeros((w3.shape[0], 128), jnp.float32).at[:, :1].set(w3)
    b3p = jnp.zeros((1, 128), jnp.float32).at[:, :1].set(b3)

    fc_packed = g0_s + be0_s + w1_s + (b1, g1, be1, w2, b2, g2, be2, w3p, b3p)
    return drug1 + drug2 + cell_packed + fc_packed


# ----------------------------------------------------------------------------
# Fused forward: one pallas_call, everything resident in VMEM.
# ----------------------------------------------------------------------------
@jax.jit
def dnn_forward(packed, drug1_feat1, drug1_feat2, drug2_feat1, drug2_feat2,
                cell_feat, cell_feat2):
    B = drug1_feat1.shape[0]
    operands = (drug1_feat1, drug2_feat1, drug1_feat2, drug2_feat2,
                cell_feat, cell_feat2) + tuple(packed)
    # NOTE: gridless single-shot kernel (all params + activations ~1-2 MiB).
    # If batch ever grows large, add a batch-tiled "parallel" grid axis (v7x has
    # 2 TensorCores) -- but training-mode BN needs full-batch statistics, so the
    # whole batch must stay in one block per BN.
    out = pl.pallas_call(
        fused_dnn_kernel,
        out_shape=jax.ShapeDtypeStruct((B, 128), jnp.float32),
        in_specs=[pl.BlockSpec(memory_space=pltpu.MemorySpace.VMEM)] * len(operands),
        out_specs=pl.BlockSpec(memory_space=pltpu.MemorySpace.VMEM),
        compiler_params=pltpu.CompilerParams(vmem_limit_bytes=16 * 1024 * 1024),
    )(*operands)
    return out[:, :1]


# ----------------------------------------------------------------------------
# Pure-JAX reference (mirrors the PyTorch module structure) for correctness.
# ----------------------------------------------------------------------------
def _mm(a, b):
    return jnp.dot(a, b, precision=jax.lax.Precision.HIGHEST)


def _bn_ref(h, g, be):
    mean = jnp.mean(h, axis=0, keepdims=True)
    var = jnp.mean((h - mean) ** 2, axis=0, keepdims=True)
    return g * (h - mean) / jnp.sqrt(var + _EPS) + be


def _mlp2_ref(x, p):
    w1, b1, g, be, w2, b2 = p
    h = jnp.maximum(_mm(x, w1) + b1, 0.0)
    h = _bn_ref(h, g, be)
    return _mm(h, w2) + b2


def dnn_forward_ref(params, d11, d12, d21, d22, c1, c2):
    v11 = _mlp2_ref(d11, params["drug1"])
    v12 = _mlp2_ref(d12, params["drug2"])
    v21 = _mlp2_ref(d21, params["drug1"])
    v22 = _mlp2_ref(d22, params["drug2"])
    vc1 = _mlp2_ref(c1, params["cell"])
    vc2 = _mlp2_ref(c2, params["cell2"])
    feat = jnp.concatenate([v11, v12, v21, v22, vc1, vc2], axis=1)
    g0, be0, w1, b1, g1, be1, w2, b2, g2, be2, w3, b3 = params["fc"]
    h = _bn_ref(feat, g0, be0)
    h = jnp.maximum(_mm(h, w1) + b1, 0.0)
    h = _bn_ref(h, g1, be1)
    h = jnp.maximum(_mm(h, w2) + b2, 0.0)
    h = _bn_ref(h, g2, be2)
    return _mm(h, w3) + b3


if __name__ == "__main__":
    B = 8
    drug_feat1_len = 32
    drug_feat2_len = 64
    cell_feat_len = 128
    cell_feat2_len = 128
    hidden_size = 64

    key = jax.random.PRNGKey(0)
    kp, k1, k2, k3, k4, k5, k6 = jax.random.split(key, 7)

    params = make_dnn_params(kp, drug_feat1_len, drug_feat2_len,
                             cell_feat_len, cell_feat2_len, hidden_size)
    packed = pack_params(params, drug_feat1_len, drug_feat2_len)

    drug1_feat1 = jax.random.normal(k1, (B, drug_feat1_len), jnp.float32)
    drug1_feat2 = jax.random.normal(k2, (B, drug_feat2_len), jnp.float32)
    drug2_feat1 = jax.random.normal(k3, (B, drug_feat1_len), jnp.float32)
    drug2_feat2 = jax.random.normal(k4, (B, drug_feat2_len), jnp.float32)
    cell_feat = jax.random.normal(k5, (B, cell_feat_len), jnp.float32)
    cell_feat2 = jax.random.normal(k6, (B, cell_feat2_len), jnp.float32)

    out = dnn_forward(packed, drug1_feat1, drug1_feat2, drug2_feat1,
                      drug2_feat2, cell_feat, cell_feat2)
    out = jax.block_until_ready(out)
    assert out.shape == (B, 1), out.shape

    ref = dnn_forward_ref(params, drug1_feat1, drug1_feat2, drug2_feat1,
                          drug2_feat2, cell_feat, cell_feat2)
    max_err = float(jnp.max(jnp.abs(out - ref)))
    assert jnp.allclose(out, ref, rtol=2e-2, atol=2e-2), max_err

    print("KERNEL_OK")
</pallas_src>

<mosaic_0001>
module attributes {stable_mosaic.version = 11 : i64} {
  func.func @fused_dnn_kernel(%arg0: memref<8x32xf32, #tpu.memory_space<vmem>>, %arg1: memref<8x32xf32, #tpu.memory_space<vmem>>, %arg2: memref<8x64xf32, #tpu.memory_space<vmem>>, %arg3: memref<8x64xf32, #tpu.memory_space<vmem>>, %arg4: memref<8x128xf32, #tpu.memory_space<vmem>>, %arg5: memref<8x128xf32, #tpu.memory_space<vmem>>, %arg6: memref<32x64xf32, #tpu.memory_space<vmem>>, %arg7: memref<1x64xf32, #tpu.memory_space<vmem>>, %arg8: memref<1x64xf32, #tpu.memory_space<vmem>>, %arg9: memref<1x64xf32, #tpu.memory_space<vmem>>, %arg10: memref<64x32xf32, #tpu.memory_space<vmem>>, %arg11: memref<1x32xf32, #tpu.memory_space<vmem>>, %arg12: memref<64x128xf32, #tpu.memory_space<vmem>>, %arg13: memref<1x128xf32, #tpu.memory_space<vmem>>, %arg14: memref<1x128xf32, #tpu.memory_space<vmem>>, %arg15: memref<1x128xf32, #tpu.memory_space<vmem>>, %arg16: memref<128x64xf32, #tpu.memory_space<vmem>>, %arg17: memref<1x64xf32, #tpu.memory_space<vmem>>, %arg18: memref<256x256xf32, #tpu.memory_space<vmem>>, %arg19: memref<1x256xf32, #tpu.memory_space<vmem>>, %arg20: memref<1x256xf32, #tpu.memory_space<vmem>>, %arg21: memref<1x256xf32, #tpu.memory_space<vmem>>, %arg22: memref<256x768xf32, #tpu.memory_space<vmem>>, %arg23: memref<1x768xf32, #tpu.memory_space<vmem>>, %arg24: memref<1x32xf32, #tpu.memory_space<vmem>>, %arg25: memref<1x64xf32, #tpu.memory_space<vmem>>, %arg26: memref<1x32xf32, #tpu.memory_space<vmem>>, %arg27: memref<1x64xf32, #tpu.memory_space<vmem>>, %arg28: memref<1x768xf32, #tpu.memory_space<vmem>>, %arg29: memref<1x32xf32, #tpu.memory_space<vmem>>, %arg30: memref<1x64xf32, #tpu.memory_space<vmem>>, %arg31: memref<1x32xf32, #tpu.memory_space<vmem>>, %arg32: memref<1x64xf32, #tpu.memory_space<vmem>>, %arg33: memref<1x768xf32, #tpu.memory_space<vmem>>, %arg34: memref<32x64xf32, #tpu.memory_space<vmem>>, %arg35: memref<64x64xf32, #tpu.memory_space<vmem>>, %arg36: memref<32x64xf32, #tpu.memory_space<vmem>>, %arg37: memref<64x64xf32, #tpu.memory_space<vmem>>, %arg38: memref<768x64xf32, #tpu.memory_space<vmem>>, %arg39: memref<1x64xf32, #tpu.memory_space<vmem>>, %arg40: memref<1x64xf32, #tpu.memory_space<vmem>>, %arg41: memref<1x64xf32, #tpu.memory_space<vmem>>, %arg42: memref<64x32xf32, #tpu.memory_space<vmem>>, %arg43: memref<1x32xf32, #tpu.memory_space<vmem>>, %arg44: memref<1x32xf32, #tpu.memory_space<vmem>>, %arg45: memref<1x32xf32, #tpu.memory_space<vmem>>, %arg46: memref<32x128xf32, #tpu.memory_space<vmem>>, %arg47: memref<1x128xf32, #tpu.memory_space<vmem>>, %arg48: memref<8x128xf32, #tpu.memory_space<vmem>>) attributes {dimension_semantics = [], scalar_prefetch = 0 : i64, scratch_operands = 0 : i64, tpu.core_type = #tpu.core_type<tc>} {
    %c0 = arith.constant 0 : index
    %c0_0 = arith.constant 0 : index
    %0 = vector.load %arg0[%c0, %c0_0] : memref<8x32xf32, #tpu.memory_space<vmem>>, vector<8x32xf32>
    %c0_1 = arith.constant 0 : index
    %c0_2 = arith.constant 0 : index
    %1 = vector.load %arg1[%c0_1, %c0_2] : memref<8x32xf32, #tpu.memory_space<vmem>>, vector<8x32xf32>
    %2 = tpu.concatenate %0, %1 in 0 : vector<8x32xf32>, vector<8x32xf32> -> vector<16x32xf32>
    %c0_3 = arith.constant 0 : index
    %c0_4 = arith.constant 0 : index
    %3 = vector.load %arg6[%c0_3, %c0_4] : memref<32x64xf32, #tpu.memory_space<vmem>>, vector<32x64xf32>
    %cst = arith.constant dense<0.000000e+00> : vector<16x64xf32>
    %4 = tpu.matmul %2, %3, %cst {dimension_numbers = #tpu.dot_dimension_numbers<[1], [0], [0], [1], [0, 0, 1, 1], [], []>} : vector<16x32xf32>, vector<32x64xf32>, vector<16x64xf32> -> vector<16x64xf32>
    %c0_5 = arith.constant 0 : index
    %c0_6 = arith.constant 0 : index
    %5 = vector.load %arg7[%c0_5, %c0_6] : memref<1x64xf32, #tpu.memory_space<vmem>>, vector<1x64xf32>
    %6 = vector.broadcast %5 : vector<1x64xf32> to vector<16x64xf32>
    %7 = arith.addf %4, %6 : vector<16x64xf32>
    %cst_7 = arith.constant 0.000000e+00 : f32
    %8 = vector.broadcast %cst_7 : f32 to vector<16x64xf32>
    %9 = arith.maximumf %7, %8 : vector<16x64xf32>
    %10 = vector.extract_strided_slice %9 {offsets = [0, 0], sizes = [8, 64], strides = [1, 1]} : vector<16x64xf32> to vector<8x64xf32>
    %c0_8 = arith.constant 0 : index
    %c0_9 = arith.constant 0 : index
    %11 = vector.load %arg8[%c0_8, %c0_9] : memref<1x64xf32, #tpu.memory_space<vmem>>, vector<1x64xf32>
    %c0_10 = arith.constant 0 : index
    %c0_11 = arith.constant 0 : index
    %12 = vector.load %arg9[%c0_10, %c0_11] : memref<1x64xf32, #tpu.memory_space<vmem>>, vector<1x64xf32>
    %cst_12 = arith.constant dense<0.000000e+00> : vector<64xf32>
    %13 = vector.multi_reduction <add>, %10, %cst_12 [0] : vector<8x64xf32> to vector<64xf32>
    %14 = vector.shape_cast %13 : vector<64xf32> to vector<1x64xf32>
    %cst_13 = arith.constant 8.000000e+00 : f32
    %15 = vector.broadcast %cst_13 : f32 to vector<1x64xf32>
    %16 = arith.divf %14, %15 : vector<1x64xf32>
    %17 = arith.mulf %10, %10 : vector<8x64xf32>
    %cst_14 = arith.constant dense<0.000000e+00> : vector<64xf32>
    %18 = vector.multi_reduction <add>, %17, %cst_14 [0] : vector<8x64xf32> to vector<64xf32>
    %19 = vector.shape_cast %18 : vector<64xf32> to vector<1x64xf32>
    %cst_15 = arith.constant 8.000000e+00 : f32
    %20 = vector.broadcast %cst_15 : f32 to vector<1x64xf32>
    %21 = arith.divf %19, %20 : vector<1x64xf32>
    %22 = arith.mulf %16, %16 : vector<1x64xf32>
    %23 = arith.subf %21, %22 : vector<1x64xf32>
    %cst_16 = arith.constant 0.000000e+00 : f32
    %24 = vector.broadcast %cst_16 : f32 to vector<1x64xf32>
    %25 = arith.maximumf %23, %24 : vector<1x64xf32>
    %cst_17 = arith.constant 9.99999974E-6 : f32
    %26 = vector.broadcast %cst_17 : f32 to vector<1x64xf32>
    %27 = arith.addf %25, %26 : vector<1x64xf32>
    %28 = math.rsqrt %27 : vector<1x64xf32>
    %29 = arith.mulf %11, %28 : vector<1x64xf32>
    %30 = vector.broadcast %29 : vector<1x64xf32> to vector<8x64xf32>
    %31 = arith.mulf %10, %30 : vector<8x64xf32>
    %32 = arith.mulf %16, %29 : vector<1x64xf32>
    %33 = arith.subf %12, %32 : vector<1x64xf32>
    %34 = vector.broadcast %33 : vector<1x64xf32> to vector<8x64xf32>
    %35 = arith.addf %31, %34 : vector<8x64xf32>
    %36 = vector.extract_strided_slice %9 {offsets = [8, 0], sizes = [8, 64], strides = [1, 1]} : vector<16x64xf32> to vector<8x64xf32>
    %c0_18 = arith.constant 0 : index
    %c0_19 = arith.constant 0 : index
    %37 = vector.load %arg8[%c0_18, %c0_19] : memref<1x64xf32, #tpu.memory_space<vmem>>, vector<1x64xf32>
    %c0_20 = arith.constant 0 : index
    %c0_21 = arith.constant 0 : index
    %38 = vector.load %arg9[%c0_20, %c0_21] : memref<1x64xf32, #tpu.memory_space<vmem>>, vector<1x64xf32>
    %cst_22 = arith.constant dense<0.000000e+00> : vector<64xf32>
    %39 = vector.multi_reduction <add>, %36, %cst_22 [0] : vector<8x64xf32> to vector<64xf32>
    %40 = vector.shape_cast %39 : vector<64xf32> to vector<1x64xf32>
    %cst_23 = arith.constant 8.000000e+00 : f32
    %41 = vector.broadcast %cst_23 : f32 to vector<1x64xf32>
    %42 = arith.divf %40, %41 : vector<1x64xf32>
    %43 = arith.mulf %36, %36 : vector<8x64xf32>
    %cst_24 = arith.constant dense<0.000000e+00> : vector<64xf32>
    %44 = vector.multi_reduction <add>, %43, %cst_24 [0] : vector<8x64xf32> to vector<64xf32>
    %45 = vector.shape_cast %44 : vector<64xf32> to vector<1x64xf32>
    %cst_25 = arith.constant 8.000000e+00 : f32
    %46 = vector.broadcast %cst_25 : f32 to vector<1x64xf32>
    %47 = arith.divf %45, %46 : vector<1x64xf32>
    %48 = arith.mulf %42, %42 : vector<1x64xf32>
    %49 = arith.subf %47, %48 : vector<1x64xf32>
    %cst_26 = arith.constant 0.000000e+00 : f32
    %50 = vector.broadcast %cst_26 : f32 to vector<1x64xf32>
    %51 = arith.maximumf %49, %50 : vector<1x64xf32>
    %cst_27 = arith.constant 9.99999974E-6 : f32
    %52 = vector.broadcast %cst_27 : f32 to vector<1x64xf32>
    %53 = arith.addf %51, %52 : vector<1x64xf32>
    %54 = math.rsqrt %53 : vector<1x64xf32>
    %55 = arith.mulf %37, %54 : vector<1x64xf32>
    %56 = vector.broadcast %55 : vector<1x64xf32> to vector<8x64xf32>
    %57 = arith.mulf %36, %56 : vector<8x64xf32>
    %58 = arith.mulf %42, %55 : vector<1x64xf32>
    %59 = arith.subf %38, %58 : vector<1x64xf32>
    %60 = vector.broadcast %59 : vector<1x64xf32> to vector<8x64xf32>
    %61 = arith.addf %57, %60 : vector<8x64xf32>
    %62 = tpu.concatenate %35, %61 in 0 : vector<8x64xf32>, vector<8x64xf32> -> vector<16x64xf32>
    %c0_28 = arith.constant 0 : index
    %c0_29 = arith.constant 0 : index
    %63 = vector.load %arg10[%c0_28, %c0_29] : memref<64x32xf32, #tpu.memory_space<vmem>>, vector<64x32xf32>
    %cst_30 = arith.constant dense<0.000000e+00> : vector<16x32xf32>
    %64 = tpu.matmul %62, %63, %cst_30 {dimension_numbers = #tpu.dot_dimension_numbers<[1], [0], [0], [1], [0, 0, 1, 1], [], []>} : vector<16x64xf32>, vector<64x32xf32>, vector<16x32xf32> -> vector<16x32xf32>
    %c0_31 = arith.constant 0 : index
    %c0_32 = arith.constant 0 : index
    %65 = vector.load %arg11[%c0_31, %c0_32] : memref<1x32xf32, #tpu.memory_space<vmem>>, vector<1x32xf32>
    %66 = vector.broadcast %65 : vector<1x32xf32> to vector<16x32xf32>
    %67 = arith.addf %64, %66 : vector<16x32xf32>
    %68 = vector.extract_strided_slice %67 {offsets = [0, 0], sizes = [8, 32], strides = [1, 1]} : vector<16x32xf32> to vector<8x32xf32>
    %69 = vector.extract_strided_slice %67 {offsets = [8, 0], sizes = [8, 32], strides = [1, 1]} : vector<16x32xf32> to vector<8x32xf32>
    %c0_33 = arith.constant 0 : index
    %c0_34 = arith.constant 0 : index
    %70 = vector.load %arg2[%c0_33, %c0_34] : memref<8x64xf32, #tpu.memory_space<vmem>>, vector<8x64xf32>
    %c0_35 = arith.constant 0 : index
    %c0_36 = arith.constant 0 : index
    %71 = vector.load %arg3[%c0_35, %c0_36] : memref<8x64xf32, #tpu.memory_space<vmem>>, vector<8x64xf32>
    %72 = tpu.concatenate %70, %71 in 0 : vector<8x64xf32>, vector<8x64xf32> -> vector<16x64xf32>
    %c0_37 = arith.constant 0 : index
    %c0_38 = arith.constant 0 : index
    %73 = vector.load %arg12[%c0_37, %c0_38] : memref<64x128xf32, #tpu.memory_space<vmem>>, vector<64x128xf32>
    %cst_39 = arith.constant dense<0.000000e+00> : vector<16x128xf32>
    %74 = tpu.matmul %72, %73, %cst_39 {dimension_numbers = #tpu.dot_dimension_numbers<[1], [0], [0], [1], [0, 0, 1, 1], [], []>} : vector<16x64xf32>, vector<64x128xf32>, vector<16x128xf32> -> vector<16x128xf32>
    %c0_40 = arith.constant 0 : index
    %c0_41 = arith.constant 0 : index
    %75 = vector.load %arg13[%c0_40, %c0_41] : memref<1x128xf32, #tpu.memory_space<vmem>>, vector<1x128xf32>
    %76 = vector.broadcast %75 : vector<1x128xf32> to vector<16x128xf32>
    %77 = arith.addf %74, %76 : vector<16x128xf32>
    %cst_42 = arith.constant 0.000000e+00 : f32
    %78 = vector.broadcast %cst_42 : f32 to vector<16x128xf32>
    %79 = arith.maximumf %77, %78 : vector<16x128xf32>
    %80 = vector.extract_strided_slice %79 {offsets = [0, 0], sizes = [8, 128], strides = [1, 1]} : vector<16x128xf32> to vector<8x128xf32>
    %c0_43 = arith.constant 0 : index
    %c0_44 = arith.constant 0 : index
    %81 = vector.load %arg14[%c0_43, %c0_44] : memref<1x128xf32, #tpu.memory_space<vmem>>, vector<1x128xf32>
    %c0_45 = arith.constant 0 : index
    %c0_46 = arith.constant 0 : index
    %82 = vector.load %arg15[%c0_45, %c0_46] : memref<1x128xf32, #tpu.memory_space<vmem>>, vector<1x128xf32>
    %cst_47 = arith.constant dense<0.000000e+00> : vector<128xf32>
    %83 = vector.multi_reduction <add>, %80, %cst_47 [0] : vector<8x128xf32> to vector<128xf32>
    %84 = vector.shape_cast %83 : vector<128xf32> to vector<1x128xf32>
    %cst_48 = arith.constant 8.000000e+00 : f32
    %85 = vector.broadcast %cst_48 : f32 to vector<1x128xf32>
    %86 = arith.divf %84, %85 : vector<1x128xf32>
    %87 = arith.mulf %80, %80 : vector<8x128xf32>
    %cst_49 = arith.constant dense<0.000000e+00> : vector<128xf32>
    %88 = vector.multi_reduction <add>, %87, %cst_49 [0] : vector<8x128xf32> to vector<128xf32>
    %89 = vector.shape_cast %88 : vector<128xf32> to vector<1x128xf32>
    %cst_50 = arith.constant 8.000000e+00 : f32
    %90 = vector.broadcast %cst_50 : f32 to vector<1x128xf32>
    %91 = arith.divf %89, %90 : vector<1x128xf32>
    %92 = arith.mulf %86, %86 : vector<1x128xf32>
    %93 = arith.subf %91, %92 : vector<1x128xf32>
    %cst_51 = arith.constant 0.000000e+00 : f32
    %94 = vector.broadcast %cst_51 : f32 to vector<1x128xf32>
    %95 = arith.maximumf %93, %94 : vector<1x128xf32>
    %cst_52 = arith.constant 9.99999974E-6 : f32
    %96 = vector.broadcast %cst_52 : f32 to vector<1x128xf32>
    %97 = arith.addf %95, %96 : vector<1x128xf32>
    %98 = math.rsqrt %97 : vector<1x128xf32>
    %99 = arith.mulf %81, %98 : vector<1x128xf32>
    %100 = vector.broadcast %99 : vector<1x128xf32> to vector<8x128xf32>
    %101 = arith.mulf %80, %100 : vector<8x128xf32>
    %102 = arith.mulf %86, %99 : vector<1x128xf32>
    %103 = arith.subf %82, %102 : vector<1x128xf32>
    %104 = vector.broadcast %103 : vector<1x128xf32> to vector<8x128xf32>
    %105 = arith.addf %101, %104 : vector<8x128xf32>
    %106 = vector.extract_strided_slice %79 {offsets = [8, 0], sizes = [8, 128], strides = [1, 1]} : vector<16x128xf32> to vector<8x128xf32>
    %c0_53 = arith.constant 0 : index
    %c0_54 = arith.constant 0 : index
    %107 = vector.load %arg14[%c0_53, %c0_54] : memref<1x128xf32, #tpu.memory_space<vmem>>, vector<1x128xf32>
    %c0_55 = arith.constant 0 : index
    %c0_56 = arith.constant 0 : index
    %108 = vector.load %arg15[%c0_55, %c0_56] : memref<1x128xf32, #tpu.memory_space<vmem>>, vector<1x128xf32>
    %cst_57 = arith.constant dense<0.000000e+00> : vector<128xf32>
    %109 = vector.multi_reduction <add>, %106, %cst_57 [0] : vector<8x128xf32> to vector<128xf32>
    %110 = vector.shape_cast %109 : vector<128xf32> to vector<1x128xf32>
    %cst_58 = arith.constant 8.000000e+00 : f32
    %111 = vector.broadcast %cst_58 : f32 to vector<1x128xf32>
    %112 = arith.divf %110, %111 : vector<1x128xf32>
    %113 = arith.mulf %106, %106 : vector<8x128xf32>
    %cst_59 = arith.constant dense<0.000000e+00> : vector<128xf32>
    %114 = vector.multi_reduction <add>, %113, %cst_59 [0] : vector<8x128xf32> to vector<128xf32>
    %115 = vector.shape_cast %114 : vector<128xf32> to vector<1x128xf32>
    %cst_60 = arith.constant 8.000000e+00 : f32
    %116 = vector.broadcast %cst_60 : f32 to vector<1x128xf32>
    %117 = arith.divf %115, %116 : vector<1x128xf32>
    %118 = arith.mulf %112, %112 : vector<1x128xf32>
    %119 = arith.subf %117, %118 : vector<1x128xf32>
    %cst_61 = arith.constant 0.000000e+00 : f32
    %120 = vector.broadcast %cst_61 : f32 to vector<1x128xf32>
    %121 = arith.maximumf %119, %120 : vector<1x128xf32>
    %cst_62 = arith.constant 9.99999974E-6 : f32
    %122 = vector.broadcast %cst_62 : f32 to vector<1x128xf32>
    %123 = arith.addf %121, %122 : vector<1x128xf32>
    %124 = math.rsqrt %123 : vector<1x128xf32>
    %125 = arith.mulf %107, %124 : vector<1x128xf32>
    %126 = vector.broadcast %125 : vector<1x128xf32> to vector<8x128xf32>
    %127 = arith.mulf %106, %126 : vector<8x128xf32>
    %128 = arith.mulf %112, %125 : vector<1x128xf32>
    %129 = arith.subf %108, %128 : vector<1x128xf32>
    %130 = vector.broadcast %129 : vector<1x128xf32> to vector<8x128xf32>
    %131 = arith.addf %127, %130 : vector<8x128xf32>
    %132 = tpu.concatenate %105, %131 in 0 : vector<8x128xf32>, vector<8x128xf32> -> vector<16x128xf32>
    %c0_63 = arith.constant 0 : index
    %c0_64 = arith.constant 0 : index
    %133 = vector.load %arg16[%c0_63, %c0_64] : memref<128x64xf32, #tpu.memory_space<vmem>>, vector<128x64xf32>
    %cst_65 = arith.constant dense<0.000000e+00> : vector<16x64xf32>
    %134 = tpu.matmul %132, %133, %cst_65 {dimension_numbers = #tpu.dot_dimension_numbers<[1], [0], [0], [1], [0, 0, 1, 1], [], []>} : vector<16x128xf32>, vector<128x64xf32>, vector<16x64xf32> -> vector<16x64xf32>
    %c0_66 = arith.constant 0 : index
    %c0_67 = arith.constant 0 : index
    %135 = vector.load %arg17[%c0_66, %c0_67] : memref<1x64xf32, #tpu.memory_space<vmem>>, vector<1x64xf32>
    %136 = vector.broadcast %135 : vector<1x64xf32> to vector<16x64xf32>
    %137 = arith.addf %134, %136 : vector<16x64xf32>
    %138 = vector.extract_strided_slice %137 {offsets = [0, 0], sizes = [8, 64], strides = [1, 1]} : vector<16x64xf32> to vector<8x64xf32>
    %139 = vector.extract_strided_slice %137 {offsets = [8, 0], sizes = [8, 64], strides = [1, 1]} : vector<16x64xf32> to vector<8x64xf32>
    %c0_68 = arith.constant 0 : index
    %c0_69 = arith.constant 0 : index
    %140 = vector.load %arg4[%c0_68, %c0_69] : memref<8x128xf32, #tpu.memory_space<vmem>>, vector<8x128xf32>
    %c0_70 = arith.constant 0 : index
    %c0_71 = arith.constant 0 : index
    %141 = vector.load %arg5[%c0_70, %c0_71] : memref<8x128xf32, #tpu.memory_space<vmem>>, vector<8x128xf32>
    %142 = tpu.concatenate %140, %141 in 1 : vector<8x128xf32>, vector<8x128xf32> -> vector<8x256xf32>
    %c0_72 = arith.constant 0 : index
    %c0_73 = arith.constant 0 : index
    %143 = vector.load %arg18[%c0_72, %c0_73] : memref<256x256xf32, #tpu.memory_space<vmem>>, vector<256x256xf32>
    %cst_74 = arith.constant dense<0.000000e+00> : vector<8x256xf32>
    %144 = tpu.matmul %142, %143, %cst_74 {dimension_numbers = #tpu.dot_dimension_numbers<[1], [0], [0], [1], [0, 0, 1, 1], [], []>} : vector<8x256xf32>, vector<256x256xf32>, vector<8x256xf32> -> vector<8x256xf32>
    %c0_75 = arith.constant 0 : index
    %c0_76 = arith.constant 0 : index
    %145 = vector.load %arg19[%c0_75, %c0_76] : memref<1x256xf32, #tpu.memory_space<vmem>>, vector<1x256xf32>
    %146 = vector.broadcast %145 : vector<1x256xf32> to vector<8x256xf32>
    %147 = arith.addf %144, %146 : vector<8x256xf32>
    %cst_77 = arith.constant 0.000000e+00 : f32
    %148 = vector.broadcast %cst_77 : f32 to vector<8x256xf32>
    %149 = arith.maximumf %147, %148 : vector<8x256xf32>
    %c0_78 = arith.constant 0 : index
    %c0_79 = arith.constant 0 : index
    %150 = vector.load %arg20[%c0_78, %c0_79] : memref<1x256xf32, #tpu.memory_space<vmem>>, vector<1x256xf32>
    %c0_80 = arith.constant 0 : index
    %c0_81 = arith.constant 0 : index
    %151 = vector.load %arg21[%c0_80, %c0_81] : memref<1x256xf32, #tpu.memory_space<vmem>>, vector<1x256xf32>
    %cst_82 = arith.constant dense<0.000000e+00> : vector<256xf32>
    %152 = vector.multi_reduction <add>, %149, %cst_82 [0] : vector<8x256xf32> to vector<256xf32>
    %153 = vector.shape_cast %152 : vector<256xf32> to vector<1x256xf32>
    %cst_83 = arith.constant 8.000000e+00 : f32
    %154 = vector.broadcast %cst_83 : f32 to vector<1x256xf32>
    %155 = arith.divf %153, %154 : vector<1x256xf32>
    %156 = arith.mulf %149, %149 : vector<8x256xf32>
    %cst_84 = arith.constant dense<0.000000e+00> : vector<256xf32>
    %157 = vector.multi_reduction <add>, %156, %cst_84 [0] : vector<8x256xf32> to vector<256xf32>
    %158 = vector.shape_cast %157 : vector<256xf32> to vector<1x256xf32>
    %cst_85 = arith.constant 8.000000e+00 : f32
    %159 = vector.broadcast %cst_85 : f32 to vector<1x256xf32>
    %160 = arith.divf %158, %159 : vector<1x256xf32>
    %161 = arith.mulf %155, %155 : vector<1x256xf32>
    %162 = arith.subf %160, %161 : vector<1x256xf32>
    %cst_86 = arith.constant 0.000000e+00 : f32
    %163 = vector.broadcast %cst_86 : f32 to vector<1x256xf32>
    %164 = arith.maximumf %162, %163 : vector<1x256xf32>
    %cst_87 = arith.constant 9.99999974E-6 : f32
    %165 = vector.broadcast %cst_87 : f32 to vector<1x256xf32>
    %166 = arith.addf %164, %165 : vector<1x256xf32>
    %167 = math.rsqrt %166 : vector<1x256xf32>
    %168 = arith.mulf %150, %167 : vector<1x256xf32>
    %169 = vector.broadcast %168 : vector<1x256xf32> to vector<8x256xf32>
    %170 = arith.mulf %149, %169 : vector<8x256xf32>
    %171 = arith.mulf %155, %168 : vector<1x256xf32>
    %172 = arith.subf %151, %171 : vector<1x256xf32>
    %173 = vector.broadcast %172 : vector<1x256xf32> to vector<8x256xf32>
    %174 = arith.addf %170, %173 : vector<8x256xf32>
    %c0_88 = arith.constant 0 : index
    %c0_89 = arith.constant 0 : index
    %175 = vector.load %arg22[%c0_88, %c0_89] : memref<256x768xf32, #tpu.memory_space<vmem>>, vector<256x768xf32>
    %cst_90 = arith.constant dense<0.000000e+00> : vector<8x768xf32>
    %176 = tpu.matmul %174, %175, %cst_90 {dimension_numbers = #tpu.dot_dimension_numbers<[1], [0], [0], [1], [0, 0, 1, 1], [], []>} : vector<8x256xf32>, vector<256x768xf32>, vector<8x768xf32> -> vector<8x768xf32>
    %c0_91 = arith.constant 0 : index
    %c0_92 = arith.constant 0 : index
    %177 = vector.load %arg23[%c0_91, %c0_92] : memref<1x768xf32, #tpu.memory_space<vmem>>, vector<1x768xf32>
    %178 = vector.broadcast %177 : vector<1x768xf32> to vector<8x768xf32>
    %179 = arith.addf %176, %178 : vector<8x768xf32>
    %c0_93 = arith.constant 0 : index
    %c0_94 = arith.constant 0 : index
    %180 = vector.load %arg24[%c0_93, %c0_94] : memref<1x32xf32, #tpu.memory_space<vmem>>, vector<1x32xf32>
    %c0_95 = arith.constant 0 : index
    %c0_96 = arith.constant 0 : index
    %181 = vector.load %arg29[%c0_95, %c0_96] : memref<1x32xf32, #tpu.memory_space<vmem>>, vector<1x32xf32>
    %cst_97 = arith.constant dense<0.000000e+00> : vector<32xf32>
    %182 = vector.multi_reduction <add>, %68, %cst_97 [0] : vector<8x32xf32> to vector<32xf32>
    %183 = vector.shape_cast %182 : vector<32xf32> to vector<1x32xf32>
    %cst_98 = arith.constant 8.000000e+00 : f32
    %184 = vector.broadcast %cst_98 : f32 to vector<1x32xf32>
    %185 = arith.divf %183, %184 : vector<1x32xf32>
    %186 = arith.mulf %68, %68 : vector<8x32xf32>
    %cst_99 = arith.constant dense<0.000000e+00> : vector<32xf32>
    %187 = vector.multi_reduction <add>, %186, %cst_99 [0] : vector<8x32xf32> to vector<32xf32>
    %188 = vector.shape_cast %187 : vector<32xf32> to vector<1x32xf32>
    %cst_100 = arith.constant 8.000000e+00 : f32
    %189 = vector.broadcast %cst_100 : f32 to vector<1x32xf32>
    %190 = arith.divf %188, %189 : vector<1x32xf32>
    %191 = arith.mulf %185, %185 : vector<1x32xf32>
    %192 = arith.subf %190, %191 : vector<1x32xf32>
    %cst_101 = arith.constant 0.000000e+00 : f32
    %193 = vector.broadcast %cst_101 : f32 to vector<1x32xf32>
    %194 = arith.maximumf %192, %193 : vector<1x32xf32>
    %cst_102 = arith.constant 9.99999974E-6 : f32
    %195 = vector.broadcast %cst_102 : f32 to vector<1x32xf32>
    %196 = arith.addf %194, %195 : vector<1x32xf32>
    %197 = math.rsqrt %196 : vector<1x32xf32>
    %198 = arith.mulf %180, %197 : vector<1x32xf32>
    %199 = vector.broadcast %198 : vector<1x32xf32> to vector<8x32xf32>
    %200 = arith.mulf %68, %199 : vector<8x32xf32>
    %201 = arith.mulf %185, %198 : vector<1x32xf32>
    %202 = arith.subf %181, %201 : vector<1x32xf32>
    %203 = vector.broadcast %202 : vector<1x32xf32> to vector<8x32xf32>
    %204 = arith.addf %200, %203 : vector<8x32xf32>
    %c0_103 = arith.constant 0 : index
    %c0_104 = arith.constant 0 : index
    %205 = vector.load %arg34[%c0_103, %c0_104] : memref<32x64xf32, #tpu.memory_space<vmem>>, vector<32x64xf32>
    %cst_105 = arith.constant dense<0.000000e+00> : vector<8x64xf32>
    %206 = tpu.matmul %204, %205, %cst_105 {dimension_numbers = #tpu.dot_dimension_numbers<[1], [0], [0], [1], [0, 0, 1, 1], [], []>} : vector<8x32xf32>, vector<32x64xf32>, vector<8x64xf32> -> vector<8x64xf32>
    %c0_106 = arith.constant 0 : index
    %c0_107 = arith.constant 0 : index
    %207 = vector.load %arg25[%c0_106, %c0_107] : memref<1x64xf32, #tpu.memory_space<vmem>>, vector<1x64xf32>
    %c0_108 = arith.constant 0 : index
    %c0_109 = arith.constant 0 : index
    %208 = vector.load %arg30[%c0_108, %c0_109] : memref<1x64xf32, #tpu.memory_space<vmem>>, vector<1x64xf32>
    %cst_110 = arith.constant dense<0.000000e+00> : vector<64xf32>
    %209 = vector.multi_reduction <add>, %138, %cst_110 [0] : vector<8x64xf32> to vector<64xf32>
    %210 = vector.shape_cast %209 : vector<64xf32> to vector<1x64xf32>
    %cst_111 = arith.constant 8.000000e+00 : f32
    %211 = vector.broadcast %cst_111 : f32 to vector<1x64xf32>
    %212 = arith.divf %210, %211 : vector<1x64xf32>
    %213 = arith.mulf %138, %138 : vector<8x64xf32>
    %cst_112 = arith.constant dense<0.000000e+00> : vector<64xf32>
    %214 = vector.multi_reduction <add>, %213, %cst_112 [0] : vector<8x64xf32> to vector<64xf32>
    %215 = vector.shape_cast %214 : vector<64xf32> to vector<1x64xf32>
    %cst_113 = arith.constant 8.000000e+00 : f32
    %216 = vector.broadcast %cst_113 : f32 to vector<1x64xf32>
    %217 = arith.divf %215, %216 : vector<1x64xf32>
    %218 = arith.mulf %212, %212 : vector<1x64xf32>
    %219 = arith.subf %217, %218 : vector<1x64xf32>
    %cst_114 = arith.constant 0.000000e+00 : f32
    %220 = vector.broadcast %cst_114 : f32 to vector<1x64xf32>
    %221 = arith.maximumf %219, %220 : vector<1x64xf32>
    %cst_115 = arith.constant 9.99999974E-6 : f32
    %222 = vector.broadcast %cst_115 : f32 to vector<1x64xf32>
    %223 = arith.addf %221, %222 : vector<1x64xf32>
    %224 = math.rsqrt %223 : vector<1x64xf32>
    %225 = arith.mulf %207, %224 : vector<1x64xf32>
    %226 = vector.broadcast %225 : vector<1x64xf32> to vector<8x64xf32>
    %227 = arith.mulf %138, %226 : vector<8x64xf32>
    %228 = arith.mulf %212, %225 : vector<1x64xf32>
    %229 = arith.subf %208, %228 : vector<1x64xf32>
    %230 = vector.broadcast %229 : vector<1x64xf32> to vector<8x64xf32>
    %231 = arith.addf %227, %230 : vector<8x64xf32>
    %c0_116 = arith.constant 0 : index
    %c0_117 = arith.constant 0 : index
    %232 = vector.load %arg35[%c0_116, %c0_117] : memref<64x64xf32, #tpu.memory_space<vmem>>, vector<64x64xf32>
    %cst_118 = arith.constant dense<0.000000e+00> : vector<8x64xf32>
    %233 = tpu.matmul %231, %232, %cst_118 {dimension_numbers = #tpu.dot_dimension_numbers<[1], [0], [0], [1], [0, 0, 1, 1], [], []>} : vector<8x64xf32>, vector<64x64xf32>, vector<8x64xf32> -> vector<8x64xf32>
    %234 = arith.addf %206, %233 : vector<8x64xf32>
    %c0_119 = arith.constant 0 : index
    %c0_120 = arith.constant 0 : index
    %235 = vector.load %arg26[%c0_119, %c0_120] : memref<1x32xf32, #tpu.memory_space<vmem>>, vector<1x32xf32>
    %c0_121 = arith.constant 0 : index
    %c0_122 = arith.constant 0 : index
    %236 = vector.load %arg31[%c0_121, %c0_122] : memref<1x32xf32, #tpu.memory_space<vmem>>, vector<1x32xf32>
    %cst_123 = arith.constant dense<0.000000e+00> : vector<32xf32>
    %237 = vector.multi_reduction <add>, %69, %cst_123 [0] : vector<8x32xf32> to vector<32xf32>
    %238 = vector.shape_cast %237 : vector<32xf32> to vector<1x32xf32>
    %cst_124 = arith.constant 8.000000e+00 : f32
    %239 = vector.broadcast %cst_124 : f32 to vector<1x32xf32>
    %240 = arith.divf %238, %239 : vector<1x32xf32>
    %241 = arith.mulf %69, %69 : vector<8x32xf32>
    %cst_125 = arith.constant dense<0.000000e+00> : vector<32xf32>
    %242 = vector.multi_reduction <add>, %241, %cst_125 [0] : vector<8x32xf32> to vector<32xf32>
    %243 = vector.shape_cast %242 : vector<32xf32> to vector<1x32xf32>
    %cst_126 = arith.constant 8.000000e+00 : f32
    %244 = vector.broadcast %cst_126 : f32 to vector<1x32xf32>
    %245 = arith.divf %243, %244 : vector<1x32xf32>
    %246 = arith.mulf %240, %240 : vector<1x32xf32>
    %247 = arith.subf %245, %246 : vector<1x32xf32>
    %cst_127 = arith.constant 0.000000e+00 : f32
    %248 = vector.broadcast %cst_127 : f32 to vector<1x32xf32>
    %249 = arith.maximumf %247, %248 : vector<1x32xf32>
    %cst_128 = arith.constant 9.99999974E-6 : f32
    %250 = vector.broadcast %cst_128 : f32 to vector<1x32xf32>
    %251 = arith.addf %249, %250 : vector<1x32xf32>
    %252 = math.rsqrt %251 : vector<1x32xf32>
    %253 = arith.mulf %235, %252 : vector<1x32xf32>
    %254 = vector.broadcast %253 : vector<1x32xf32> to vector<8x32xf32>
    %255 = arith.mulf %69, %254 : vector<8x32xf32>
    %256 = arith.mulf %240, %253 : vector<1x32xf32>
    %257 = arith.subf %236, %256 : vector<1x32xf32>
    %258 = vector.broadcast %257 : vector<1x32xf32> to vector<8x32xf32>
    %259 = arith.addf %255, %258 : vector<8x32xf32>
    %c0_129 = arith.constant 0 : index
    %c0_130 = arith.constant 0 : index
    %260 = vector.load %arg36[%c0_129, %c0_130] : memref<32x64xf32, #tpu.memory_space<vmem>>, vector<32x64xf32>
    %cst_131 = arith.constant dense<0.000000e+00> : vector<8x64xf32>
    %261 = tpu.matmul %259, %260, %cst_131 {dimension_numbers = #tpu.dot_dimension_numbers<[1], [0], [0], [1], [0, 0, 1, 1], [], []>} : vector<8x32xf32>, vector<32x64xf32>, vector<8x64xf32> -> vector<8x64xf32>
    %262 = arith.addf %234, %261 : vector<8x64xf32>
    %c0_132 = arith.constant 0 : index
    %c0_133 = arith.constant 0 : index
    %263 = vector.load %arg27[%c0_132, %c0_133] : memref<1x64xf32, #tpu.memory_space<vmem>>, vector<1x64xf32>
    %c0_134 = arith.constant 0 : index
    %c0_135 = arith.constant 0 : index
    %264 = vector.load %arg32[%c0_134, %c0_135] : memref<1x64xf32, #tpu.memory_space<vmem>>, vector<1x64xf32>
    %cst_136 = arith.constant dense<0.000000e+00> : vector<64xf32>
    %265 = vector.multi_reduction <add>, %139, %cst_136 [0] : vector<8x64xf32> to vector<64xf32>
    %266 = vector.shape_cast %265 : vector<64xf32> to vector<1x64xf32>
    %cst_137 = arith.constant 8.000000e+00 : f32
    %267 = vector.broadcast %cst_137 : f32 to vector<1x64xf32>
    %268 = arith.divf %266, %267 : vector<1x64xf32>
    %269 = arith.mulf %139, %139 : vector<8x64xf32>
    %cst_138 = arith.constant dense<0.000000e+00> : vector<64xf32>
    %270 = vector.multi_reduction <add>, %269, %cst_138 [0] : vector<8x64xf32> to vector<64xf32>
    %271 = vector.shape_cast %270 : vector<64xf32> to vector<1x64xf32>
    %cst_139 = arith.constant 8.000000e+00 : f32
    %272 = vector.broadcast %cst_139 : f32 to vector<1x64xf32>
    %273 = arith.divf %271, %272 : vector<1x64xf32>
    %274 = arith.mulf %268, %268 : vector<1x64xf32>
    %275 = arith.subf %273, %274 : vector<1x64xf32>
    %cst_140 = arith.constant 0.000000e+00 : f32
    %276 = vector.broadcast %cst_140 : f32 to vector<1x64xf32>
    %277 = arith.maximumf %275, %276 : vector<1x64xf32>
    %cst_141 = arith.constant 9.99999974E-6 : f32
    %278 = vector.broadcast %cst_141 : f32 to vector<1x64xf32>
    %279 = arith.addf %277, %278 : vector<1x64xf32>
    %280 = math.rsqrt %279 : vector<1x64xf32>
    %281 = arith.mulf %263, %280 : vector<1x64xf32>
    %282 = vector.broadcast %281 : vector<1x64xf32> to vector<8x64xf32>
    %283 = arith.mulf %139, %282 : vector<8x64xf32>
    %284 = arith.mulf %268, %281 : vector<1x64xf32>
    %285 = arith.subf %264, %284 : vector<1x64xf32>
    %286 = vector.broadcast %285 : vector<1x64xf32> to vector<8x64xf32>
    %287 = arith.addf %283, %286 : vector<8x64xf32>
    %c0_142 = arith.constant 0 : index
    %c0_143 = arith.constant 0 : index
    %288 = vector.load %arg37[%c0_142, %c0_143] : memref<64x64xf32, #tpu.memory_space<vmem>>, vector<64x64xf32>
    %cst_144 = arith.constant dense<0.000000e+00> : vector<8x64xf32>
    %289 = tpu.matmul %287, %288, %cst_144 {dimension_numbers = #tpu.dot_dimension_numbers<[1], [0], [0], [1], [0, 0, 1, 1], [], []>} : vector<8x64xf32>, vector<64x64xf32>, vector<8x64xf32> -> vector<8x64xf32>
    %290 = arith.addf %262, %289 : vector<8x64xf32>
    %c0_145 = arith.constant 0 : index
    %c0_146 = arith.constant 0 : index
    %291 = vector.load %arg28[%c0_145, %c0_146] : memref<1x768xf32, #tpu.memory_space<vmem>>, vector<1x768xf32>
    %c0_147 = arith.constant 0 : index
    %c0_148 = arith.constant 0 : index
    %292 = vector.load %arg33[%c0_147, %c0_148] : memref<1x768xf32, #tpu.memory_space<vmem>>, vector<1x768xf32>
    %cst_149 = arith.constant dense<0.000000e+00> : vector<768xf32>
    %293 = vector.multi_reduction <add>, %179, %cst_149 [0] : vector<8x768xf32> to vector<768xf32>
    %294 = vector.shape_cast %293 : vector<768xf32> to vector<1x768xf32>
    %cst_150 = arith.constant 8.000000e+00 : f32
    %295 = vector.broadcast %cst_150 : f32 to vector<1x768xf32>
    %296 = arith.divf %294, %295 : vector<1x768xf32>
    %297 = arith.mulf %179, %179 : vector<8x768xf32>
    %cst_151 = arith.constant dense<0.000000e+00> : vector<768xf32>
    %298 = vector.multi_reduction <add>, %297, %cst_151 [0] : vector<8x768xf32> to vector<768xf32>
    %299 = vector.shape_cast %298 : vector<768xf32> to vector<1x768xf32>
    %cst_152 = arith.constant 8.000000e+00 : f32
    %300 = vector.broadcast %cst_152 : f32 to vector<1x768xf32>
    %301 = arith.divf %299, %300 : vector<1x768xf32>
    %302 = arith.mulf %296, %296 : vector<1x768xf32>
    %303 = arith.subf %301, %302 : vector<1x768xf32>
    %cst_153 = arith.constant 0.000000e+00 : f32
    %304 = vector.broadcast %cst_153 : f32 to vector<1x768xf32>
    %305 = arith.maximumf %303, %304 : vector<1x768xf32>
    %cst_154 = arith.constant 9.99999974E-6 : f32
    %306 = vector.broadcast %cst_154 : f32 to vector<1x768xf32>
    %307 = arith.addf %305, %306 : vector<1x768xf32>
    %308 = math.rsqrt %307 : vector<1x768xf32>
    %309 = arith.mulf %291, %308 : vector<1x768xf32>
    %310 = vector.broadcast %309 : vector<1x768xf32> to vector<8x768xf32>
    %311 = arith.mulf %179, %310 : vector<8x768xf32>
    %312 = arith.mulf %296, %309 : vector<1x768xf32>
    %313 = arith.subf %292, %312 : vector<1x768xf32>
    %314 = vector.broadcast %313 : vector<1x768xf32> to vector<8x768xf32>
    %315 = arith.addf %311, %314 : vector<8x768xf32>
    %c0_155 = arith.constant 0 : index
    %c0_156 = arith.constant 0 : index
    %316 = vector.load %arg38[%c0_155, %c0_156] : memref<768x64xf32, #tpu.memory_space<vmem>>, vector<768x64xf32>
    %cst_157 = arith.constant dense<0.000000e+00> : vector<8x64xf32>
    %317 = tpu.matmul %315, %316, %cst_157 {dimension_numbers = #tpu.dot_dimension_numbers<[1], [0], [0], [1], [0, 0, 1, 1], [], []>} : vector<8x768xf32>, vector<768x64xf32>, vector<8x64xf32> -> vector<8x64xf32>
    %318 = arith.addf %290, %317 : vector<8x64xf32>
    %c0_158 = arith.constant 0 : index
    %c0_159 = arith.constant 0 : index
    %319 = vector.load %arg39[%c0_158, %c0_159] : memref<1x64xf32, #tpu.memory_space<vmem>>, vector<1x64xf32>
    %320 = vector.broadcast %319 : vector<1x64xf32> to vector<8x64xf32>
    %321 = arith.addf %318, %320 : vector<8x64xf32>
    %cst_160 = arith.constant 0.000000e+00 : f32
    %322 = vector.broadcast %cst_160 : f32 to vector<8x64xf32>
    %323 = arith.maximumf %321, %322 : vector<8x64xf32>
    %c0_161 = arith.constant 0 : index
    %c0_162 = arith.constant 0 : index
    %324 = vector.load %arg40[%c0_161, %c0_162] : memref<1x64xf32, #tpu.memory_space<vmem>>, vector<1x64xf32>
    %c0_163 = arith.constant 0 : index
    %c0_164 = arith.constant 0 : index
    %325 = vector.load %arg41[%c0_163, %c0_164] : memref<1x64xf32, #tpu.memory_space<vmem>>, vector<1x64xf32>
    %cst_165 = arith.constant dense<0.000000e+00> : vector<64xf32>
    %326 = vector.multi_reduction <add>, %323, %cst_165 [0] : vector<8x64xf32> to vector<64xf32>
    %327 = vector.shape_cast %326 : vector<64xf32> to vector<1x64xf32>
    %cst_166 = arith.constant 8.000000e+00 : f32
    %328 = vector.broadcast %cst_166 : f32 to vector<1x64xf32>
    %329 = arith.divf %327, %328 : vector<1x64xf32>
    %330 = arith.mulf %323, %323 : vector<8x64xf32>
    %cst_167 = arith.constant dense<0.000000e+00> : vector<64xf32>
    %331 = vector.multi_reduction <add>, %330, %cst_167 [0] : vector<8x64xf32> to vector<64xf32>
    %332 = vector.shape_cast %331 : vector<64xf32> to vector<1x64xf32>
    %cst_168 = arith.constant 8.000000e+00 : f32
    %333 = vector.broadcast %cst_168 : f32 to vector<1x64xf32>
    %334 = arith.divf %332, %333 : vector<1x64xf32>
    %335 = arith.mulf %329, %329 : vector<1x64xf32>
    %336 = arith.subf %334, %335 : vector<1x64xf32>
    %cst_169 = arith.constant 0.000000e+00 : f32
    %337 = vector.broadcast %cst_169 : f32 to vector<1x64xf32>
    %338 = arith.maximumf %336, %337 : vector<1x64xf32>
    %cst_170 = arith.constant 9.99999974E-6 : f32
    %339 = vector.broadcast %cst_170 : f32 to vector<1x64xf32>
    %340 = arith.addf %338, %339 : vector<1x64xf32>
    %341 = math.rsqrt %340 : vector<1x64xf32>
    %342 = arith.mulf %324, %341 : vector<1x64xf32>
    %343 = vector.broadcast %342 : vector<1x64xf32> to vector<8x64xf32>
    %344 = arith.mulf %323, %343 : vector<8x64xf32>
    %345 = arith.mulf %329, %342 : vector<1x64xf32>
    %346 = arith.subf %325, %345 : vector<1x64xf32>
    %347 = vector.broadcast %346 : vector<1x64xf32> to vector<8x64xf32>
    %348 = arith.addf %344, %347 : vector<8x64xf32>
    %c0_171 = arith.constant 0 : index
    %c0_172 = arith.constant 0 : index
    %349 = vector.load %arg42[%c0_171, %c0_172] : memref<64x32xf32, #tpu.memory_space<vmem>>, vector<64x32xf32>
    %cst_173 = arith.constant dense<0.000000e+00> : vector<8x32xf32>
    %350 = tpu.matmul %348, %349, %cst_173 {dimension_numbers = #tpu.dot_dimension_numbers<[1], [0], [0], [1], [0, 0, 1, 1], [], []>} : vector<8x64xf32>, vector<64x32xf32>, vector<8x32xf32> -> vector<8x32xf32>
    %c0_174 = arith.constant 0 : index
    %c0_175 = arith.constant 0 : index
    %351 = vector.load %arg43[%c0_174, %c0_175] : memref<1x32xf32, #tpu.memory_space<vmem>>, vector<1x32xf32>
    %352 = vector.broadcast %351 : vector<1x32xf32> to vector<8x32xf32>
    %353 = arith.addf %350, %352 : vector<8x32xf32>
    %cst_176 = arith.constant 0.000000e+00 : f32
    %354 = vector.broadcast %cst_176 : f32 to vector<8x32xf32>
    %355 = arith.maximumf %353, %354 : vector<8x32xf32>
    %c0_177 = arith.constant 0 : index
    %c0_178 = arith.constant 0 : index
    %356 = vector.load %arg44[%c0_177, %c0_178] : memref<1x32xf32, #tpu.memory_space<vmem>>, vector<1x32xf32>
    %c0_179 = arith.constant 0 : index
    %c0_180 = arith.constant 0 : index
    %357 = vector.load %arg45[%c0_179, %c0_180] : memref<1x32xf32, #tpu.memory_space<vmem>>, vector<1x32xf32>
    %cst_181 = arith.constant dense<0.000000e+00> : vector<32xf32>
    %358 = vector.multi_reduction <add>, %355, %cst_181 [0] : vector<8x32xf32> to vector<32xf32>
    %359 = vector.shape_cast %358 : vector<32xf32> to vector<1x32xf32>
    %cst_182 = arith.constant 8.000000e+00 : f32
    %360 = vector.broadcast %cst_182 : f32 to vector<1x32xf32>
    %361 = arith.divf %359, %360 : vector<1x32xf32>
    %362 = arith.mulf %355, %355 : vector<8x32xf32>
    %cst_183 = arith.constant dense<0.000000e+00> : vector<32xf32>
    %363 = vector.multi_reduction <add>, %362, %cst_183 [0] : vector<8x32xf32> to vector<32xf32>
    %364 = vector.shape_cast %363 : vector<32xf32> to vector<1x32xf32>
    %cst_184 = arith.constant 8.000000e+00 : f32
    %365 = vector.broadcast %cst_184 : f32 to vector<1x32xf32>
    %366 = arith.divf %364, %365 : vector<1x32xf32>
    %367 = arith.mulf %361, %361 : vector<1x32xf32>
    %368 = arith.subf %366, %367 : vector<1x32xf32>
    %cst_185 = arith.constant 0.000000e+00 : f32
    %369 = vector.broadcast %cst_185 : f32 to vector<1x32xf32>
    %370 = arith.maximumf %368, %369 : vector<1x32xf32>
    %cst_186 = arith.constant 9.99999974E-6 : f32
    %371 = vector.broadcast %cst_186 : f32 to vector<1x32xf32>
    %372 = arith.addf %370, %371 : vector<1x32xf32>
    %373 = math.rsqrt %372 : vector<1x32xf32>
    %374 = arith.mulf %356, %373 : vector<1x32xf32>
    %375 = vector.broadcast %374 : vector<1x32xf32> to vector<8x32xf32>
    %376 = arith.mulf %355, %375 : vector<8x32xf32>
    %377 = arith.mulf %361, %374 : vector<1x32xf32>
    %378 = arith.subf %357, %377 : vector<1x32xf32>
    %379 = vector.broadcast %378 : vector<1x32xf32> to vector<8x32xf32>
    %380 = arith.addf %376, %379 : vector<8x32xf32>
    %c0_187 = arith.constant 0 : index
    %c0_188 = arith.constant 0 : index
    %381 = vector.load %arg46[%c0_187, %c0_188] : memref<32x128xf32, #tpu.memory_space<vmem>>, vector<32x128xf32>
    %cst_189 = arith.constant dense<0.000000e+00> : vector<8x128xf32>
    %382 = tpu.matmul %380, %381, %cst_189 {dimension_numbers = #tpu.dot_dimension_numbers<[1], [0], [0], [1], [0, 0, 1, 1], [], []>} : vector<8x32xf32>, vector<32x128xf32>, vector<8x128xf32> -> vector<8x128xf32>
    %c0_190 = arith.constant 0 : index
    %c0_191 = arith.constant 0 : index
    %383 = vector.load %arg47[%c0_190, %c0_191] : memref<1x128xf32, #tpu.memory_space<vmem>>, vector<1x128xf32>
    %384 = vector.broadcast %383 : vector<1x128xf32> to vector<8x128xf32>
    %385 = arith.addf %382, %384 : vector<8x128xf32>
    %c0_192 = arith.constant 0 : index
    %c0_193 = arith.constant 0 : index
    %386 = vector.load %arg48[%c0_192, %c0_193] : memref<8x128xf32, #tpu.memory_space<vmem>>, vector<8x128xf32>
    tpu.vector_store %arg48[%c0_192, %c0_193], %385 {strides = array<i32>} : memref<8x128xf32, #tpu.memory_space<vmem>>, vector<8x128xf32>,
    return
  }
}

</mosaic_0001>

<bundles_post_ra>
// kernel: dnn_forward.1
= control target key start
LH: loop header
LB: loop body
LE: loop exit
PB: predicated region body
PF: predicated region fallthrough
CT: control target
= control target key end

     0   :  { %s4630_s6 = smov 1   ;;  %s4631_s10 = smov 2   ;;  %s5700_s0 = inlined_call_operand.smem [shape: u32[49], index: -1, kind: input, shape index: {}] }
   0x1   :  { %s4731_s5 = sld [smem:[%s5700_s0]]   ;;  %s4632_s14 = smov 3  }
   0x2   :  { %s4736_s9 = sld [smem:[%s5700_s0 + %s4630_s6]]   ;;  %s4633_s18 = smov 4  }
   0x3   :  { %s4741_s13 = sld [smem:[%s5700_s0 + %s4631_s10]]   ;;  %s4634_s22 = smov 5  }
   0x4   :  { %s4746_s17 = sld [smem:[%s5700_s0 + %s4632_s14]]   ;;  %s4635_s26 = smov 6  }
   0x5   :  { %s4751_s21 = sld [smem:[%s5700_s0 + %s4633_s18]]   ;;  %s4636_s30 = smov 7  }
   0x6   :  { %s4756_s25 = sld [smem:[%s5700_s0 + %s4634_s22]]   ;;  %s4637_s4 = smov 8  }
   0x7   :  { %5707 = sst [smem:[#allocation80_spill]] %s4731_s5  ;;  %s4638_s10 = smov 9  }
   0x8   :  { %s4761_s29 = sld [smem:[%s5700_s0 + %s4635_s26]]   ;;  %s4639_s15 = smov 10  }
   0x9   :  { %5708 = sst [smem:[#allocation81_spill]] %s4741_s13  ;;  %s4640_s20 = smov 11  }
   0xa   :  { %5709 = sst [smem:[#allocation82_spill]] %s4746_s17  ;;  %s4641_s26 = smov 12  }
   0xb   :  { %5710 = sst [smem:[#allocation83_spill]] %s4751_s21  ;;  %s4642_s1 = smov 13  }
   0xc   :  { %s4766_s3 = sld [smem:[%s5700_s0 + %s4636_s30]]   ;;  %s4643_s7 = smov 14  }
   0xd   :  { %s4771_s8 = sld [smem:[%s5700_s0 + %s4637_s4]]   ;;  %s4645_s22 = smov 16  }
   0xe   :  { %5711 = sst [smem:[#allocation84_spill]] %s4761_s29  ;;  %s4646_s28 = smov 17  }
   0xf   :  { %s4776_s14 = sld [smem:[%s5700_s0 + %s4638_s10]]  }
  0x10   :  { %s4781_s19 = sld [smem:[%s5700_s0 + %s4639_s15]]   ;;  %s4644_s15 = smov 15  }
  0x11   :  { %s4786_s24 = sld [smem:[%s5700_s0 + %s4640_s20]]  }
  0x12   :  { %s4791_s30 = sld [smem:[%s5700_s0 + %s4641_s26]]  }
  0x13   :  { %5712 = sst [smem:[#allocation85_spill]] %s4771_s8 }
  0x14   :  { %s4796_s6 = sld [smem:[%s5700_s0 + %s4642_s1]]  }
  0x15   :  { %s4801_s12 = sld [smem:[%s5700_s0 + %s4643_s7]]   ;;  %s4647_s7 = smov 18  }
  0x16   :  { %5713 = sst [smem:[#allocation86_spill]] %s4781_s19 }
  0x17   :  { %5714 = sst [smem:[#allocation87_spill]] %s4786_s24 }
  0x18   :  { %s4806_s20 = sld [smem:[%s5700_s0 + %s4644_s15]]   ;;  %s4648_s15 = smov 19  }
  0x19   :  { %s4811_s27 = sld [smem:[%s5700_s0 + %s4645_s22]]   ;;  %s4649_s22 = smov 20  }
  0x1a   :  { %5715 = sst [smem:[#allocation88_spill]] %s4796_s6 }
  0x1b   :  { %s4816_s4 = sld [smem:[%s5700_s0 + %s4646_s28]]   ;;  %s4650_s28 = smov 21  }
  0x1c   :  { %s4821_s19 = sld [smem:[%s5700_s0 + %s4647_s7]]   ;;  %s4651_s7 = smov 22  }
  0x1d   :  { %s4826_s21 = sld [smem:[%s5700_s0 + %s4648_s15]]   ;;  %s4652_s15 = smov 23  }
  0x1e   :  { %5716 = sst [smem:[#allocation89_spill]] %s4806_s20 }
  0x1f   :  { %5717 = sst [smem:[#allocation90_spill]] %s4811_s27 }
  0x20   :  { %s4831_s27 = sld [smem:[%s5700_s0 + %s4649_s22]]   ;;  %s4653_s22 = smov 24  }
  0x21   :  { %s4836_s17 = sld [smem:[%s5700_s0 + %s4650_s28]]   ;;  %s4654_s28 = smov 25  }
  0x22   :  { %5718 = sst [smem:[#allocation91_spill]] %s4821_s19 }
  0x23   :  { %s4841_s19 = sld [smem:[%s5700_s0 + %s4651_s7]]   ;;  %s4655_s7 = smov 26  }
  0x24   :  { %s4846_s20 = sld [smem:[%s5700_s0 + %s4652_s15]]   ;;  %s4656_s15 = smov 27  }
  0x25   :  { %s4856_s6 = sld [smem:[%s5700_s0 + %s4654_s28]]   ;;  %s4658_s28 = smov 29  }
  0x26   :  { %5719 = sst [smem:[#allocation92_spill]] %s4831_s27 }
  0x27   :  { %s4851_s27 = sld [smem:[%s5700_s0 + %s4653_s22]]   ;;  %s4657_s22 = smov 28  }
  0x28   :  { %s4871_s24 = sld [smem:[%s5700_s0 + %s4657_s22]]   ;;  %s4661_s22 = smov 32  }
  0x29   :  { %5720 = sst [smem:[#allocation93_spill]] %s4841_s19 }
  0x2a   :  { %5721 = sst [smem:[#allocation94_spill]] %s4846_s20 }
  0x2b   :  { %5722 = sst [smem:[#allocation95_spill]] %s4856_s6 }
  0x2c   :  { %s4861_s19 = sld [smem:[%s5700_s0 + %s4655_s7]]   ;;  %s4659_s7 = smov 30  }
  0x2d   :  { %s4866_s20 = sld [smem:[%s5700_s0 + %s4656_s15]]   ;;  %s4660_s15 = smov 31  }
  0x2e   :  { %s4876_s6 = sld [smem:[%s5700_s0 + %s4658_s28]]   ;;  %s4662_s28 = smov 33  }
  0x2f   :  { %s4881_s8 = sld [smem:[%s5700_s0 + %s4659_s7]]   ;;  %s4663_s7 = smov 34  }
  0x30   :  { %s4891_s29 = sld [smem:[%s5700_s0 + %s4661_s22]]   ;;  %s4665_s22 = smov 36  }
  0x31   :  { %s4901_s13 = sld [smem:[%s5700_s0 + %s4663_s7]]   ;;  %s4667_s7 = smov 38  }
  0x32   :  { %s4911_s5 = sld [smem:[%s5700_s0 + %s4665_s22]]   ;;  %s4669_s22 = smov 40  }
  0x33   :  { %5723 = sst [smem:[#allocation96_spill]] %s4866_s20 }
  0x34   :  { %5724 = sst [smem:[#allocation97_spill]] %s4876_s6 }
  0x35   :  { %s4886_s20 = sld [smem:[%s5700_s0 + %s4660_s15]]   ;;  %s4664_s15 = smov 35  }
  0x36   :  { %s4896_s6 = sld [smem:[%s5700_s0 + %s4662_s28]]   ;;  %s4666_s28 = smov 37  }
  0x37   :  { %5727 = sst [smem:[#allocation100_spill]] %s4901_s13 }
  0x38   :  { %5729 = sst [smem:[#allocation102_spill]] %s4911_s5 }
  0x39   :  { %s4921_s13 = sld [smem:[%s5700_s0 + %s4667_s7]]   ;;  %s4671_s7 = smov 42  }
  0x3a   :  { %s4931_s5 = sld [smem:[%s5700_s0 + %s4669_s22]]   ;;  %s4673_s22 = smov 44  }
  0x3b   :  { %5725 = sst [smem:[#allocation98_spill]] %s4886_s20 }
  0x3c   :  { %5726 = sst [smem:[#allocation99_spill]] %s4896_s6 }
  0x3d   :  { %s4906_s20 = sld [smem:[%s5700_s0 + %s4664_s15]]   ;;  %s4668_s15 = smov 39  }
  0x3e   :  { %s4916_s6 = sld [smem:[%s5700_s0 + %s4666_s28]]   ;;  %s4670_s28 = smov 41  }
  0x3f   :  { %5731 = sst [smem:[#allocation104_spill]] %s4921_s13 }
  0x40   :  { %5733 = sst [smem:[#allocation106_spill]] %s4931_s5 }
  0x41   :  { %s4941_s13 = sld [smem:[%s5700_s0 + %s4671_s7]]   ;;  %s4675_s7 = smov 46  }
  0x42   :  { %s4951_s5 = sld [smem:[%s5700_s0 + %s4673_s22]]   ;;  %s4677_s22 = smov 48  }
  0x43   :  { %5728 = sst [smem:[#allocation101_spill]] %s4906_s20 }
  0x44   :  { %5730 = sst [smem:[#allocation103_spill]] %s4916_s6 }
  0x45   :  { %s4926_s20 = sld [smem:[%s5700_s0 + %s4668_s15]]   ;;  %s4672_s15 = smov 43  }
  0x46   :  { %s4936_s6 = sld [smem:[%s5700_s0 + %s4670_s28]]   ;;  %s4674_s28 = smov 45  }
  0x47   :  { %5735 = sst [smem:[#allocation108_spill]] %s4941_s13 }
  0x48   :  { %5737 = sst [smem:[#allocation110_spill]] %s4951_s5 }
  0x49   :  { %s4961_s13 = sld [smem:[%s5700_s0 + %s4675_s7]]  }
  0x4a   :  { %s4971_s5 = sld [smem:[%s5700_s0 + %s4677_s22]]  }
  0x4b   :  { %5732 = sst [smem:[#allocation105_spill]] %s4926_s20 }
  0x4c   :  { %5734 = sst [smem:[#allocation107_spill]] %s4936_s6 }
  0x4d   :  { %s4946_s20 = sld [smem:[%s5700_s0 + %s4672_s15]]   ;;  %s4676_s15 = smov 47  }
  0x4e   :  { %s4956_s6 = sld [smem:[%s5700_s0 + %s4674_s28]]  }
  0x53   :  { %5736 = sst [smem:[#allocation109_spill]] %s4946_s20 }
  0x54   :  { %s4966_s20 = sld [smem:[%s5700_s0 + %s4676_s15]]  }
  0x55   :  { %102 = vsyncpa [#allocation3], 0 }
  0x56   :  { %103 = vsyncpa [#allocation5], 0 }
  0x57   :  { %104 = vsyncpa [#allocation8], 0 }
  0x58   :  { %105 = vsyncpa [#allocation11], 0 }
  0x59   :  { %106 = vsyncpa [#allocation14], 0 }
  0x5a   :  { %107 = vsyncpa [#allocation17], 0 }
  0x5b   :  { %108 = vsyncpa [#allocation20], 0 }
  0x5c   :  { %109 = vsyncpa [#allocation23], 0 }
  0x5d   :  { %110 = vsyncpa [#allocation26], 0 }
  0x5e   :  { %111 = vsyncpa [#allocation29], 0 }
  0x5f   :  { %112 = vsyncpa [#allocation32], 0 }
  0x60   :  { %113 = vsyncpa [#allocation35], 0 }
  0x61   :  { %114 = vsyncpa [#allocation38], 0 }
  0x62   :  { %115 = vsyncpa [#allocation41], 0 }
  0x63   :  { %116 = vsyncpa [#allocation44], 0 }
  0x64   :  { %117 = vsyncpa [#allocation47], 0 }
  0x65   :  { %118 = vsyncpa [#allocation50], 0 }
  0x66   :  { %119 = vsyncpa [#allocation53], 0 }
  0x67   :  { %120 = vsyncpa [#allocation56], 0 }
  0x68   :  { %121 = vsyncpa [#allocation59], 0  ;;  %s4678_s0 = smov [#allocation4]   ;;  %s4679_s1 = smov [#allocation7]  }
  0x69   :  { %s138_s28 = sshll.u32 %s4678_s0, 4  ;;  %s162_s2 = sshll.u32 %s4679_s1, 4  ;;  %s139_s28 = int_to_ptr.vmem [resolvable:$true] %s138_s28  ;;  %s163_s2 = int_to_ptr.vmem [resolvable:$true] %s162_s2 }
  0x6a   :  { %s3838_s7 = scalar_lea.vmem %s139_s28, 128  ;;  %p3843_p1 = scmp.lt.s32.totalorder %s139_s28, %s139_s28 }
  0x6b   :  { %p3839_p0 = scmp.ne.s32.totalorder %s139_s28, %s3838_s7  ;;  %p3844_p2 = scmp.lt.s32.totalorder %s3838_s7, %s3838_s7 }
  0x6d   :  { %p3845_p3 = por %p3844_p2, %p3843_p1 }
  0x6f   :  { %p3846_p4 = pnand %p3845_p3, %p3839_p0 }
  0x71   :  { %3849 = shalt.err (!%p3846_p4)
}
  0x72   :  { %141 = dma.hbm_to_vmem [thread:$0]  %s4736_s9, 128, %s139_s28, [#allocation5]  }
  0x73   :  { %s3858_s10 = scalar_lea.vmem %s163_s2, 128  ;;  %p3863_p6 = scmp.lt.s32.totalorder %s163_s2, %s163_s2 }
  0x74   :  { %p3859_p5 = scmp.ne.s32.totalorder %s163_s2, %s3858_s10  ;;  %p3864_p7 = scmp.lt.s32.totalorder %s3858_s10, %s3858_s10 }
  0x76   :  { %p3865_p8 = por %p3864_p7, %p3863_p6 }
  0x78   :  { %p3866_p9 = pnand %p3865_p8, %p3859_p5 }
  0x7a   :  { %3869 = shalt.err (!%p3866_p9)
}
  0x7b   :  { %165 = dma.hbm_to_vmem [thread:$0]  %s4756_s25, 128, %s163_s2, [#allocation8]  }
  0x7c   :  { %s4680_s11 = smov [#allocation10]   ;;  %s4681_s16 = smov [#allocation13]  }
  0x7d   :  { %s184_s15 = sshll.u32 %s4680_s11, 4  ;;  %s204_s18 = sshll.u32 %s4681_s16, 4  ;;  %s185_s15 = int_to_ptr.vmem [resolvable:$true] %s184_s15  ;;  %s205_s18 = int_to_ptr.vmem [resolvable:$true] %s204_s18 }
  0x7e   :  { %s3878_s22 = scalar_lea.vmem %s185_s15, 16  ;;  %s3882_s23 = scalar_lea.vmem %s185_s15, 32 }
  0x7f   :  { %p3879_p10 = scmp.ne.s32.totalorder %s185_s15, %s3878_s22  ;;  %p3883_p11 = scmp.lt.s32.totalorder %s185_s15, %s185_s15 }
  0x80   :  { %p3884_p12 = scmp.lt.s32.totalorder %s3882_s23, %s3878_s22 }
  0x82   :  { %p3885_p13 = por %p3884_p12, %p3883_p11 }
  0x84   :  { %p3886_p0 = pnand %p3885_p13, %p3879_p10 }
  0x86   :  { %3889 = shalt.err (!%p3886_p0)
}
  0x87   :  { %187 = dma.hbm_to_vmem [thread:$0]  %s4766_s3, 16, %s185_s15, [#allocation11]  }
  0x88   :  { %s3898_s9 = scalar_lea.vmem %s205_s18, 16  ;;  %s3902_s26 = scalar_lea.vmem %s205_s18, 32 }
  0x89   :  { %p3899_p1 = scmp.ne.s32.totalorder %s205_s18, %s3898_s9  ;;  %p3903_p2 = scmp.lt.s32.totalorder %s205_s18, %s205_s18 }
  0x8a   :  { %p3904_p3 = scmp.lt.s32.totalorder %s3902_s26, %s3898_s9 }
  0x8c   :  { %p3905_p4 = por %p3904_p3, %p3903_p2 }
  0x8e   :  { %p3906_p5 = pnand %p3905_p4, %p3899_p1 }
  0x90   :  { %3909 = shalt.err (!%p3906_p5)
}
  0x91   :  { %207 = dma.hbm_to_vmem [thread:$0]  %s4776_s14, 16, %s205_s18, [#allocation14]  }
  0x92   :  { %s4682_s25 = smov [#allocation16]   ;;  %s4683_s28 = smov [#allocation19]  }
  0x93   :  { %s225_s0 = sshll.u32 %s4682_s25, 4  ;;  %s248_s1 = sshll.u32 %s4683_s28, 4  ;;  %s226_s0 = int_to_ptr.vmem [resolvable:$true] %s225_s0  ;;  %s249_s1 = int_to_ptr.vmem [resolvable:$true] %s248_s1 }
  0x94   :  { %s3918_s2 = scalar_lea.vmem %s226_s0, 1024  ;;  %p3923_p7 = scmp.lt.s32.totalorder %s226_s0, %s226_s0 }
  0x95   :  { %p3919_p6 = scmp.ne.s32.totalorder %s226_s0, %s3918_s2  ;;  %p3924_p8 = scmp.lt.s32.totalorder %s3918_s2, %s3918_s2 }
  0x97   :  { %p3925_p9 = por %p3924_p8, %p3923_p7 }
  0x99   :  { %p3926_p10 = pnand %p3925_p9, %p3919_p6 }
  0x9b   :  { %3929 = shalt.err (!%p3926_p10)
}
  0x9c   :  { %s4684_s3 = smov 128   ;;  %s4685_s7 = smov 8  }
  0x9d   :  { %231 = dma.hbm_to_vmem [thread:$0]  %s4791_s30, 1024, %s226_s0, [#allocation17], %s4684_s3, %s4684_s3, %s4685_s7  }
  0x9e   :  { %s3938_s14 = scalar_lea.vmem %s249_s1, 16  ;;  %s3942_s10 = scalar_lea.vmem %s249_s1, 32 }
  0x9f   :  { %p3939_p11 = scmp.ne.s32.totalorder %s249_s1, %s3938_s14  ;;  %p3943_p12 = scmp.lt.s32.totalorder %s249_s1, %s249_s1 }
  0xa0   :  { %p3944_p13 = scmp.lt.s32.totalorder %s3942_s10, %s3938_s14 }
  0xa2   :  { %p3945_p0 = por %p3944_p13, %p3943_p12 }
  0xa4   :  { %p3946_p1 = pnand %p3945_p0, %p3939_p11 }
  0xa6   :  { %3949 = shalt.err (!%p3946_p1)
}
  0xa7   :  { %251 = dma.hbm_to_vmem [thread:$0]  %s4801_s12, 16, %s249_s1, [#allocation20]  }
  0xa8   :  { %s4686_s11 = smov [#allocation22]   ;;  %s4687_s16 = smov [#allocation25]  }
  0xa9   :  { %s270_s15 = sshll.u32 %s4686_s11, 4  ;;  %s292_s18 = sshll.u32 %s4687_s16, 4  ;;  %s271_s15 = int_to_ptr.vmem [resolvable:$true] %s270_s15  ;;  %s293_s18 = int_to_ptr.vmem [resolvable:$true] %s292_s18 }
  0xaa   :  { %s3958_s22 = scalar_lea.vmem %s271_s15, 16  ;;  %s3962_s23 = scalar_lea.vmem %s271_s15, 32 }
  0xab   :  { %p3959_p2 = scmp.ne.s32.totalorder %s271_s15, %s3958_s22  ;;  %p3963_p3 = scmp.lt.s32.totalorder %s271_s15, %s271_s15 }
  0xac   :  { %p3964_p4 = scmp.lt.s32.totalorder %s3962_s23, %s3958_s22 }
  0xae   :  { %p3965_p5 = por %p3964_p4, %p3963_p3 }
  0xb0   :  { %p3966_p6 = pnand %p3965_p5, %p3959_p2 }
  0xb2   :  { %3969 = shalt.err (!%p3966_p6)
}
  0xb3   :  { %273 = dma.hbm_to_vmem [thread:$0]  %s4816_s4, 16, %s271_s15, [#allocation23]  }
  0xb4   :  { %s3978_s30 = scalar_lea.vmem %s293_s18, 32  ;;  %p3983_p8 = scmp.lt.s32.totalorder %s293_s18, %s293_s18 }
  0xb5   :  { %p3979_p7 = scmp.ne.s32.totalorder %s293_s18, %s3978_s30  ;;  %p3984_p9 = scmp.lt.s32.totalorder %s3978_s30, %s3978_s30 }
  0xb7   :  { %p3985_p10 = por %p3984_p9, %p3983_p8 }
  0xb9   :  { %p3986_p11 = pnand %p3985_p10, %p3979_p7 }
  0xbb   :  { %3989 = shalt.err (!%p3986_p11)
}
  0xbc   :  { %295 = dma.hbm_to_vmem [thread:$0]  %s4826_s21, 32, %s293_s18, [#allocation26]  }
  0xbd   :  { %s4688_s12 = smov [#allocation28]   ;;  %s4689_s26 = smov [#allocation31]  }
  0xbe   :  { %s312_s9 = sshll.u32 %s4688_s12, 4  ;;  %s334_s25 = sshll.u32 %s4689_s26, 4  ;;  %s313_s9 = int_to_ptr.vmem [resolvable:$true] %s312_s9  ;;  %s335_s25 = int_to_ptr.vmem [resolvable:$true] %s334_s25 }
  0xbf   :  { %s3998_s0 = scalar_lea.vmem %s313_s9, 32  ;;  %p4003_p13 = scmp.lt.s32.totalorder %s313_s9, %s313_s9 }
  0xc0   :  { %p3999_p12 = scmp.ne.s32.totalorder %s313_s9, %s3998_s0  ;;  %p4004_p0 = scmp.lt.s32.totalorder %s3998_s0, %s3998_s0 }
  0xc2   :  { %p4005_p1 = por %p4004_p0, %p4003_p13 }
  0xc4   :  { %p4006_p2 = pnand %p4005_p1, %p3999_p12 }
  0xc6   :  { %4009 = shalt.err (!%p4006_p2)
}
  0xc7   :  { %315 = dma.hbm_to_vmem [thread:$0]  %s4836_s17, 32, %s313_s9, [#allocation29]  }
  0xc8   :  { %s4018_s4 = scalar_lea.vmem %s335_s25, 16  ;;  %s4022_s28 = scalar_lea.vmem %s335_s25, 32 }
  0xc9   :  { %p4019_p3 = scmp.ne.s32.totalorder %s335_s25, %s4018_s4  ;;  %p4023_p4 = scmp.lt.s32.totalorder %s335_s25, %s335_s25 }
  0xca   :  { %p4024_p5 = scmp.lt.s32.totalorder %s4022_s28, %s4018_s4 }
  0xcc   :  { %p4025_p6 = por %p4024_p5, %p4023_p4 }
  0xce   :  { %p4026_p7 = pnand %p4025_p6, %p4019_p3 }
  0xd0   :  { %4029 = shalt.err (!%p4026_p7)
}
  0xd1   :  { %337 = dma.hbm_to_vmem [thread:$0]  %s4851_s27, 16, %s335_s25, [#allocation32]  }
  0xd2   :  { %s4690_s21 = smov [#allocation34]   ;;  %s4691_s2 = smov [#allocation37]  }
  0xd3   :  { %s354_s1 = sshll.u32 %s4690_s21, 4  ;;  %s374_s14 = sshll.u32 %s4691_s2, 4  ;;  %s355_s1 = int_to_ptr.vmem [resolvable:$true] %s354_s1  ;;  %s375_s14 = int_to_ptr.vmem [resolvable:$true] %s374_s14 }
  0xd4   :  { %s4038_s10 = scalar_lea.vmem %s355_s1, 16  ;;  %s4042_s11 = scalar_lea.vmem %s355_s1, 32 }
  0xd5   :  { %p4039_p8 = scmp.ne.s32.totalorder %s355_s1, %s4038_s10  ;;  %p4043_p9 = scmp.lt.s32.totalorder %s355_s1, %s355_s1 }
  0xd6   :  { %p4044_p10 = scmp.lt.s32.totalorder %s4042_s11, %s4038_s10 }
  0xd8   :  { %p4045_p11 = por %p4044_p10, %p4043_p9 }
  0xda   :  { %p4046_p12 = pnand %p4045_p11, %p4039_p8 }
  0xdc   :  { %4049 = shalt.err (!%p4046_p12)
}
  0xdd   :  { %357 = dma.hbm_to_vmem [thread:$0]  %s4861_s19, 16, %s355_s1, [#allocation35]  }
  0xde   :  { %s4058_s17 = scalar_lea.vmem %s375_s14, 96  ;;  %p4063_p0 = scmp.lt.s32.totalorder %s375_s14, %s375_s14 }
  0xdf   :  { %p4059_p13 = scmp.ne.s32.totalorder %s375_s14, %s4058_s17  ;;  %p4064_p1 = scmp.lt.s32.totalorder %s4058_s17, %s4058_s17 }
  0xe1   :  { %p4065_p2 = por %p4064_p1, %p4063_p0 }
  0xe3   :  { %p4066_p3 = pnand %p4065_p2, %p4059_p13 }
  0xe5   :  { %4069 = shalt.err (!%p4066_p3)
}
  0xe6   :  { %377 = dma.hbm_to_vmem [thread:$0]  %s4871_s24, 96, %s375_s14, [#allocation38]  }
  0xe7   :  { %s4692_s27 = smov [#allocation40]   ;;  %s4693_s16 = smov [#allocation43]  }
  0xe8   :  { %s394_s15 = sshll.u32 %s4692_s27, 4  ;;  %s414_s18 = sshll.u32 %s4693_s16, 4  ;;  %s395_s15 = int_to_ptr.vmem [resolvable:$true] %s394_s15  ;;  %s415_s18 = int_to_ptr.vmem [resolvable:$true] %s414_s18 }
  0xe9   :  { %s4078_s22 = scalar_lea.vmem %s395_s15, 16  ;;  %s4082_s23 = scalar_lea.vmem %s395_s15, 32 }
  0xea   :  { %p4079_p4 = scmp.ne.s32.totalorder %s395_s15, %s4078_s22  ;;  %p4083_p5 = scmp.lt.s32.totalorder %s395_s15, %s395_s15 }
  0xeb   :  { %p4084_p6 = scmp.lt.s32.totalorder %s4082_s23, %s4078_s22 }
  0xed   :  { %p4085_p7 = por %p4084_p6, %p4083_p5 }
  0xef   :  { %p4086_p8 = pnand %p4085_p7, %p4079_p4 }
  0xf1   :  { %4089 = shalt.err (!%p4086_p8)
}
  0xf2   :  { %397 = dma.hbm_to_vmem [thread:$0]  %s4881_s8, 16, %s395_s15, [#allocation41]  }
  0xf3   :  { %s4098_s19 = scalar_lea.vmem %s415_s18, 16  ;;  %s4102_s30 = scalar_lea.vmem %s415_s18, 32 }
  0xf4   :  { %p4099_p9 = scmp.ne.s32.totalorder %s415_s18, %s4098_s19  ;;  %p4103_p10 = scmp.lt.s32.totalorder %s415_s18, %s415_s18 }
  0xf5   :  { %p4104_p11 = scmp.lt.s32.totalorder %s4102_s30, %s4098_s19 }
  0xf7   :  { %p4105_p12 = por %p4104_p11, %p4103_p10 }
  0xf9   :  { %p4106_p13 = pnand %p4105_p12, %p4099_p9 }
  0xfb   :  { %4109 = shalt.err (!%p4106_p13)
}
  0xfc   :  { %417 = dma.hbm_to_vmem [thread:$0]  %s4891_s29, 16, %s415_s18, [#allocation44]  }
  0xfd   :  { %s4694_s24 = smov [#allocation46]   ;;  %s4695_s9 = smov [#allocation49]  }
  0xfe   :  { %s435_s12 = sshll.u32 %s4694_s24, 4  ;;  %s459_s26 = sshll.u32 %s4695_s9, 4  ;;  %s436_s12 = int_to_ptr.vmem [resolvable:$true] %s435_s12  ;;  %s460_s26 = int_to_ptr.vmem [resolvable:$true] %s459_s26 }
  0xff   :  { %s4118_s25 = scalar_lea.vmem %s436_s12, 1024  ;;  %p4123_p1 = scmp.lt.s32.totalorder %s436_s12, %s436_s12 }
 0x100   :  { %p4119_p0 = scmp.ne.s32.totalorder %s436_s12, %s4118_s25  ;;  %p4124_p2 = scmp.lt.s32.totalorder %s4118_s25, %s4118_s25 }
 0x102   :  { %p4125_p3 = por %p4124_p2, %p4123_p1 }
 0x104   :  { %p4126_p4 = pnand %p4125_p3, %p4119_p0 }
 0x106   :  { %4129 = shalt.err (!%p4126_p4)
}
 0x107   :  { %s5738_s8 = sld [smem:[#allocation101_spill]]  ;;  %s4138_s0 = scalar_lea.vmem %s460_s26, 1024 }
 0x108   :  { %p4139_p5 = scmp.ne.s32.totalorder %s460_s26, %s4138_s0  ;;  %p4143_p6 = scmp.lt.s32.totalorder %s460_s26, %s460_s26 }
 0x109   :  { %p4144_p7 = scmp.lt.s32.totalorder %s4138_s0, %s4138_s0 }
 0x10b   :  { %p4145_p8 = por %p4144_p7, %p4143_p6 }
 0x10d   :  { %441 = dma.hbm_to_vmem [thread:$0]  %s5738_s8, 1024, %s436_s12, [#allocation47], %s4684_s3, %s4684_s3, %s4685_s7  }
 0x10e   :  { %p4146_p9 = pnand %p4145_p8, %p4139_p5 }
 0x110   :  { %4149 = shalt.err (!%p4146_p9)
}
 0x111   :  { %s5739_s29 = sld [smem:[#allocation103_spill]]  ;;  %s4696_s4 = smov [#allocation52]  }
 0x112   :  { %s486_s28 = sshll.u32 %s4696_s4, 4  ;;  %s4697_s21 = smov [#allocation55]   ;;  %s487_s28 = int_to_ptr.vmem [resolvable:$true] %s486_s28 }
 0x113   :  { %s508_s1 = sshll.u32 %s4697_s21, 4  ;;  %s4158_s2 = scalar_lea.vmem %s487_s28, 16  ;;  %s509_s1 = int_to_ptr.vmem [resolvable:$true] %s508_s1 }
 0x114   :  { %p4159_p10 = scmp.ne.s32.totalorder %s487_s28, %s4158_s2  ;;  %s4162_s14 = scalar_lea.vmem %s487_s28, 32 }
 0x115   :  { %p4163_p11 = scmp.lt.s32.totalorder %s487_s28, %s487_s28  ;;  %p4164_p12 = scmp.lt.s32.totalorder %s4162_s14, %s4158_s2 }
 0x117   :  { %465 = dma.hbm_to_vmem [thread:$0]  %s5739_s29, 1024, %s460_s26, [#allocation50], %s4684_s3, %s4684_s3, %s4685_s7  }
 0x118   :  { %p4165_p13 = por %p4164_p12, %p4163_p11 }
 0x11a   :  { %p4166_p0 = pnand %p4165_p13, %p4159_p10 }
 0x11c   :  { %4169 = shalt.err (!%p4166_p0)
}
 0x11d   :  { %s5740_s10 = sld [smem:[#allocation107_spill]]  ;;  %s4178_s11 = scalar_lea.vmem %s509_s1, 16 }
 0x11e   :  { %p4179_p1 = scmp.ne.s32.totalorder %s509_s1, %s4178_s11  ;;  %s4182_s17 = scalar_lea.vmem %s509_s1, 32 }
 0x11f   :  { %p4183_p2 = scmp.lt.s32.totalorder %s509_s1, %s509_s1  ;;  %p4184_p3 = scmp.lt.s32.totalorder %s4182_s17, %s4178_s11 }
 0x121   :  { %p4185_p4 = por %p4184_p3, %p4183_p2 }
 0x123   :  { %489 = dma.hbm_to_vmem [thread:$0]  %s5740_s10, 16, %s487_s28, [#allocation53]  }
 0x124   :  { %p4186_p5 = pnand %p4185_p4, %p4179_p1 }
 0x126   :  { %4189 = shalt.err (!%p4186_p5)
}
 0x127   :  { %s5741_s27 = sld [smem:[#allocation110_spill]]  ;;  %s4698_s15 = smov [#allocation2]  }
 0x128   :  { %s128_s16 = sshll.u32 %s4698_s15, 4  ;;  %s4699_s18 = smov [#allocation6]   ;;  %s129_s16 = int_to_ptr.vmem [resolvable:$true] %s128_s16 }
 0x129   :  { %s148_s22 = sshll.u32 %s4699_s18, 4  ;;  %s4198_s23 = scalar_lea.vmem %s129_s16, 128  ;;  %s149_s22 = int_to_ptr.vmem [resolvable:$true] %s148_s22 }
 0x12a   :  { %p4199_p6 = scmp.ne.s32.totalorder %s129_s16, %s4198_s23  ;;  %p4203_p7 = scmp.lt.s32.totalorder %s129_s16, %s129_s16 }
 0x12b   :  { %p4204_p8 = scmp.lt.s32.totalorder %s4198_s23, %s4198_s23 }
 0x12d   :  { %511 = dma.hbm_to_vmem [thread:$0]  %s5741_s27, 16, %s509_s1, [#allocation56]  }
 0x12e   :  { %p4205_p9 = por %p4204_p8, %p4203_p7 }
 0x130   :  { %p4206_p10 = pnand %p4205_p9, %p4199_p6 }
 0x132   :  { %4209 = shalt.err (!%p4206_p10)
}
 0x133   :  { %s5742_s19 = sld [smem:[#allocation80_spill]]  ;;  %s4218_s30 = scalar_lea.vmem %s149_s22, 128 }
 0x134   :  { %p4219_p11 = scmp.ne.s32.totalorder %s149_s22, %s4218_s30  ;;  %p4223_p12 = scmp.lt.s32.totalorder %s149_s22, %s149_s22 }
 0x135   :  { %p4224_p13 = scmp.lt.s32.totalorder %s4218_s30, %s4218_s30 }
 0x137   :  { %p4225_p0 = por %p4224_p13, %p4223_p12 }
 0x139   :  { %131 = dma.hbm_to_vmem [thread:$0]  %s5742_s19, 128, %s129_s16, [#allocation3]  }
 0x13a   :  { %p4226_p1 = pnand %p4225_p0, %p4219_p11 }
 0x13c   :  { %4229 = shalt.err (!%p4226_p1)
}
 0x13d   :  { %s5743_s24 = sld [smem:[#allocation81_spill]]  ;;  %s4700_s12 = smov [#allocation9]  }
 0x13e   :  { %s171_s9 = sshll.u32 %s4700_s12, 4  ;;  %s4701_s26 = smov [#allocation12]   ;;  %s172_s9 = int_to_ptr.vmem [resolvable:$true] %s171_s9 }
 0x13f   :  { %s194_s25 = sshll.u32 %s4701_s26, 4  ;;  %s4238_s8 = scalar_lea.vmem %s172_s9, 512  ;;  %s195_s25 = int_to_ptr.vmem [resolvable:$true] %s194_s25 }
 0x140   :  { %p4239_p2 = scmp.ne.s32.totalorder %s172_s9, %s4238_s8  ;;  %p4243_p3 = scmp.lt.s32.totalorder %s172_s9, %s172_s9 }
 0x141   :  { %p4244_p4 = scmp.lt.s32.totalorder %s4238_s8, %s4238_s8 }
 0x143   :  { %151 = dma.hbm_to_vmem [thread:$0]  %s5743_s24, 128, %s149_s22, [#allocation5]  }
 0x144   :  { %p4245_p5 = por %p4244_p4, %p4243_p3 }
 0x146   :  { %p4246_p6 = pnand %p4245_p5, %p4239_p2 }
 0x148   :  { %4249 = shalt.err (!%p4246_p6)
}
 0x149   :  { %s5744_s0 = sld [smem:[#allocation84_spill]]  ;;  %s4258_s29 = scalar_lea.vmem %s195_s25, 16 }
 0x14a   :  { %p4259_p7 = scmp.ne.s32.totalorder %s195_s25, %s4258_s29  ;;  %s4262_s4 = scalar_lea.vmem %s195_s25, 32 }
 0x14b   :  { %p4263_p8 = scmp.lt.s32.totalorder %s195_s25, %s195_s25  ;;  %p4264_p9 = scmp.lt.s32.totalorder %s4262_s4, %s4258_s29 }
 0x14d   :  { %p4265_p10 = por %p4264_p9, %p4263_p8 }
 0x14f   :  { %177 = dma.hbm_to_vmem [thread:$0]  %s5744_s0, 512, %s172_s9, [#allocation8], %s4684_s3, %s4684_s3, %s4685_s7  }
 0x150   :  { %p4266_p11 = pnand %p4265_p10, %p4259_p7 }
 0x152   :  { %4269 = shalt.err (!%p4266_p11)
}
 0x153   :  { %s5745_s28 = sld [smem:[#allocation85_spill]]  ;;  %s4702_s21 = smov [#allocation15]  }
 0x154   :  { %s216_s1 = sshll.u32 %s4702_s21, 4  ;;  %s4703_s2 = smov [#allocation18]   ;;  %s217_s1 = int_to_ptr.vmem [resolvable:$true] %s216_s1 }
 0x155   :  { %s238_s14 = sshll.u32 %s4703_s2, 4  ;;  %s4278_s10 = scalar_lea.vmem %s217_s1, 16  ;;  %s239_s14 = int_to_ptr.vmem [resolvable:$true] %s238_s14 }
 0x156   :  { %p4279_p12 = scmp.ne.s32.totalorder %s217_s1, %s4278_s10  ;;  %s4282_s11 = scalar_lea.vmem %s217_s1, 32 }
 0x157   :  { %p4283_p13 = scmp.lt.s32.totalorder %s217_s1, %s217_s1  ;;  %p4284_p0 = scmp.lt.s32.totalorder %s4282_s11, %s4278_s10 }
 0x159   :  { %197 = dma.hbm_to_vmem [thread:$0]  %s5745_s28, 16, %s195_s25, [#allocation11]  }
 0x15a   :  { %p4285_p1 = por %p4284_p0, %p4283_p13 }
 0x15c   :  { %p4286_p2 = pnand %p4285_p1, %p4279_p12 }
 0x15e   :  { %4289 = shalt.err (!%p4286_p2)
}
 0x15f   :  { %s5746_s17 = sld [smem:[#allocation87_spill]]  ;;  %s4298_s27 = scalar_lea.vmem %s239_s14, 16 }
 0x160   :  { %p4299_p3 = scmp.ne.s32.totalorder %s239_s14, %s4298_s27  ;;  %s4302_s15 = scalar_lea.vmem %s239_s14, 32 }
 0x161   :  { %p4303_p4 = scmp.lt.s32.totalorder %s239_s14, %s239_s14  ;;  %p4304_p5 = scmp.lt.s32.totalorder %s4302_s15, %s4298_s27 }
 0x163   :  { %p4305_p6 = por %p4304_p5, %p4303_p4 }
 0x165   :  { %219 = dma.hbm_to_vmem [thread:$0]  %s5746_s17, 16, %s217_s1, [#allocation14]  }
 0x166   :  { %p4306_p7 = pnand %p4305_p6, %p4299_p3 }
 0x168   :  { %4309 = shalt.err (!%p4306_p7)
}
 0x169   :  { %s5747_s16 = sld [smem:[#allocation88_spill]]  ;;  %s4704_s18 = smov [#allocation21]  }
 0x16a   :  { %s258_s22 = sshll.u32 %s4704_s18, 4  ;;  %s4705_s23 = smov [#allocation24]   ;;  %s259_s22 = int_to_ptr.vmem [resolvable:$true] %s258_s22 }
 0x16b   :  { %s279_s19 = sshll.u32 %s4705_s23, 4  ;;  %s4318_s30 = scalar_lea.vmem %s259_s22, 16  ;;  %s280_s19 = int_to_ptr.vmem [resolvable:$true] %s279_s19 }
 0x16c   :  { %p4319_p8 = scmp.ne.s32.totalorder %s259_s22, %s4318_s30  ;;  %s4322_s24 = scalar_lea.vmem %s259_s22, 32 }
 0x16d   :  { %p4323_p9 = scmp.lt.s32.totalorder %s259_s22, %s259_s22  ;;  %p4324_p10 = scmp.lt.s32.totalorder %s4322_s24, %s4318_s30 }
 0x16f   :  { %241 = dma.hbm_to_vmem [thread:$0]  %s5747_s16, 16, %s239_s14, [#allocation17]  }
 0x170   :  { %p4325_p11 = por %p4324_p10, %p4323_p9 }
 0x172   :  { %p4326_p12 = pnand %p4325_p11, %p4319_p8 }
 0x174   :  { %4329 = shalt.err (!%p4326_p12)
}
 0x175   :  { %s5748_s12 = sld [smem:[#allocation89_spill]]  ;;  %s4338_s9 = scalar_lea.vmem %s280_s19, 8192 }
 0x176   :  { %p4339_p13 = scmp.ne.s32.totalorder %s280_s19, %s4338_s9  ;;  %p4343_p0 = scmp.lt.s32.totalorder %s280_s19, %s280_s19 }
 0x177   :  { %p4344_p1 = scmp.lt.s32.totalorder %s4338_s9, %s4338_s9 }
 0x179   :  { %p4345_p2 = por %p4344_p1, %p4343_p0 }
 0x17b   :  { %261 = dma.hbm_to_vmem [thread:$0]  %s5748_s12, 16, %s259_s22, [#allocation20]  }
 0x17c   :  { %p4346_p3 = pnand %p4345_p2, %p4339_p13 }
 0x17e   :  { %4349 = shalt.err (!%p4346_p3)
}
 0x17f   :  { %s4706_s26 = smov 256   ;;  %s5749_s25 = sld [smem:[#allocation91_spill]] }
 0x180   :  { %s4707_s8 = smov 16   ;;  %s4708_s0 = smov [#allocation27]  }
 0x181   :  { %s302_s29 = sshll.u32 %s4708_s0, 4  ;;  %s4709_s4 = smov [#allocation30]   ;;  %s303_s29 = int_to_ptr.vmem [resolvable:$true] %s302_s29 }
 0x182   :  { %s324_s28 = sshll.u32 %s4709_s4, 4  ;;  %s4358_s21 = scalar_lea.vmem %s303_s29, 32  ;;  %s325_s28 = int_to_ptr.vmem [resolvable:$true] %s324_s28 }
 0x183   :  { %p4359_p4 = scmp.ne.s32.totalorder %s303_s29, %s4358_s21  ;;  %p4363_p5 = scmp.lt.s32.totalorder %s303_s29, %s303_s29 }
 0x184   :  { %p4364_p6 = scmp.lt.s32.totalorder %s4358_s21, %s4358_s21 }
 0x185   :  { %285 = dma.hbm_to_vmem [thread:$0]  %s5749_s25, 8192, %s280_s19, [#allocation23], %s4706_s26, %s4706_s26, %s4707_s8  }
 0x186   :  { %p4365_p7 = por %p4364_p6, %p4363_p5 }
 0x188   :  { %p4366_p8 = pnand %p4365_p7, %p4359_p4 }
 0x18a   :  { %4369 = shalt.err (!%p4366_p8)
}
 0x18b   :  { %s5750_s1 = sld [smem:[#allocation92_spill]]  ;;  %s4378_s2 = scalar_lea.vmem %s325_s28, 96 }
 0x18c   :  { %p4379_p9 = scmp.ne.s32.totalorder %s325_s28, %s4378_s2  ;;  %p4383_p10 = scmp.lt.s32.totalorder %s325_s28, %s325_s28 }
 0x18d   :  { %p4384_p11 = scmp.lt.s32.totalorder %s4378_s2, %s4378_s2 }
 0x18f   :  { %p4385_p12 = por %p4384_p11, %p4383_p10 }
 0x191   :  { %305 = dma.hbm_to_vmem [thread:$0]  %s5750_s1, 32, %s303_s29, [#allocation26]  }
 0x192   :  { %p4386_p13 = pnand %p4385_p12, %p4379_p9 }
 0x194   :  { %4389 = shalt.err (!%p4386_p13)
}
 0x195   :  { %s5751_s14 = sld [smem:[#allocation94_spill]]  ;;  %s4710_s10 = smov [#allocation33]  }
 0x196   :  { %s344_s11 = sshll.u32 %s4710_s10, 4  ;;  %s4711_s17 = smov [#allocation36]   ;;  %s345_s11 = int_to_ptr.vmem [resolvable:$true] %s344_s11 }
 0x197   :  { %s364_s27 = sshll.u32 %s4711_s17, 4  ;;  %s4398_s15 = scalar_lea.vmem %s345_s11, 16  ;;  %s365_s27 = int_to_ptr.vmem [resolvable:$true] %s364_s27 }
 0x198   :  { %p4399_p0 = scmp.ne.s32.totalorder %s345_s11, %s4398_s15  ;;  %s4402_s16 = scalar_lea.vmem %s345_s11, 32 }
 0x199   :  { %p4403_p1 = scmp.lt.s32.totalorder %s345_s11, %s345_s11  ;;  %p4404_p2 = scmp.lt.s32.totalorder %s4402_s16, %s4398_s15 }
 0x19b   :  { %327 = dma.hbm_to_vmem [thread:$0]  %s5751_s14, 96, %s325_s28, [#allocation29]  }
 0x19c   :  { %p4405_p3 = por %p4404_p2, %p4403_p1 }
 0x19e   :  { %p4406_p4 = pnand %p4405_p3, %p4399_p0 }
 0x1a0   :  { %4409 = shalt.err (!%p4406_p4)
}
 0x1a1   :  { %s5752_s18 = sld [smem:[#allocation95_spill]]  ;;  %s4418_s22 = scalar_lea.vmem %s365_s27, 16 }
 0x1a2   :  { %p4419_p5 = scmp.ne.s32.totalorder %s365_s27, %s4418_s22  ;;  %s4422_s23 = scalar_lea.vmem %s365_s27, 32 }
 0x1a3   :  { %p4423_p6 = scmp.lt.s32.totalorder %s365_s27, %s365_s27  ;;  %p4424_p7 = scmp.lt.s32.totalorder %s4422_s23, %s4418_s22 }
 0x1a5   :  { %p4425_p8 = por %p4424_p7, %p4423_p6 }
 0x1a7   :  { %347 = dma.hbm_to_vmem [thread:$0]  %s5752_s18, 16, %s345_s11, [#allocation32]  }
 0x1a8   :  { %p4426_p9 = pnand %p4425_p8, %p4419_p5 }
 0x1aa   :  { %4429 = shalt.err (!%p4426_p9)
}
 0x1ab   :  { %s5753_s19 = sld [smem:[#allocation96_spill]]  ;;  %s4712_s30 = smov [#allocation39]  }
 0x1ac   :  { %s384_s24 = sshll.u32 %s4712_s30, 4  ;;  %s4713_s12 = smov [#allocation42]   ;;  %s385_s24 = int_to_ptr.vmem [resolvable:$true] %s384_s24 }
 0x1ad   :  { %s404_s9 = sshll.u32 %s4713_s12, 4  ;;  %s4438_s26 = scalar_lea.vmem %s385_s24, 16  ;;  %s405_s9 = int_to_ptr.vmem [resolvable:$true] %s404_s9 }
 0x1ae   :  { %p4439_p10 = scmp.ne.s32.totalorder %s385_s24, %s4438_s26  ;;  %s4442_s25 = scalar_lea.vmem %s385_s24, 32 }
 0x1af   :  { %p4443_p11 = scmp.lt.s32.totalorder %s385_s24, %s385_s24  ;;  %p4444_p12 = scmp.lt.s32.totalorder %s4442_s25, %s4438_s26 }
 0x1b1   :  { %367 = dma.hbm_to_vmem [thread:$0]  %s5753_s19, 16, %s365_s27, [#allocation35]  }
 0x1b2   :  { %p4445_p13 = por %p4444_p12, %p4443_p11 }
 0x1b4   :  { %p4446_p0 = pnand %p4445_p13, %p4439_p10 }
 0x1b6   :  { %4449 = shalt.err (!%p4446_p0)
}
 0x1b7   :  { %s5754_s8 = sld [smem:[#allocation97_spill]]  ;;  %s4458_s0 = scalar_lea.vmem %s405_s9, 16 }
 0x1b8   :  { %p4459_p1 = scmp.ne.s32.totalorder %s405_s9, %s4458_s0  ;;  %s4462_s29 = scalar_lea.vmem %s405_s9, 32 }
 0x1b9   :  { %p4463_p2 = scmp.lt.s32.totalorder %s405_s9, %s405_s9  ;;  %p4464_p3 = scmp.lt.s32.totalorder %s4462_s29, %s4458_s0 }
 0x1bb   :  { %p4465_p4 = por %p4464_p3, %p4463_p2 }
 0x1bd   :  { %387 = dma.hbm_to_vmem [thread:$0]  %s5754_s8, 16, %s385_s24, [#allocation38]  }
 0x1be   :  { %p4466_p5 = pnand %p4465_p4, %p4459_p1 }
 0x1c0   :  { %4469 = shalt.err (!%p4466_p5)
}
 0x1c1   :  { %s5755_s4 = sld [smem:[#allocation98_spill]]  ;;  %s4714_s28 = smov [#allocation45]  }
 0x1c2   :  { %s424_s21 = sshll.u32 %s4714_s28, 4  ;;  %s4715_s1 = smov [#allocation48]   ;;  %s425_s21 = int_to_ptr.vmem [resolvable:$true] %s424_s21 }
 0x1c3   :  { %s447_s2 = sshll.u32 %s4715_s1, 4  ;;  %s4478_s14 = scalar_lea.vmem %s425_s21, 96  ;;  %s448_s2 = int_to_ptr.vmem [resolvable:$true] %s447_s2 }
 0x1c4   :  { %p4479_p6 = scmp.ne.s32.totalorder %s425_s21, %s4478_s14  ;;  %p4483_p7 = scmp.lt.s32.totalorder %s425_s21, %s425_s21 }
 0x1c5   :  { %p4484_p8 = scmp.lt.s32.totalorder %s4478_s14, %s4478_s14 }
 0x1c7   :  { %407 = dma.hbm_to_vmem [thread:$0]  %s5755_s4, 16, %s405_s9, [#allocation41]  }
 0x1c8   :  { %p4485_p9 = por %p4484_p8, %p4483_p7 }
 0x1ca   :  { %p4486_p10 = pnand %p4485_p9, %p4479_p6 }
 0x1cc   :  { %4489 = shalt.err (!%p4486_p10)
}
 0x1cd   :  { %s5756_s10 = sld [smem:[#allocation99_spill]]  ;;  %s4498_s11 = scalar_lea.vmem %s448_s2, 512 }
 0x1ce   :  { %p4499_p11 = scmp.ne.s32.totalorder %s448_s2, %s4498_s11  ;;  %p4503_p12 = scmp.lt.s32.totalorder %s448_s2, %s448_s2 }
 0x1cf   :  { %p4504_p13 = scmp.lt.s32.totalorder %s4498_s11, %s4498_s11 }
 0x1d1   :  { %p4505_p0 = por %p4504_p13, %p4503_p12 }
 0x1d3   :  { %427 = dma.hbm_to_vmem [thread:$0]  %s5756_s10, 96, %s425_s21, [#allocation44]  }
 0x1d4   :  { %p4506_p1 = pnand %p4505_p0, %p4499_p11 }
 0x1d6   :  { %4509 = shalt.err (!%p4506_p1)
}
 0x1d7   :  { %s5757_s17 = sld [smem:[#allocation102_spill]]  ;;  %s4716_s27 = smov [#allocation51]  }
 0x1d8   :  { %s476_s15 = sshll.u32 %s4716_s27, 4  ;;  %s4717_s16 = smov [#allocation54]   ;;  %s477_s15 = int_to_ptr.vmem [resolvable:$true] %s476_s15 }
 0x1d9   :  { %s498_s18 = sshll.u32 %s4717_s16, 4  ;;  %s4518_s22 = scalar_lea.vmem %s477_s15, 16  ;;  %s499_s18 = int_to_ptr.vmem [resolvable:$true] %s498_s18 }
 0x1da   :  { %p4519_p2 = scmp.ne.s32.totalorder %s477_s15, %s4518_s22  ;;  %s4522_s23 = scalar_lea.vmem %s477_s15, 32 }
 0x1db   :  { %p4523_p3 = scmp.lt.s32.totalorder %s477_s15, %s477_s15  ;;  %p4524_p4 = scmp.lt.s32.totalorder %s4522_s23, %s4518_s22 }
 0x1dd   :  { %453 = dma.hbm_to_vmem [thread:$0]  %s5757_s17, 512, %s448_s2, [#allocation47], %s4684_s3, %s4684_s3, %s4685_s7  }
 0x1de   :  { %p4525_p5 = por %p4524_p4, %p4523_p3 }
 0x1e0   :  { %p4526_p6 = pnand %p4525_p5, %p4519_p2 }
 0x1e2   :  { %4529 = shalt.err (!%p4526_p6)
}
 0x1e3   :  { %s5758_s19 = sld [smem:[#allocation106_spill]]  ;;  %s4538_s30 = scalar_lea.vmem %s499_s18, 16 }
 0x1e4   :  { %p4539_p7 = scmp.ne.s32.totalorder %s499_s18, %s4538_s30  ;;  %s4542_s24 = scalar_lea.vmem %s499_s18, 32 }
 0x1e5   :  { %p4543_p8 = scmp.lt.s32.totalorder %s499_s18, %s499_s18  ;;  %p4544_p9 = scmp.lt.s32.totalorder %s4542_s24, %s4538_s30 }
 0x1e7   :  { %p4545_p10 = por %p4544_p9, %p4543_p8 }
 0x1e9   :  { %479 = dma.hbm_to_vmem [thread:$0]  %s5758_s19, 16, %s477_s15, [#allocation50]  }
 0x1ea   :  { %p4546_p11 = pnand %p4545_p10, %p4539_p7 }
 0x1ec   :  { %4549 = shalt.err (!%p4546_p11)
}
 0x1ed   :  { %s5759_s3 = sld [smem:[#allocation109_spill]]  ;;  %s4718_s7 = smov [#allocation57]  }
 0x1ee   :  { %s518_s12 = sshll.u32 %s4718_s7, 4  ;;  %s4719_s9 = smov [#allocation58]   ;;  %s519_s12 = int_to_ptr.vmem [resolvable:$true] %s518_s12 }
 0x1ef   :  { %s530_s26 = sshll.u32 %s4719_s9, 4  ;;  %s4558_s25 = scalar_lea.vmem %s519_s12, 16  ;;  %s531_s26 = int_to_ptr.vmem [resolvable:$true] %s530_s26 }
 0x1f0   :  { %p4559_p12 = scmp.ne.s32.totalorder %s519_s12, %s4558_s25  ;;  %s4562_s8 = scalar_lea.vmem %s519_s12, 32 }
 0x1f1   :  { %p4563_p13 = scmp.lt.s32.totalorder %s519_s12, %s519_s12  ;;  %p4564_p0 = scmp.lt.s32.totalorder %s4562_s8, %s4558_s25 }
 0x1f3   :  { %501 = dma.hbm_to_vmem [thread:$0]  %s5759_s3, 16, %s499_s18, [#allocation53]  }
 0x1f4   :  { %p4565_p1 = por %p4564_p0, %p4563_p13 }
 0x1f6   :  { %p4566_p2 = pnand %p4565_p1, %p4559_p12 }
 0x1f8   :  { %4569 = shalt.err (!%p4566_p2)
}
 0x1f9   :  { %521 = dma.hbm_to_vmem [thread:$0]  %s4956_s6, 16, %s519_s12, [#allocation56]  }
 0x1fa   :  { %s4578_s0 = scalar_lea.vmem %s531_s26, 16  ;;  %s4582_s29 = scalar_lea.vmem %s531_s26, 32 }
 0x1fb   :  { %p4579_p3 = scmp.ne.s32.totalorder %s531_s26, %s4578_s0  ;;  %p4583_p4 = scmp.lt.s32.totalorder %s531_s26, %s531_s26 }
 0x1fc   :  { %p4584_p5 = scmp.lt.s32.totalorder %s4582_s29, %s4578_s0 }
 0x1fe   :  { %p4585_p6 = por %p4584_p5, %p4583_p4 }
 0x200   :  { %p4586_p7 = pnand %p4585_p6, %p4579_p3 }
 0x202   :  { %4589 = shalt.err (!%p4586_p7)
}
 0x203   :  { %533 = dma.hbm_to_vmem [thread:$0]  %s4966_s20, 16, %s531_s26, [#allocation59]  }
 0x204   :  { %4590 = dma.done.wait [#allocation3], 128  }
 0x205   :  { %4591 = vsyncadd [#allocation3], 4294967168 }
 0x206   :  { %4592 = dma.done.wait [#allocation5], 256  }
 0x207   :  { %4593 = vsyncadd [#allocation5], 4294967040 }
 0x208   :  { %4594 = dma.done.wait [#allocation8], 640  }
 0x209   :  { %4595 = vsyncadd [#allocation8], 4294966656 }
 0x20a   :  { %4596 = dma.done.wait [#allocation11], 32  }
 0x20b   :  { %4597 = vsyncadd [#allocation11], 4294967264 }
 0x20c   :  { %4598 = dma.done.wait [#allocation14], 32  }
 0x20d   :  { %4599 = vsyncadd [#allocation14], 4294967264 }
 0x20e   :  { %4600 = dma.done.wait [#allocation17], 1040  }
 0x20f   :  { %4601 = vsyncadd [#allocation17], 4294966256 }
 0x210   :  { %4602 = dma.done.wait [#allocation20], 32  }
 0x211   :  { %4603 = vsyncadd [#allocation20], 4294967264 }
 0x212   :  { %4604 = dma.done.wait [#allocation23], 8208  }
 0x213   :  { %4605 = vsyncadd [#allocation23], 4294959088 }
 0x214   :  { %4606 = dma.done.wait [#allocation26], 64  }
 0x215   :  { %4607 = vsyncadd [#allocation26], 4294967232 }
 0x216   :  { %4608 = dma.done.wait [#allocation29], 128  }
 0x217   :  { %4609 = vsyncadd [#allocation29], 4294967168 }
 0x218   :  { %4610 = dma.done.wait [#allocation32], 32  }
 0x219   :  { %4611 = vsyncadd [#allocation32], 4294967264 }
 0x21a   :  { %4612 = dma.done.wait [#allocation35], 32  }
 0x21b   :  { %4613 = vsyncadd [#allocation35], 4294967264 }
 0x21c   :  { %4614 = dma.done.wait [#allocation38], 112  }
 0x21d   :  { %4615 = vsyncadd [#allocation38], 4294967184 }
 0x21e   :  { %4616 = dma.done.wait [#allocation41], 32  }
 0x21f   :  { %4617 = vsyncadd [#allocation41], 4294967264 }
 0x220   :  { %4618 = dma.done.wait [#allocation44], 112  }
 0x221   :  { %4619 = vsyncadd [#allocation44], 4294967184 }
 0x222   :  { %4620 = dma.done.wait [#allocation47], 1536  }
 0x223   :  { %4621 = vsyncadd [#allocation47], 4294965760 }
 0x224   :  { %4622 = dma.done.wait [#allocation50], 1040  }
 0x225   :  { %4623 = vsyncadd [#allocation50], 4294966256 }
 0x226   :  { %4624 = dma.done.wait [#allocation53], 32  }
 0x227   :  { %4625 = vsyncadd [#allocation53], 4294967264 }
 0x228   :  { %4626 = dma.done.wait [#allocation56], 32  }
 0x229   :  { %4627 = vsyncadd [#allocation56], 4294967264 }
 0x22a   :  { %4628 = dma.done.wait [#allocation59], 16  }
 0x22b   :  { %4629 = vsyncadd [#allocation59], 4294967280  ;;  %vm661_vm0 = vcmask 261120   ;;  %v653_v0 = vld [vmem:[#allocation9 + $0x18] sm:$0xff]  ;;  %v652_v1 = vld [vmem:[#allocation9 + $0x10] sm:$0xff]  ;;  %vm747_vm1 = vcmask 523264  }
 0x22c   :  { %3527 = vmatprep.subr.mxu0 %v653_v0  ;;  %v648_v2 = vld [vmem:[#allocation2] sm:$0xff]  ;;  %v651_v3 = vld [vmem:[#allocation9 + $0x8] sm:$0xff]  ;;  %v923_v7 = vld [vmem:[#allocation6] sm:$0xff]  ;;  %s5760_s6 = sld [smem:[#allocation82_spill]]  ;;  %vm4722_vm2 = vmmov 0  }
 0x22d   :  { %3528 = vmatpush3.msra.mxu0 %v653_v0  ;;  %3535 = vmatprep.mubr.msk.f32.mxu0 %vm661_vm0, %v648_v2  ;;  %v650_v4 = vld [vmem:[#allocation9] sm:$0xff]  ;;  %v649_v5 = vld [vmem:[#allocation4] sm:$0xff]  ;;  %v931_v8 = vld [vmem:[#allocation16 + $0x30] sm:$0xff]  ;;  %s5761_s20 = sld [smem:[#allocation83_spill]] }
 0x22e   :  { %3529 = vmatprep.subr.mxu0 %v652_v1  ;;  %v932_v6 = vld [vmem:[#allocation16 + $0x38] sm:$0xff]  ;;  %v930_v9 = vld [vmem:[#allocation16 + $0x28] sm:$0xff]  ;;  %v929_v10 = vld [vmem:[#allocation16 + $0x20] sm:$0xff]  ;;  %s5762_s4 = sld [smem:[#allocation86_spill]] }
 0x22f   :  { %3530 = vmatpush3.msra.mxu0 %v652_v1  ;;  %v928_v11 = vld [vmem:[#allocation16 + $0x18] sm:$0xff]  ;;  %v927_v12 = vld [vmem:[#allocation16 + $0x10] sm:$0xff]  ;;  %v926_v13 = vld [vmem:[#allocation16 + $0x8] sm:$0xff]  ;;  %s5763_s28 = sld [smem:[#allocation90_spill]] }
 0x230   :  { %3531 = vmatprep.subr.mxu0 %v651_v3  ;;  %v925_v14 = vld [vmem:[#allocation16] sm:$0xff]  ;;  %v1229_v17 = vld [vmem:[#allocation24 + $0xf0] sm:$0xff]  ;;  %v1228_v18 = vld [vmem:[#allocation24 + $0xe8] sm:$0xff]  ;;  %s5764_s21 = sld [smem:[#allocation93_spill]] }
 0x231   :  { %3532 = vmatpush3.msra.mxu0 %v651_v3  ;;  %v1230_v16 = vld [vmem:[#allocation24 + $0xf8] sm:$0xff]  ;;  %v1227_v19 = vld [vmem:[#allocation24 + $0xe0] sm:$0xff]  ;;  %v1198_v21 = vld [vmem:[#allocation7] sm:$0xff]  ;;  %s5765_s1 = sld [smem:[#allocation104_spill]] }
 0x232   :  { %3533 = vmatprep.subr.mxu0 %v650_v4  ;;  %v924_v15 = vld [vmem:[%s5760_s6] sm:$0xff]  ;;  %v1226_v20 = vld [vmem:[#allocation24 + $0xd8] sm:$0xff]  ;;  %v1224_v23 = vld [vmem:[#allocation24 + $0xc8] sm:$0xff]  ;;  %s5766_s2 = sld [smem:[#allocation100_spill]] }
 0x233   :  { %3534 = vmatpush3.msra.mxu0 %v650_v4  ;;  %v1225_v22 = vld [vmem:[#allocation24 + $0xd0] sm:$0xff]  ;;  %v1223_v24 = vld [vmem:[#allocation24 + $0xc0] sm:$0xff]  ;;  %v1222_v25 = vld [vmem:[#allocation24 + $0xb8] sm:$0xff]  ;;  %s5767_s14 = sld [smem:[#allocation108_spill]] }
 0x234   :  { %3536 = vmatmul.mubr.msk.f32.vlgmr.msra.gmra.mxu0 %vm661_vm0, %v649_v5  ;;  %3557 = vmatprep.subr.mxu0 %v932_v6  ;;  %v1221_v26 = vld [vmem:[#allocation24 + $0xb0] sm:$0xff]  ;;  %v1220_v27 = vld [vmem:[#allocation24 + $0xa8] sm:$0xff]  ;;  %v1219_v28 = vld [vmem:[#allocation24 + $0xa0] sm:$0xff]  ;;  %s5768_s10 = sld [smem:[#allocation105_spill]] }
 0x235   :  { %3558 = vmatpush3.msra.mxu0 %v932_v6  ;;  %3573 = vmatprep.mubr.msk.f32.mxu0 %vm747_vm1, %v923_v7  ;;  %v1218_v29 = vld [vmem:[#allocation24 + $0x98] sm:$0xff]  ;;  %v1217_v30 = vld [vmem:[#allocation24 + $0x90] sm:$0xff]  ;;  %v1216_v31 = vld [vmem:[#allocation24 + $0x88] sm:$0xff] }
 0x236   :  { %3559 = vmatprep.subr.mxu0 %v931_v8  ;;  %v1215_v32 = vld [vmem:[#allocation24 + $0x80] sm:$0xff]  ;;  %v1214_v33 = vld [vmem:[#allocation24 + $0x78] sm:$0xff]  ;;  %v1213_v34 = vld [vmem:[#allocation24 + $0x70] sm:$0xff] }
 0x237   :  { %3560 = vmatpush3.msra.mxu0 %v931_v8  ;;  %v1212_v35 = vld [vmem:[#allocation24 + $0x68] sm:$0xff]  ;;  %v1211_v36 = vld [vmem:[#allocation24 + $0x60] sm:$0xff]  ;;  %v1210_v37 = vld [vmem:[#allocation24 + $0x58] sm:$0xff] }
 0x238   :  { %3561 = vmatprep.subr.mxu0 %v930_v9  ;;  %v1209_v38 = vld [vmem:[#allocation24 + $0x50] sm:$0xff]  ;;  %v1208_v39 = vld [vmem:[#allocation24 + $0x48] sm:$0xff]  ;;  %v1207_v40 = vld [vmem:[#allocation24 + $0x40] sm:$0xff] }
 0x239   :  { %3562 = vmatpush3.msra.mxu0 %v930_v9  ;;  %v1206_v41 = vld [vmem:[#allocation24 + $0x38] sm:$0xff]  ;;  %v1205_v42 = vld [vmem:[#allocation24 + $0x30] sm:$0xff]  ;;  %v1204_v43 = vld [vmem:[#allocation24 + $0x28] sm:$0xff] }
 0x23a   :  { %3563 = vmatprep.subr.mxu0 %v929_v10  ;;  %v1203_v44 = vld [vmem:[#allocation24 + $0x20] sm:$0xff]  ;;  %v1202_v45 = vld [vmem:[#allocation24 + $0x18] sm:$0xff]  ;;  %v1201_v46 = vld [vmem:[#allocation24 + $0x10] sm:$0xff] }
 0x23b   :  { %3564 = vmatpush3.msra.mxu0 %v929_v10  ;;  %v1200_v47 = vld [vmem:[#allocation24 + $0x8] sm:$0xff]  ;;  %v1199_v48 = vld [vmem:[#allocation24] sm:$0xff]  ;;  %v1262_v49 = vld [vmem:[#allocation24 + $0x1f8] sm:$0xff] }
 0x23c   :  { %3565 = vmatprep.subr.mxu0 %v928_v11  ;;  %v1261_v50 = vld [vmem:[#allocation24 + $0x1f0] sm:$0xff]  ;;  %v1260_v51 = vld [vmem:[#allocation24 + $0x1e8] sm:$0xff]  ;;  %v1259_v52 = vld [vmem:[#allocation24 + $0x1e0] sm:$0xff] }
 0x23d   :  { %3566 = vmatpush3.msra.mxu0 %v928_v11  ;;  %v1258_v53 = vld [vmem:[#allocation24 + $0x1d8] sm:$0xff]  ;;  %v1257_v54 = vld [vmem:[#allocation24 + $0x1d0] sm:$0xff]  ;;  %v1256_v55 = vld [vmem:[#allocation24 + $0x1c8] sm:$0xff] }
 0x23e   :  { %3567 = vmatprep.subr.mxu0 %v927_v12  ;;  %v1255_v56 = vld [vmem:[#allocation24 + $0x1c0] sm:$0xff]  ;;  %v1254_v57 = vld [vmem:[#allocation24 + $0x1b8] sm:$0xff]  ;;  %v1253_v58 = vld [vmem:[#allocation24 + $0x1b0] sm:$0xff] }
 0x23f   :  { %3568 = vmatpush3.msra.mxu0 %v927_v12  ;;  %v1252_v59 = vld [vmem:[#allocation24 + $0x1a8] sm:$0xff]  ;;  %v1251_v60 = vld [vmem:[#allocation24 + $0x1a0] sm:$0xff]  ;;  %v1250_v61 = vld [vmem:[#allocation24 + $0x198] sm:$0xff] }
 0x240   :  { %3569 = vmatprep.subr.mxu0 %v926_v13  ;;  %v1249_v62 = vld [vmem:[#allocation24 + $0x190] sm:$0xff]  ;;  %v1248_v63 = vld [vmem:[#allocation24 + $0x188] sm:$0xff]  ;;  %v1247_v0 = vld [vmem:[#allocation24 + $0x180] sm:$0xff] }
 0x241   :  { %3570 = vmatpush3.msra.mxu0 %v926_v13  ;;  %v1246_v1 = vld [vmem:[#allocation24 + $0x178] sm:$0xff]  ;;  %v1245_v2 = vld [vmem:[#allocation24 + $0x170] sm:$0xff]  ;;  %v1244_v3 = vld [vmem:[#allocation24 + $0x168] sm:$0xff] }
 0x242   :  { %3571 = vmatprep.subr.mxu0 %v925_v14  ;;  %v1243_v4 = vld [vmem:[#allocation24 + $0x160] sm:$0xff]  ;;  %v1242_v5 = vld [vmem:[#allocation24 + $0x158] sm:$0xff]  ;;  %v1241_v6 = vld [vmem:[#allocation24 + $0x150] sm:$0xff] }
 0x243   :  { %3572 = vmatpush3.msra.mxu0 %v925_v14  ;;  %v1240_v7 = vld [vmem:[#allocation24 + $0x148] sm:$0xff]  ;;  %v1239_v8 = vld [vmem:[#allocation24 + $0x140] sm:$0xff]  ;;  %v1238_v9 = vld [vmem:[#allocation24 + $0x138] sm:$0xff] }
 0x244   :  { %3574 = vmatmul.mubr.msk.f32.vlgmr.msra.gmra.mxu0 %vm747_vm1, %v924_v15  ;;  %1275 = vmatprep.subr.mxu0 %v1230_v16  ;;  %v1237_v10 = vld [vmem:[#allocation24 + $0x130] sm:$0xff]  ;;  %v1236_v11 = vld [vmem:[#allocation24 + $0x128] sm:$0xff]  ;;  %v1235_v12 = vld [vmem:[#allocation24 + $0x120] sm:$0xff] }
 0x245   :  { %1276 = vmatpush1.msra.mxu0 %v1229_v17  ;;  %1339 = vmatprep.mubr.f32.mxu0 %v1198_v21  ;;  %v1234_v13 = vld [vmem:[#allocation24 + $0x118] sm:$0xff]  ;;  %v1233_v14 = vld [vmem:[#allocation24 + $0x110] sm:$0xff]  ;;  %v1232_v15 = vld [vmem:[#allocation24 + $0x108] sm:$0xff] }
 0x246   :  { %1277 = vmatprep.subr.mxu0 %v1228_v18  ;;  %v1231_v16 = vld [vmem:[#allocation24 + $0x100] sm:$0xff]  ;;  %v1197_v17 = vld [vmem:[%s5761_s20] sm:$0xff]  ;;  %v834_v18 = vld [vmem:[%s5762_s4 + $0x38] sm:$0xff] }
 0x247   :  { %1278 = vmatpush1.msra.mxu0 %v1227_v19  ;;  %3538 = vmatprep.subr.mxu1 %v834_v18  ;;  %v833_v19 = vld [vmem:[%s5762_s4 + $0x30] sm:$0xff]  ;;  %v831_v21 = vld [vmem:[%s5762_s4 + $0x20] sm:$0xff] }
 0x248   :  { %1279 = vmatprep.subr.mxu0 %v1226_v20  ;;  %3539 = vmatpush3.msra.mxu1 %v834_v18  ;;  %v832_v20 = vld [vmem:[%s5762_s4 + $0x28] sm:$0xff] }
 0x249   :  { %1280 = vmatpush1.msra.mxu0 %v1225_v22  ;;  %3540 = vmatprep.subr.mxu1 %v833_v19  ;;  %v830_v22 = vld [vmem:[%s5762_s4 + $0x18] sm:$0xff] }
 0x24a   :  { %1281 = vmatprep.subr.mxu0 %v1224_v23  ;;  %3541 = vmatpush3.msra.mxu1 %v833_v19  ;;  %v829_v23 = vld [vmem:[%s5762_s4 + $0x10] sm:$0xff] }
 0x24b   :  { %1282 = vmatpush1.msra.mxu0 %v1223_v24  ;;  %3542 = vmatprep.subr.mxu1 %v832_v20  ;;  %v828_v24 = vld [vmem:[%s5762_s4 + $0x8] sm:$0xff] }
 0x24c   :  { %1283 = vmatprep.subr.mxu0 %v1222_v25  ;;  %3543 = vmatpush3.msra.mxu1 %v832_v20  ;;  %v827_v25 = vld [vmem:[%s5762_s4] sm:$0xff] }
 0x24d   :  { %1284 = vmatpush1.msra.mxu0 %v1221_v26  ;;  %3544 = vmatprep.subr.mxu1 %v831_v21  ;;  %v5041_v26 = vld [vmem:[%s5763_s28 + $0x78] sm:$0xff] }
 0x24e   :  { %1285 = vmatprep.subr.mxu0 %v1220_v27  ;;  %3545 = vmatpush3.msra.mxu1 %v831_v21  ;;  %v1549_v27 = vld [vmem:[%s5764_s21 + $0x2e8] sm:$0xff]  ;;  %v1596_v21 = vld [vmem:[%s5764_s21 + $0x460] sm:$0xff] }
 0x24f   :  { %1286 = vmatpush1.msra.mxu0 %v1219_v28  ;;  %3546 = vmatprep.subr.mxu1 %v830_v22  ;;  %v1548_v28 = vld [vmem:[%s5764_s21 + $0x2e0] sm:$0xff] }
 0x250   :  { %1287 = vmatprep.subr.mxu0 %v1218_v29  ;;  %3547 = vmatpush3.msra.mxu1 %v830_v22  ;;  %v1543_v29 = vld [vmem:[%s5764_s21 + $0x2b8] sm:$0xff] }
 0x251   :  { %1288 = vmatpush1.msra.mxu0 %v1217_v30  ;;  %3548 = vmatprep.subr.mxu1 %v829_v23  ;;  %v1542_v30 = vld [vmem:[%s5764_s21 + $0x2b0] sm:$0xff] }
 0x252   :  { %1289 = vmatprep.subr.mxu0 %v1216_v31  ;;  %3549 = vmatpush3.msra.mxu1 %v829_v23  ;;  %v1537_v31 = vld [vmem:[%s5764_s21 + $0x288] sm:$0xff]  ;;  %v1591_v23 = vld [vmem:[%s5764_s21 + $0x438] sm:$0xff] }
 0x253   :  { %1290 = vmatpush1.msra.mxu0 %v1215_v32  ;;  %3550 = vmatprep.subr.mxu1 %v828_v24  ;;  %v1536_v32 = vld [vmem:[%s5764_s21 + $0x280] sm:$0xff] }
 0x254   :  { %1291 = vmatprep.subr.mxu0 %v1214_v33  ;;  %3551 = vmatpush3.msra.mxu1 %v828_v24  ;;  %v1531_v33 = vld [vmem:[%s5764_s21 + $0x258] sm:$0xff] }
 0x255   :  { %1292 = vmatpush1.msra.mxu0 %v1213_v34  ;;  %3552 = vmatprep.subr.mxu1 %v827_v25  ;;  %v1530_v34 = vld [vmem:[%s5764_s21 + $0x250] sm:$0xff] }
 0x256   :  { %1293 = vmatprep.subr.mxu0 %v1212_v35  ;;  %3553 = vmatpush3.msra.mxu1 %v827_v25  ;;  %v1525_v35 = vld [vmem:[%s5764_s21 + $0x228] sm:$0xff] }
 0x257   :  { %1294 = vmatpush1.msra.mxu0 %v1211_v36  ;;  %3576 = vmatprep.subr.mxu1 %v5041_v26  ;;  %v1524_v36 = vld [vmem:[%s5764_s21 + $0x220] sm:$0xff] }
 0x258   :  { %1295 = vmatprep.subr.mxu0 %v1210_v37  ;;  %v1519_v37 = vld [vmem:[%s5764_s21 + $0x1f8] sm:$0xff] }
 0x259   :  { %1296 = vmatpush1.msra.mxu0 %v1209_v38  ;;  %v1518_v38 = vld [vmem:[%s5764_s21 + $0x1f0] sm:$0xff] }
 0x25a   :  { %1297 = vmatprep.subr.mxu0 %v1208_v39  ;;  %v1513_v39 = vld [vmem:[%s5764_s21 + $0x1c8] sm:$0xff] }
 0x25b   :  { %1298 = vmatpush1.msra.mxu0 %v1207_v40  ;;  %v1512_v40 = vld [vmem:[%s5764_s21 + $0x1c0] sm:$0xff] }
 0x25c   :  { %1299 = vmatprep.subr.mxu0 %v1206_v41  ;;  %v1507_v41 = vld [vmem:[%s5764_s21 + $0x198] sm:$0xff] }
 0x25d   :  { %1300 = vmatpush1.msra.mxu0 %v1205_v42  ;;  %v1506_v42 = vld [vmem:[%s5764_s21 + $0x190] sm:$0xff] }
 0x25e   :  { %1301 = vmatprep.subr.mxu0 %v1204_v43  ;;  %v1501_v43 = vld [vmem:[%s5764_s21 + $0x168] sm:$0xff] }
 0x25f   :  { %1302 = vmatpush1.msra.mxu0 %v1203_v44  ;;  %v1500_v44 = vld [vmem:[%s5764_s21 + $0x160] sm:$0xff] }
 0x260   :  { %1303 = vmatprep.subr.mxu0 %v1202_v45  ;;  %v1495_v45 = vld [vmem:[%s5764_s21 + $0x138] sm:$0xff] }
 0x261   :  { %1304 = vmatpush1.msra.mxu0 %v1201_v46  ;;  %v1494_v46 = vld [vmem:[%s5764_s21 + $0x130] sm:$0xff] }
 0x262   :  { %1305 = vmatprep.subr.mxu0 %v1200_v47  ;;  %v1489_v47 = vld [vmem:[%s5764_s21 + $0x108] sm:$0xff] }
 0x263   :  { %1306 = vmatpush1.msra.mxu0 %v1199_v48  ;;  %v1488_v48 = vld [vmem:[%s5764_s21 + $0x100] sm:$0xff] }
 0x264   :  { %1307 = vmatprep.subr.mxu0 %v1262_v49  ;;  %v1483_v49 = vld [vmem:[%s5764_s21 + $0xd8] sm:$0xff] }
 0x265   :  { %1308 = vmatpush2.msra.mxu0 %v1261_v50  ;;  %v1482_v50 = vld [vmem:[%s5764_s21 + $0xd0] sm:$0xff] }
 0x266   :  { %1309 = vmatprep.subr.mxu0 %v1260_v51  ;;  %v1477_v51 = vld [vmem:[%s5764_s21 + $0xa8] sm:$0xff] }
 0x267   :  { %1310 = vmatpush2.msra.mxu0 %v1259_v52  ;;  %v1476_v52 = vld [vmem:[%s5764_s21 + $0xa0] sm:$0xff] }
 0x268   :  { %1311 = vmatprep.subr.mxu0 %v1258_v53  ;;  %v1471_v53 = vld [vmem:[%s5764_s21 + $0x78] sm:$0xff] }
 0x269   :  { %1312 = vmatpush2.msra.mxu0 %v1257_v54  ;;  %v1470_v54 = vld [vmem:[%s5764_s21 + $0x70] sm:$0xff] }
 0x26a   :  { %1313 = vmatprep.subr.mxu0 %v1256_v55  ;;  %v1465_v55 = vld [vmem:[%s5764_s21 + $0x48] sm:$0xff] }
 0x26b   :  { %1314 = vmatpush2.msra.mxu0 %v1255_v56  ;;  %v1464_v56 = vld [vmem:[%s5764_s21 + $0x40] sm:$0xff] }
 0x26c   :  { %1315 = vmatprep.subr.mxu0 %v1254_v57  ;;  %v1459_v57 = vld [vmem:[%s5764_s21 + $0x18] sm:$0xff] }
 0x26d   :  { %1316 = vmatpush2.msra.mxu0 %v1253_v58  ;;  %v1458_v58 = vld [vmem:[%s5764_s21 + $0x10] sm:$0xff] }
 0x26e   :  { %1317 = vmatprep.subr.mxu0 %v1252_v59  ;;  %v1645_v59 = vld [vmem:[%s5764_s21 + $0x5e8] sm:$0xff] }
 0x26f   :  { %1318 = vmatpush2.msra.mxu0 %v1251_v60  ;;  %v1644_v60 = vld [vmem:[%s5764_s21 + $0x5e0] sm:$0xff] }
 0x270   :  { %1319 = vmatprep.subr.mxu0 %v1250_v61  ;;  %v1639_v61 = vld [vmem:[%s5764_s21 + $0x5b8] sm:$0xff] }
 0x271   :  { %1320 = vmatpush2.msra.mxu0 %v1249_v62  ;;  %v1638_v62 = vld [vmem:[%s5764_s21 + $0x5b0] sm:$0xff] }
 0x272   :  { %1321 = vmatprep.subr.mxu0 %v1248_v63  ;;  %v1633_v63 = vld [vmem:[%s5764_s21 + $0x588] sm:$0xff] }
 0x273   :  { %1322 = vmatpush2.msra.mxu0 %v1247_v0  ;;  %v1632_v0 = vld [vmem:[%s5764_s21 + $0x580] sm:$0xff] }
 0x274   :  { %1323 = vmatprep.subr.mxu0 %v1246_v1  ;;  %v1627_v1 = vld [vmem:[%s5764_s21 + $0x558] sm:$0xff] }
 0x275   :  { %1324 = vmatpush2.msra.mxu0 %v1245_v2  ;;  %v1626_v2 = vld [vmem:[%s5764_s21 + $0x550] sm:$0xff] }
 0x276   :  { %1325 = vmatprep.subr.mxu0 %v1244_v3  ;;  %v1621_v3 = vld [vmem:[%s5764_s21 + $0x528] sm:$0xff] }
 0x277   :  { %1326 = vmatpush2.msra.mxu0 %v1243_v4  ;;  %v1620_v4 = vld [vmem:[%s5764_s21 + $0x520] sm:$0xff] }
 0x278   :  { %1327 = vmatprep.subr.mxu0 %v1242_v5  ;;  %v3317_v5 = vld [vmem:[#allocation10] ss:$0 sm:$0xff] }
 0x279   :  { %1328 = vmatpush2.msra.mxu0 %v1241_v6  ;;  %v1615_v6 = vld [vmem:[%s5764_s21 + $0x4f8] sm:$0xff] }
 0x27a   :  { %1329 = vmatprep.subr.mxu0 %v1240_v7  ;;  %v1614_v7 = vld [vmem:[%s5764_s21 + $0x4f0] sm:$0xff] }
 0x27b   :  { %1330 = vmatpush2.msra.mxu0 %v1239_v8 }
 0x27c   :  { %1331 = vmatprep.subr.mxu0 %v1238_v9  ;;  %v1609_v9 = vld [vmem:[%s5764_s21 + $0x4c8] sm:$0xff] }
 0x27d   :  { %1332 = vmatpush2.msra.mxu0 %v1237_v10 }
 0x27e   :  { %1333 = vmatprep.subr.mxu0 %v1236_v11  ;;  %v1608_v11 = vld [vmem:[%s5764_s21 + $0x4c0] sm:$0xff] }
 0x27f   :  { %1334 = vmatpush2.msra.mxu0 %v1235_v12 }
 0x280   :  { %1335 = vmatprep.subr.mxu0 %v1234_v13  ;;  %v1603_v13 = vld [vmem:[%s5764_s21 + $0x498] sm:$0xff] }
 0x281   :  { %1336 = vmatpush2.msra.mxu0 %v1233_v14 }
 0x282   :  { %1337 = vmatprep.subr.mxu0 %v1232_v15 }
 0x283   :  { %1338 = vmatpush2.msra.mxu0 %v1231_v16  ;;  %v1602_v16 = vld [vmem:[%s5764_s21 + $0x490] sm:$0xff] }
 0x284   :  { %1340 = vmatmul.mubr.f32.vlgmr.msra.gmra.mxu0 %v1197_v17  ;;  %1751 = vmatprep.subr.mxu0 %v1549_v27  ;;  %v1597_v17 = vld [vmem:[%s5764_s21 + $0x468] sm:$0xff] }
 0x285   :  { %1752 = vmatpush1.msra.mxu0 %v1548_v28  ;;  %v1590_v28 = vld [vmem:[%s5764_s21 + $0x430] sm:$0xff] }
 0x286   :  { %1753 = vmatprep.subr.mxu0 %v1543_v29 }
 0x287   :  { %1754 = vmatpush1.msra.mxu0 %v1542_v30 }
 0x288   :  { %1755 = vmatprep.subr.mxu0 %v1537_v31 }
 0x289   :  { %1756 = vmatpush1.msra.mxu0 %v1536_v32  ;;  %v1585_v32 = vld [vmem:[%s5764_s21 + $0x408] sm:$0xff] }
 0x28a   :  { %1757 = vmatprep.subr.mxu0 %v1531_v33 }
 0x28b   :  { %1758 = vmatpush1.msra.mxu0 %v1530_v34  ;;  %v1584_v34 = vld [vmem:[%s5764_s21 + $0x400] sm:$0xff] }
 0x28c   :  { %1759 = vmatprep.subr.mxu0 %v1525_v35 }
 0x28d   :  { %1760 = vmatpush1.msra.mxu0 %v1524_v36 }
 0x28e   :  { %1761 = vmatprep.subr.mxu0 %v1519_v37 }
 0x28f   :  { %1762 = vmatpush1.msra.mxu0 %v1518_v38 }
 0x290   :  { %1763 = vmatprep.subr.mxu0 %v1513_v39  ;;  %v1579_v39 = vld [vmem:[%s5764_s21 + $0x3d8] sm:$0xff] }
 0x291   :  { %1764 = vmatpush1.msra.mxu0 %v1512_v40  ;;  %v1578_v40 = vld [vmem:[%s5764_s21 + $0x3d0] sm:$0xff] }
 0x292   :  { %1765 = vmatprep.subr.mxu0 %v1507_v41 }
 0x293   :  { %1766 = vmatpush1.msra.mxu0 %v1506_v42 }
 0x294   :  { %1767 = vmatprep.subr.mxu0 %v1501_v43 }
 0x295   :  { %1768 = vmatpush1.msra.mxu0 %v1500_v44 }
 0x296   :  { %1769 = vmatprep.subr.mxu0 %v1495_v45  ;;  %v1573_v45 = vld [vmem:[%s5764_s21 + $0x3a8] sm:$0xff] }
 0x297   :  { %1770 = vmatpush1.msra.mxu0 %v1494_v46  ;;  %v1572_v46 = vld [vmem:[%s5764_s21 + $0x3a0] sm:$0xff] }
 0x298   :  { %1771 = vmatprep.subr.mxu0 %v1489_v47 }
 0x299   :  { %1772 = vmatpush1.msra.mxu0 %v1488_v48 }
 0x29a   :  { %1773 = vmatprep.subr.mxu0 %v1483_v49 }
 0x29b   :  { %1774 = vmatpush1.msra.mxu0 %v1482_v50 }
 0x29c   :  { %1775 = vmatprep.subr.mxu0 %v1477_v51  ;;  %v3323_v51 = vld [vmem:[#allocation18] ss:$0 sm:$0xff] }
 0x29d   :  { %1776 = vmatpush1.msra.mxu0 %v1476_v52  ;;  %v1567_v52 = vld [vmem:[%s5764_s21 + $0x378] sm:$0xff] }
 0x29e   :  { %1777 = vmatprep.subr.mxu0 %v1471_v53  ;;  %v1566_v53 = vld [vmem:[%s5764_s21 + $0x370] sm:$0xff] }
 0x29f   :  { %1778 = vmatpush1.msra.mxu0 %v1470_v54 }
 0x2a0   :  { %1779 = vmatprep.subr.mxu0 %v1465_v55 }
 0x2a1   :  { %1780 = vmatpush1.msra.mxu0 %v1464_v56 }
 0x2a2   :  { %1781 = vmatprep.subr.mxu0 %v1459_v57 }
 0x2a3   :  { %1782 = vmatpush1.msra.mxu0 %v1458_v58 }
 0x2a4   :  { %1783 = vmatprep.subr.mxu0 %v1645_v59  ;;  %v1561_v59 = vld [vmem:[%s5764_s21 + $0x348] sm:$0xff] }
 0x2a5   :  { %1784 = vmatpush2.msra.mxu0 %v1644_v60 }
 0x2a6   :  { %1785 = vmatprep.subr.mxu0 %v1639_v61  ;;  %v1560_v61 = vld [vmem:[%s5764_s21 + $0x340] sm:$0xff] }
 0x2a7   :  { %1786 = vmatpush2.msra.mxu0 %v1638_v62 }
 0x2a8   :  { %1787 = vmatprep.subr.mxu0 %v1633_v63 }
 0x2a9   :  { %1788 = vmatpush2.msra.mxu0 %v1632_v0 }
 0x2aa   :  { %1789 = vmatprep.subr.mxu0 %v1627_v1 }
 0x2ab   :  { %1790 = vmatpush2.msra.mxu0 %v1626_v2 }
 0x2ac   :  { %1791 = vmatprep.subr.mxu0 %v1621_v3  ;;  %v1555_v3 = vld [vmem:[%s5764_s21 + $0x318] sm:$0xff] }
 0x2ad   :  { %1792 = vmatpush2.msra.mxu0 %v1620_v4 }
 0x2ae   :  { %1793 = vmatprep.subr.mxu0 %v1615_v6  ;;  %v1554_v6 = vld [vmem:[%s5764_s21 + $0x310] sm:$0xff] }
 0x2af   :  { %1794 = vmatpush2.msra.mxu0 %v1614_v7 }
 0x2b0   :  { %1795 = vmatprep.subr.mxu0 %v1609_v9 }
 0x2b1   :  { %1796 = vmatpush2.msra.mxu0 %v1608_v11 }
 0x2b2   :  { %1797 = vmatprep.subr.mxu0 %v1603_v13 }
 0x2b3   :  { %1798 = vmatpush2.msra.mxu0 %v1602_v16 }
 0x2b4   :  { %1799 = vmatprep.subr.mxu0 %v1597_v17 }
 0x2b5   :  { %1800 = vmatpush2.msra.mxu0 %v1596_v21 }
 0x2b6   :  { %1801 = vmatprep.subr.mxu0 %v1591_v23 }
 0x2b7   :  { %1802 = vmatpush2.msra.mxu0 %v1590_v28 }
 0x2b8   :  { %1803 = vmatprep.subr.mxu0 %v1585_v32 }
 0x2b9   :  { %1804 = vmatpush2.msra.mxu0 %v1584_v34 }
 0x2ba   :  { %1805 = vmatprep.subr.mxu0 %v1579_v39 }
 0x2bb   :  { %1806 = vmatpush2.msra.mxu0 %v1578_v40 }
 0x2bc   :  { %1807 = vmatprep.subr.mxu0 %v1573_v45 }
 0x2bd   :  { %1808 = vmatpush2.msra.mxu0 %v1572_v46 }
 0x2be   :  { %1809 = vmatprep.subr.mxu0 %v1567_v52 }
 0x2bf   :  { %1810 = vmatpush2.msra.mxu0 %v1566_v53 }
 0x2c0   :  { %1811 = vmatprep.subr.mxu0 %v1561_v59 }
 0x2c1   :  { %1812 = vmatpush2.msra.mxu0 %v1560_v61 }
 0x2c2   :  { %1813 = vmatprep.subr.mxu0 %v1555_v3 }
 0x2c3   :  { %1814 = vmatpush2.msra.mxu0 %v1554_v6 }
 0x2f4   :  { %v3537_v8 = vpop.f32.mrf.mxu0 }
 0x2f5   :  { %v740_v10 = vadd.f32 %v3537_v8, %v3317_v5 }
 0x2f6   :  { %v734_v12 = vpop.f32.mrf.mxu0 }
 0x2f7   :  { %v5091_v14 = vmax.f32 %v740_v10, 0.0  ;;  %v735_v15 = vadd.f32 %v3317_v5, %v734_v12 }
 0x2f9   :  { %v788_v18 = vsel %vm747_vm1, %v5091_v14, 0.0  ;;  %v796_v19 = vmul.f32 %v5091_v14, %v5091_v14  ;;  %v5099_v20 = vmax.f32 %v735_v15, 0.0 }
 0x2fa   :  { %v789_v22 = vrot.slane %v788_v18, 4 }
 0x2fb   :  { %v797_v24 = vsel %vm747_vm1, %v796_v19, 0.0  ;;  %v748_v25 = vsel %vm747_vm1, %v5099_v20, 0.0  ;;  %v757_v27 = vmul.f32 %v5099_v20, %v5099_v20 }
 0x2fc   :  { %v790_v29 = vadd.f32 %v789_v22, %v788_v18  ;;  %v798_v30 = vrot.slane %v797_v24, 4  ;;  %v749_v31 = vrot.slane %v748_v25, 4 }
 0x2fd   :  { %v758_v33 = vsel %vm747_vm1, %v757_v27, 0.0 }
 0x2fe   :  { %v791_v35 = vrot.slane %v790_v29, 2  ;;  %v799_v36 = vadd.f32 %v798_v30, %v797_v24  ;;  %v750_v37 = vadd.f32 %v749_v31, %v748_v25  ;;  %v759_v38 = vrot.slane %v758_v33, 4 }
 0x300   :  { %v792_v41 = vadd.f32 %v791_v35, %v790_v29  ;;  %v800_v42 = vrot.slane %v799_v36, 2  ;;  %v751_v43 = vrot.slane %v750_v37, 2  ;;  %v760_v44 = vadd.f32 %v759_v38, %v758_v33 }
 0x302   :  { %v793_v47 = vrot.slane %v792_v41, 1  ;;  %v801_v48 = vadd.f32 %v800_v42, %v799_v36  ;;  %v752_v49 = vadd.f32 %v751_v43, %v750_v37  ;;  %v761_v50 = vrot.slane %v760_v44, 2 }
 0x304   :  { %v794_v54 = vadd.f32 %v793_v47, %v792_v41  ;;  %v802_v55 = vrot.slane %v801_v48, 1  ;;  %v753_v56 = vrot.slane %v752_v49, 1  ;;  %v762_v57 = vadd.f32 %v761_v50, %v760_v44  ;;  %v3575_v58 = vpop.f32.mrf.mxu0 }
 0x305   :  { %v1018_v60 = vadd.f32 %v3575_v58, %v3323_v51 }
 0x306   :  { %v5120_v62 = vmul.f32 0.125, %v794_v54  ;;  %v803_v63 = vadd.f32 %v802_v55, %v801_v48  ;;  %v763_v0 = vrot.slane %v762_v57, 1  ;;  %v1012_v1 = vpop.f32.mrf.mxu0  ;;  %v754_v2 = vadd.f32 %v753_v56, %v752_v49  ;;  %v745_v56 = vld [vmem:[#allocation12] sm:$0x1] }
 0x307   :  { %v5123_v4 = vmax.f32 %v1018_v60, 0.0  ;;  %v1013_v5 = vadd.f32 %v3323_v51, %v1012_v1  ;;  %v773_v49 = vlaneseq }
 0x308   :  { %v804_v7 = vmul.f32 0.125, %v803_v63  ;;  %v805_v8 = vmul.f32 %v5120_v62, %v5120_v62  ;;  %v764_v9 = vadd.f32 %v763_v0, %v762_v57  ;;  %v756_v10 = vmul.f32 0.125, %v754_v2  ;;  %v746_v2 = vld [vmem:[#allocation13] sm:$0x1] }
 0x309   :  { %v1062_v11 = vrot.slane %v5123_v4, 4  ;;  %v1069_v12 = vmul.f32 %v5123_v4, %v5123_v4  ;;  %v5131_v13 = vmax.f32 %v1013_v5, 0.0  ;;  %v5142_v57 = vshrl.u32 %v773_v49, 7  ;;  %v1101_v49 = vld [vmem:[%s5763_s28 + $0x10] sm:$0xff] }
 0x30a   :  { %v806_v15 = vsub.f32 %v804_v7, %v805_v8  ;;  %v765_v16 = vmul.f32 0.125, %v764_v9  ;;  %v766_v17 = vmul.f32 %v756_v10, %v756_v10 }
 0x30b   :  { %v1063_v18 = vadd.f32 %v1062_v11, %v5123_v4  ;;  %v1070_v19 = vrot.slane %v1069_v12, 4  ;;  %v1025_v21 = vrot.slane %v5131_v13, 4  ;;  %v1032_v22 = vmul.f32 %v5131_v13, %v5131_v13 }
 0x30c   :  { %v807_v23 = vmax.f32 %v806_v15, 0.0  ;;  %v767_v24 = vsub.f32 %v765_v16, %v766_v17  ;;  %v5145_v1 = vsub.s32 0, %v5142_v57 }
 0x30d   :  { %v1064_v25 = vrot.slane %v1063_v18, 2  ;;  %v1071_v27 = vadd.f32 %v1070_v19, %v1069_v12  ;;  %v1026_v28 = vadd.f32 %v1025_v21, %v5131_v13  ;;  %v1033_v29 = vrot.slane %v1032_v22, 4 }
 0x30e   :  { %v808_v30 = vadd.f32 1e-05, %v807_v23  ;;  %v768_v31 = vmax.f32 %v767_v24, 0.0  ;;  %v1112_v23 = vld [vmem:[%s5763_s28 + $0x68] sm:$0xff] }
 0x30f   :  { %v1065_v32 = vadd.f32 %v1064_v25, %v1063_v18  ;;  %v1072_v33 = vrot.slane %v1071_v27, 2  ;;  %v1027_v34 = vrot.slane %v1026_v28, 2  ;;  %v1034_v35 = vadd.f32 %v1033_v29, %v1032_v22  ;;  %v1111_v25 = vld [vmem:[%s5763_s28 + $0x60] sm:$0xff] }
 0x310   :  { %3794 = vrsqrt.f32 %v808_v30  ;;  %v769_v36 = vadd.f32 1e-05, %v768_v31  ;;  %v1109_v30 = vld [vmem:[%s5763_s28 + $0x50] sm:$0xff] }
 0x311   :  { %v1066_v37 = vrot.slane %v1065_v32, 1  ;;  %v1073_v38 = vadd.f32 %v1072_v33, %v1071_v27  ;;  %v1028_v39 = vadd.f32 %v1027_v34, %v1026_v28  ;;  %v1035_v40 = vrot.slane %v1034_v35, 2  ;;  %v1110_v27 = vld [vmem:[%s5763_s28 + $0x58] sm:$0xff] }
 0x312   :  { %3796 = vrsqrt.f32 %v769_v36  ;;  %v1107_v36 = vld [vmem:[%s5763_s28 + $0x40] sm:$0xff] }
 0x313   :  { %v1067_v41 = vadd.f32 %v1066_v37, %v1065_v32  ;;  %v1074_v42 = vrot.slane %v1073_v38, 1  ;;  %v1029_v43 = vrot.slane %v1028_v39, 1  ;;  %v1036_v44 = vadd.f32 %v1035_v40, %v1034_v35  ;;  %v1108_v32 = vld [vmem:[%s5763_s28 + $0x48] sm:$0xff]  ;;  %v1105_v40 = vld [vmem:[%s5763_s28 + $0x30] sm:$0xff] }
 0x315   :  { %v5138_v45 = vmul.f32 0.125, %v1067_v41  ;;  %v1075_v46 = vadd.f32 %v1074_v42, %v1073_v38  ;;  %v1037_v47 = vrot.slane %v1036_v44, 1  ;;  %v1030_v48 = vadd.f32 %v1029_v43, %v1028_v39  ;;  %v1106_v38 = vld [vmem:[%s5763_s28 + $0x38] sm:$0xff]  ;;  %v1103_v42 = vld [vmem:[%s5763_s28 + $0x20] sm:$0xff]  ;;  %v1263_v43 = vld [vmem:[#allocation25] sm:$0x3] }
 0x317   :  { %v1038_v50 = vadd.f32 %v1037_v47, %v1036_v44  ;;  %v1031_v51 = vmul.f32 0.125, %v1030_v48  ;;  %v1076_v52 = vmul.f32 0.125, %v1075_v46  ;;  %v1077_v53 = vmul.f32 %v5138_v45, %v5138_v45  ;;  %v1102_v46 = vld [vmem:[%s5763_s28 + $0x18] sm:$0xff] }
 0x318   :  { %v5173_v44 = vsub.s32 1, %v5142_v57  ;;  %v1268_v48 = vrot.slane %v1263_v43, %v5145_v1 }
 0x319   :  { %v1039_v54 = vmul.f32 0.125, %v1038_v50  ;;  %v1040_v55 = vmul.f32 %v1031_v51, %v1031_v51  ;;  %v1078_v60 = vsub.f32 %v1076_v52, %v1077_v53  ;;  %v1100_v52 = vld [vmem:[%s5763_s28 + $0x8] sm:$0xff] }
 0x31a   :  { %v1272_v50 = vrot.slane %v1263_v43, %v5173_v44 }
 0x31b   :  { %v1041_v58 = vsub.f32 %v1039_v54, %v1040_v55  ;;  %v1079_v7 = vmax.f32 %v1078_v60, 0.0 }
 0x31d   :  { %v3795_v59 = vpop.eup %3794  ;;  %v1042_v61 = vmax.f32 %v1041_v58, 0.0  ;;  %v1080_v16 = vadd.f32 1e-05, %v1079_v7 }
 0x31e   :  { %v810_v63 = vmul.f32 %v3795_v59, %v745_v56 }
 0x31f   :  { %v3797_v0 = vpop.eup %3796  ;;  %v1043_v3 = vadd.f32 1e-05, %v1042_v61  ;;  %v1547_v61 = vld [vmem:[%s5764_s21 + $0x2d8] sm:$0xff] }
 0x320   :  { %v771_v5 = vmul.f32 %v3797_v0, %v745_v56  ;;  %v818_v6 = vmul.f32 %v810_v63, %v5120_v62  ;;  %v815_v12 = vrot.slane %v810_v63, %v5145_v1  ;;  %v1099_v56 = vld [vmem:[%s5763_s28] sm:$0xff] }
 0x321   :  { %3798 = vrsqrt.f32 %v1043_v3 }
 0x322   :  { %v776_v8 = vrot.slane %v771_v5, %v5145_v1  ;;  %v779_v9 = vmul.f32 %v771_v5, %v756_v10  ;;  %v819_v11 = vsub.f32 %v746_v2, %v818_v6  ;;  %v817_v62 = vmul.f32 %v815_v12, %v5091_v14  ;;  %v1113_v10 = vld [vmem:[%s5763_s28 + $0x70] sm:$0xff]  ;;  %v1535_v12 = vld [vmem:[%s5764_s21 + $0x278] sm:$0xff] }
 0x323   :  { %3800 = vrsqrt.f32 %v1080_v16  ;;  %v1546_v5 = vld [vmem:[%s5764_s21 + $0x2d0] sm:$0xff] }
 0x324   :  { %v780_v15 = vsub.f32 %v746_v2, %v779_v9  ;;  %v824_v17 = vrot.slane %v819_v11, %v5145_v1  ;;  %v778_v18 = vmul.f32 %v776_v8, %v5099_v20  ;;  %v1023_v20 = vld [vmem:[#allocation19] sm:$0x1]  ;;  %v1540_v11 = vld [vmem:[%s5764_s21 + $0x2a0] sm:$0xff] }
 0x326   :  { %v785_v19 = vrot.slane %v780_v15, %v5145_v1  ;;  %v826_v22 = vadd.f32 %v824_v17, %v817_v62  ;;  %v1529_v62 = vld [vmem:[%s5764_s21 + $0x248] sm:$0xff] }
 0x328   :  { %v787_v21 = vadd.f32 %v785_v19, %v778_v18  ;;  %v1534_v19 = vld [vmem:[%s5764_s21 + $0x270] sm:$0xff] }
 0x32a   :  { %3554 = vmatprep.mubr.msk.f32.mxu1 %vm747_vm1, %v787_v21 }
 0x32b   :  { %3555 = vmatmul.mubr.msk.f32.vlgmr.msra.gmra.mxu1 %vm747_vm1, %v826_v22 }
 0x32c   :  { %3577 = vmatpush3.msra.mxu1 %v5041_v26  ;;  %v1024_v26 = vld [vmem:[#allocation21] sm:$0x1] }
 0x32d   :  { %3578 = vmatprep.subr.mxu1 %v1113_v10 }
 0x32e   :  { %v3799_v24 = vpop.eup %3798  ;;  %3579 = vmatpush3.msra.mxu1 %v1113_v10 }
 0x32f   :  { %3580 = vmatprep.subr.mxu1 %v1112_v23  ;;  %v1045_v14 = vmul.f32 %v3799_v24, %v1023_v20  ;;  %v1528_v24 = vld [vmem:[%s5764_s21 + $0x240] sm:$0xff] }
 0x330   :  { %3581 = vmatpush3.msra.mxu1 %v1112_v23  ;;  %v3801_v35 = vpop.eup %3800 }
 0x331   :  { %3582 = vmatprep.subr.mxu1 %v1111_v25  ;;  %v1050_v28 = vrot.slane %v1045_v14, %v5145_v1  ;;  %v1053_v29 = vmul.f32 %v1045_v14, %v1031_v51  ;;  %v1082_v39 = vmul.f32 %v3801_v35, %v1023_v20  ;;  %v1523_v20 = vld [vmem:[%s5764_s21 + $0x218] sm:$0xff] }
 0x332   :  { %3583 = vmatpush3.msra.mxu1 %v1111_v25  ;;  %v1511_v35 = vld [vmem:[%s5764_s21 + $0x1b8] sm:$0xff] }
 0x333   :  { %3584 = vmatprep.subr.mxu1 %v1110_v27  ;;  %v1054_v31 = vsub.f32 %v1024_v26, %v1053_v29  ;;  %v1052_v33 = vmul.f32 %v1050_v28, %v5131_v13  ;;  %v1104_v13 = vld [vmem:[%s5763_s28 + $0x28] sm:$0xff]  ;;  %v1090_v41 = vmul.f32 %v1082_v39, %v5138_v45  ;;  %v1087_v45 = vrot.slane %v1082_v39, %v5145_v1  ;;  %v1522_v29 = vld [vmem:[%s5764_s21 + $0x210] sm:$0xff] }
 0x334   :  { %3585 = vmatpush3.msra.mxu1 %v1110_v27  ;;  %v1510_v39 = vld [vmem:[%s5764_s21 + $0x1b0] sm:$0xff] }
 0x335   :  { %3586 = vmatprep.subr.mxu1 %v1109_v30  ;;  %v1059_v34 = vrot.slane %v1054_v31, %v5145_v1  ;;  %v1091_v47 = vsub.f32 %v1024_v26, %v1090_v41  ;;  %v1089_v58 = vmul.f32 %v1087_v45, %v5123_v4  ;;  %v1541_v4 = vld [vmem:[%s5764_s21 + $0x2a8] sm:$0xff] }
 0x336   :  { %3587 = vmatpush3.msra.mxu1 %v1109_v30  ;;  %v1517_v30 = vld [vmem:[%s5764_s21 + $0x1e8] sm:$0xff] }
 0x337   :  { %3588 = vmatprep.subr.mxu1 %v1108_v32  ;;  %v1061_v37 = vadd.f32 %v1059_v34, %v1052_v33  ;;  %v1096_v54 = vrot.slane %v1091_v47, %v5145_v1  ;;  %v1516_v34 = vld [vmem:[%s5764_s21 + $0x1e0] sm:$0xff] }
 0x338   :  { %3589 = vmatpush3.msra.mxu1 %v1108_v32 }
 0x339   :  { %3590 = vmatprep.subr.mxu1 %v1107_v36  ;;  %3608 = vmatprep.mubr.f32.mxu1 %v1061_v37  ;;  %v1098_v3 = vadd.f32 %v1096_v54, %v1089_v58  ;;  %v1492_v54 = vld [vmem:[%s5764_s21 + $0x120] sm:$0xff] }
 0x33a   :  { %3591 = vmatpush3.msra.mxu1 %v1107_v36 }
 0x33b   :  { %3592 = vmatprep.subr.mxu1 %v1106_v38 }
 0x33c   :  { %3593 = vmatpush3.msra.mxu1 %v1106_v38 }
 0x33d   :  { %3594 = vmatprep.subr.mxu1 %v1105_v40 }
 0x33e   :  { %3595 = vmatpush3.msra.mxu1 %v1105_v40 }
 0x33f   :  { %3596 = vmatprep.subr.mxu1 %v1104_v13 }
 0x340   :  { %3597 = vmatpush3.msra.mxu1 %v1104_v13  ;;  %v1505_v13 = vld [vmem:[%s5764_s21 + $0x188] sm:$0xff] }
 0x341   :  { %3598 = vmatprep.subr.mxu1 %v1103_v42 }
 0x342   :  { %3599 = vmatpush3.msra.mxu1 %v1103_v42 }
 0x343   :  { %3600 = vmatprep.subr.mxu1 %v1102_v46 }
 0x344   :  { %3601 = vmatpush3.msra.mxu1 %v1102_v46  ;;  %v1341_v51 = vpop.f32.mrf.mxu0  ;;  %v1504_v46 = vld [vmem:[%s5764_s21 + $0x180] sm:$0xff] }
 0x345   :  { %3602 = vmatprep.subr.mxu1 %v1101_v49  ;;  %v1342_v53 = vadd.f32 %v1341_v51, %v1268_v48  ;;  %v1499_v48 = vld [vmem:[%s5764_s21 + $0x158] sm:$0xff] }
 0x346   :  { %3603 = vmatpush3.msra.mxu1 %v1101_v49  ;;  %v1343_v55 = vpop.f32.mrf.mxu0 }
 0x347   :  { %v5184_v59 = vmax.f32 %v1342_v53, 0.0  ;;  %3604 = vmatprep.subr.mxu1 %v1100_v52  ;;  %v1344_v60 = vadd.f32 %v1343_v55, %v1272_v50  ;;  %v1498_v50 = vld [vmem:[%s5764_s21 + $0x150] sm:$0xff] }
 0x348   :  { %3605 = vmatpush3.msra.mxu1 %v1100_v52  ;;  %v1493_v52 = vld [vmem:[%s5764_s21 + $0x128] sm:$0xff] }
 0x349   :  { %v1350_v63 = vrot.slane %v5184_v59, 4  ;;  %v1364_v0 = vmul.f32 %v5184_v59, %v5184_v59  ;;  %v5190_v2 = vmax.f32 %v1344_v60, 0.0  ;;  %3606 = vmatprep.subr.mxu1 %v1099_v56  ;;  %v1486_v60 = vld [vmem:[%s5764_s21 + $0xf0] sm:$0xff] }
 0x34a   :  { %3607 = vmatpush3.msra.mxu1 %v1099_v56  ;;  %v1487_v56 = vld [vmem:[%s5764_s21 + $0xf8] sm:$0xff] }
 0x34b   :  { %v1351_v6 = vadd.f32 %v1350_v63, %v5184_v59  ;;  %v1366_v7 = vrot.slane %v1364_v0, 4  ;;  %v1356_v8 = vrot.slane %v5190_v2, 4  ;;  %v1365_v9 = vmul.f32 %v5190_v2, %v5190_v2  ;;  %3609 = vmatmul.mubr.f32.vlgmr.msra.gmra.mxu1 %v1098_v3  ;;  %1680 = vmatprep.subr.mxu1 %v1547_v61  ;;  %v1481_v63 = vld [vmem:[%s5764_s21 + $0xc8] sm:$0xff] }
 0x34c   :  { %1681 = vmatpush1.msra.mxu1 %v1546_v5  ;;  %v1475_v5 = vld [vmem:[%s5764_s21 + $0x98] sm:$0xff] }
 0x34d   :  { %v1352_v15 = vrot.slane %v1351_v6, 2  ;;  %v1367_v16 = vadd.f32 %v1366_v7, %v1364_v0  ;;  %v1357_v17 = vadd.f32 %v1356_v8, %v5190_v2  ;;  %v1372_v18 = vrot.slane %v1365_v9, 4  ;;  %1682 = vmatprep.subr.mxu1 %v1541_v4  ;;  %v1480_v0 = vld [vmem:[%s5764_s21 + $0xc0] sm:$0xff]  ;;  %v1474_v4 = vld [vmem:[%s5764_s21 + $0x90] sm:$0xff]  ;;  %v1463_v8 = vld [vmem:[%s5764_s21 + $0x38] sm:$0xff] }
 0x34e   :  { %1683 = vmatpush1.msra.mxu1 %v1540_v11  ;;  %v1468_v7 = vld [vmem:[%s5764_s21 + $0x60] sm:$0xff]  ;;  %v4720_v11 = vmov 1966171168  }
 0x34f   :  { %v1353_v21 = vadd.f32 %v1352_v15, %v1351_v6  ;;  %v1368_v22 = vrot.slane %v1367_v16, 2  ;;  %v1358_v10 = vrot.slane %v1357_v17, 2  ;;  %v1373_v23 = vadd.f32 %v1372_v18, %v1365_v9  ;;  %1684 = vmatprep.subr.mxu1 %v1535_v12  ;;  %v1469_v6 = vld [vmem:[%s5764_s21 + $0x68] sm:$0xff]  ;;  %v1462_v9 = vld [vmem:[%s5764_s21 + $0x30] sm:$0xff] }
 0x350   :  { %1685 = vmatpush1.msra.mxu1 %v1534_v19  ;;  %v1394_v12 = vunpack.c.l.s4 %v4720_v11  ;;  %v1457_v15 = vld [vmem:[%s5764_s21 + $0x8] sm:$0xff]  ;;  %v1642_v18 = vld [vmem:[%s5764_s21 + $0x5d0] sm:$0xff] }
 0x351   :  { %v1354_v25 = vrot.slane %v1353_v21, 1  ;;  %v1369_v14 = vadd.f32 %v1368_v22, %v1367_v16  ;;  %v1359_v27 = vadd.f32 %v1358_v10, %v1357_v17  ;;  %v1374_v28 = vrot.slane %v1373_v23, 2  ;;  %1686 = vmatprep.subr.mxu1 %v1529_v62  ;;  %v1456_v16 = vld [vmem:[%s5764_s21] sm:$0xff]  ;;  %v1643_v17 = vld [vmem:[%s5764_s21 + $0x5d8] sm:$0xff]  ;;  %v1637_v62 = vld [vmem:[%s5764_s21 + $0x5a8] sm:$0xff] }
 0x352   :  { %1687 = vmatpush1.msra.mxu1 %v1528_v24  ;;  %v1395_v19 = vunpack.c.0.s8 %v1394_v12  ;;  %v1631_v22 = vld [vmem:[%s5764_s21 + $0x578] sm:$0xff]  ;;  %v1550_v11 = vld [vmem:[%s5764_s21 + $0x2f0] sm:$0xff]  ;;  %v1545_v12 = vld [vmem:[%s5764_s21 + $0x2c8] sm:$0xff] }
 0x353   :  { %v1355_v26 = vadd.f32 %v1354_v25, %v1353_v21  ;;  %v1370_v31 = vrot.slane %v1369_v14, 1  ;;  %v1360_v32 = vrot.slane %v1359_v27, 1  ;;  %v1375_v33 = vadd.f32 %v1374_v28, %v1373_v23  ;;  %1688 = vmatprep.subr.mxu1 %v1523_v20  ;;  %v1636_v21 = vld [vmem:[%s5764_s21 + $0x5a0] sm:$0xff]  ;;  %v1630_v23 = vld [vmem:[%s5764_s21 + $0x570] sm:$0xff]  ;;  %v1625_v25 = vld [vmem:[%s5764_s21 + $0x548] sm:$0xff] }
 0x354   :  { %1689 = vmatpush1.msra.mxu1 %v1522_v29  ;;  %v5243_v24 = vsub.s32 %v1395_v19, %v5142_v57  ;;  %v1619_v28 = vld [vmem:[%s5764_s21 + $0x518] sm:$0xff]  ;;  %v1618_v29 = vld [vmem:[%s5764_s21 + $0x510] sm:$0xff]  ;;  %v1532_v19 = vld [vmem:[%s5764_s21 + $0x260] sm:$0xff] }
 0x355   :  { %v5209_v36 = vmul.f32 0.125, %v1355_v26  ;;  %v1371_v37 = vadd.f32 %v1370_v31, %v1369_v14  ;;  %v1376_v38 = vrot.slane %v1375_v33, 1  ;;  %1690 = vmatprep.subr.mxu1 %v1517_v30  ;;  %v1361_v40 = vadd.f32 %v1360_v32, %v1359_v27  ;;  %v1624_v14 = vld [vmem:[%s5764_s21 + $0x540] sm:$0xff]  ;;  %v1613_v26 = vld [vmem:[%s5764_s21 + $0x4e8] sm:$0xff]  ;;  %v1348_v31 = vld [vmem:[#allocation27] sm:$0x3] }
 0x356   :  { %1691 = vmatpush1.msra.mxu1 %v1516_v34  ;;  %v1612_v32 = vld [vmem:[%s5764_s21 + $0x4e0] sm:$0xff]  ;;  %v1607_v34 = vld [vmem:[%s5764_s21 + $0x4b8] sm:$0xff] }
 0x357   :  { %v1378_v41 = vmul.f32 0.125, %v1371_v37  ;;  %v1380_v42 = vmul.f32 %v5209_v36, %v5209_v36  ;;  %v1377_v43 = vadd.f32 %v1376_v38, %v1375_v33  ;;  %1692 = vmatprep.subr.mxu1 %v1511_v35  ;;  %v5216_v47 = vmul.f32 0.125, %v1361_v40  ;;  %v1606_v35 = vld [vmem:[%s5764_s21 + $0x4b0] sm:$0xff]  ;;  %v1601_v38 = vld [vmem:[%s5764_s21 + $0x488] sm:$0xff] }
 0x358   :  { %1693 = vmatpush1.msra.mxu1 %v1510_v39  ;;  %v1600_v39 = vld [vmem:[%s5764_s21 + $0x480] sm:$0xff] }
 0x359   :  { %v1382_v49 = vsub.f32 %v1378_v41, %v1380_v42  ;;  %v1379_v45 = vmul.f32 0.125, %v1377_v43  ;;  %1694 = vmatprep.subr.mxu1 %v1505_v13  ;;  %v1381_v51 = vmul.f32 %v5216_v47, %v5216_v47  ;;  %v1595_v41 = vld [vmem:[%s5764_s21 + $0x458] sm:$0xff]  ;;  %v1594_v42 = vld [vmem:[%s5764_s21 + $0x450] sm:$0xff] }
 0x35a   :  { %1695 = vmatpush1.msra.mxu1 %v1504_v46 }
 0x35b   :  { %v1384_v53 = vmax.f32 %v1382_v49, 0.0  ;;  %1696 = vmatprep.subr.mxu1 %v1499_v48  ;;  %v1383_v55 = vsub.f32 %v1379_v45, %v1381_v51  ;;  %v1589_v48 = vld [vmem:[%s5764_s21 + $0x428] sm:$0xff]  ;;  %v1588_v49 = vld [vmem:[%s5764_s21 + $0x420] sm:$0xff]  ;;  %v1582_v51 = vld [vmem:[%s5764_s21 + $0x3f0] sm:$0xff] }
 0x35c   :  { %1697 = vmatpush1.msra.mxu1 %v1498_v50  ;;  %v1583_v50 = vld [vmem:[%s5764_s21 + $0x3f8] sm:$0xff] }
 0x35d   :  { %v1386_v58 = vadd.f32 1e-05, %v1384_v53  ;;  %1698 = vmatprep.subr.mxu1 %v1493_v52  ;;  %v1385_v61 = vmax.f32 %v1383_v55, 0.0  ;;  %v1349_v53 = vld [vmem:[#allocation28] sm:$0x3]  ;;  %v1571_v55 = vld [vmem:[%s5764_s21 + $0x398] sm:$0xff] }
 0x35e   :  { %1699 = vmatpush1.msra.mxu1 %v1492_v54 }
 0x35f   :  { %1700 = vmatprep.subr.mxu1 %v1487_v56  ;;  %v1387_v3 = vadd.f32 1e-05, %v1385_v61  ;;  %3802 = vrsqrt.f32 %v1386_v58  ;;  %v1570_v56 = vld [vmem:[%s5764_s21 + $0x390] sm:$0xff]  ;;  %v1564_v61 = vld [vmem:[%s5764_s21 + $0x360] sm:$0xff] }
 0x360   :  { %1701 = vmatpush1.msra.mxu1 %v1486_v60  ;;  %v1565_v60 = vld [vmem:[%s5764_s21 + $0x368] sm:$0xff] }
 0x361   :  { %1702 = vmatprep.subr.mxu1 %v1481_v63  ;;  %3804 = vrsqrt.f32 %v1387_v3 }
 0x362   :  { %1703 = vmatpush1.msra.mxu1 %v1480_v0 }
 0x363   :  { %1704 = vmatprep.subr.mxu1 %v1475_v5 }
 0x364   :  { %1705 = vmatpush1.msra.mxu1 %v1474_v4  ;;  %v1559_v4 = vld [vmem:[%s5764_s21 + $0x338] sm:$0xff] }
 0x365   :  { %1706 = vmatprep.subr.mxu1 %v1469_v6  ;;  %v1558_v6 = vld [vmem:[%s5764_s21 + $0x330] sm:$0xff] }
 0x366   :  { %1707 = vmatpush1.msra.mxu1 %v1468_v7 }
 0x367   :  { %1708 = vmatprep.subr.mxu1 %v1463_v8 }
 0x368   :  { %1709 = vmatpush1.msra.mxu1 %v1462_v9  ;;  %v1553_v9 = vld [vmem:[%s5764_s21 + $0x308] sm:$0xff] }
 0x369   :  { %1710 = vmatprep.subr.mxu1 %v1457_v15  ;;  %v1544_v15 = vld [vmem:[%s5764_s21 + $0x2c0] sm:$0xff] }
 0x36a   :  { %1711 = vmatpush1.msra.mxu1 %v1456_v16  ;;  %v1539_v16 = vld [vmem:[%s5764_s21 + $0x298] sm:$0xff] }
 0x36b   :  { %1712 = vmatprep.subr.mxu1 %v1643_v17  ;;  %v1538_v17 = vld [vmem:[%s5764_s21 + $0x290] sm:$0xff] }
 0x36c   :  { %1713 = vmatpush2.msra.mxu1 %v1642_v18  ;;  %v3803_v10 = vpop.eup %3802  ;;  %v1533_v18 = vld [vmem:[%s5764_s21 + $0x268] sm:$0xff] }
 0x36d   :  { %1714 = vmatprep.subr.mxu1 %v1637_v62  ;;  %v1527_v62 = vld [vmem:[%s5764_s21 + $0x238] sm:$0xff] }
 0x36e   :  { %v3805_v20 = vpop.eup %3804  ;;  %1715 = vmatpush2.msra.mxu1 %v1636_v21  ;;  %v1526_v21 = vld [vmem:[%s5764_s21 + $0x230] sm:$0xff] }
 0x36f   :  { %1716 = vmatprep.subr.mxu1 %v1631_v22  ;;  %v1392_v27 = vcombine.low %v3803_v10, %v3805_v20  ;;  %v1521_v22 = vld [vmem:[%s5764_s21 + $0x208] sm:$0xff]  ;;  %v1520_v10 = vld [vmem:[%s5764_s21 + $0x200] sm:$0xff]  ;;  %v1514_v20 = vld [vmem:[%s5764_s21 + $0x1d0] sm:$0xff] }
 0x370   :  { %1717 = vmatpush2.msra.mxu1 %v1630_v23  ;;  %v1515_v23 = vld [vmem:[%s5764_s21 + $0x1d8] sm:$0xff] }
 0x371   :  { %1718 = vmatprep.subr.mxu1 %v1625_v25  ;;  %v1399_v30 = vrot.slane %v1392_v27, %v5243_v24  ;;  %v1509_v25 = vld [vmem:[%s5764_s21 + $0x1a8] sm:$0xff]  ;;  %v1503_v27 = vld [vmem:[%s5764_s21 + $0x178] sm:$0xff] }
 0x372   :  { %1719 = vmatpush2.msra.mxu1 %v1624_v14  ;;  %v1508_v14 = vld [vmem:[%s5764_s21 + $0x1a0] sm:$0xff] }
 0x373   :  { %1720 = vmatprep.subr.mxu1 %v1619_v28  ;;  %v1406_v33 = vrot.slane %v1399_v30, %v5243_v24  ;;  %v1502_v28 = vld [vmem:[%s5764_s21 + $0x170] sm:$0xff]  ;;  %v1496_v30 = vld [vmem:[%s5764_s21 + $0x140] sm:$0xff] }
 0x374   :  { %1721 = vmatpush2.msra.mxu1 %v1618_v29  ;;  %v1497_v29 = vld [vmem:[%s5764_s21 + $0x148] sm:$0xff] }
 0x375   :  { %1722 = vmatprep.subr.mxu1 %v1613_v26  ;;  %v1408_v37 = vmul.f32 %v1406_v33, %v1348_v31  ;;  %v1491_v26 = vld [vmem:[%s5764_s21 + $0x118] sm:$0xff]  ;;  %v1490_v31 = vld [vmem:[%s5764_s21 + $0x110] sm:$0xff]  ;;  %v1484_v33 = vld [vmem:[%s5764_s21 + $0xe0] sm:$0xff] }
 0x376   :  { %1723 = vmatpush2.msra.mxu1 %v1612_v32  ;;  %v1485_v32 = vld [vmem:[%s5764_s21 + $0xe8] sm:$0xff] }
 0x377   :  { %1724 = vmatprep.subr.mxu1 %v1607_v34  ;;  %v1413_v40 = vrot.slane %v1408_v37, %v5145_v1  ;;  %v1417_v13 = vrot.slane %v1408_v37, %v5173_v44  ;;  %v1479_v34 = vld [vmem:[%s5764_s21 + $0xb8] sm:$0xff]  ;;  %v1473_v37 = vld [vmem:[%s5764_s21 + $0x88] sm:$0xff] }
 0x378   :  { %1725 = vmatpush2.msra.mxu1 %v1606_v35  ;;  %v1478_v35 = vld [vmem:[%s5764_s21 + $0xb0] sm:$0xff] }
 0x379   :  { %1726 = vmatprep.subr.mxu1 %v1601_v38  ;;  %v1422_v43 = vmul.f32 %v1413_v40, %v5209_v36  ;;  %v1423_v46 = vmul.f32 %v1417_v13, %v5216_v47  ;;  %v1577_v36 = vld [vmem:[%s5764_s21 + $0x3c8] sm:$0xff]  ;;  %v1576_v47 = vld [vmem:[%s5764_s21 + $0x3c0] sm:$0xff]  ;;  %v1421_v63 = vmul.f32 %v1417_v13, %v5190_v2  ;;  %v1420_v3 = vmul.f32 %v1413_v40, %v5184_v59  ;;  %v1551_v59 = vld [vmem:[%s5764_s21 + $0x2f8] sm:$0xff] }
 0x37a   :  { %1727 = vmatpush2.msra.mxu1 %v1600_v39  ;;  %v1552_v2 = vld [vmem:[%s5764_s21 + $0x300] sm:$0xff]  ;;  %v1467_v39 = vld [vmem:[%s5764_s21 + $0x58] sm:$0xff]  ;;  %v1466_v40 = vld [vmem:[%s5764_s21 + $0x50] sm:$0xff] }
 0x37b   :  { %1728 = vmatprep.subr.mxu1 %v1595_v41  ;;  %v1426_v45 = vcombine.low %v1422_v43, %v1423_v46  ;;  %v1472_v38 = vld [vmem:[%s5764_s21 + $0x80] sm:$0xff]  ;;  %v1461_v13 = vld [vmem:[%s5764_s21 + $0x28] sm:$0xff]  ;;  %v1646_v43 = vld [vmem:[%s5764_s21 + $0x5f0] sm:$0xff] }
 0x37c   :  { %1729 = vmatpush2.msra.mxu1 %v1594_v42  ;;  %v1460_v41 = vld [vmem:[%s5764_s21 + $0x20] sm:$0xff]  ;;  %v1647_v42 = vld [vmem:[%s5764_s21 + $0x5f8] sm:$0xff]  ;;  %v1641_v46 = vld [vmem:[%s5764_s21 + $0x5c8] sm:$0xff] }
 0x37d   :  { %1730 = vmatprep.subr.mxu1 %v1589_v48  ;;  %v1433_v52 = vrot.slane %v1426_v45, %v5243_v24  ;;  %v1640_v48 = vld [vmem:[%s5764_s21 + $0x5c0] sm:$0xff]  ;;  %v1634_v45 = vld [vmem:[%s5764_s21 + $0x590] sm:$0xff] }
 0x37e   :  { %1731 = vmatpush2.msra.mxu1 %v1588_v49  ;;  %v1635_v49 = vld [vmem:[%s5764_s21 + $0x598] sm:$0xff] }
 0x37f   :  { %1732 = vmatprep.subr.mxu1 %v1583_v50  ;;  %v1440_v54 = vrot.slane %v1433_v52, %v5243_v24  ;;  %v1629_v50 = vld [vmem:[%s5764_s21 + $0x568] sm:$0xff]  ;;  %v1628_v52 = vld [vmem:[%s5764_s21 + $0x560] sm:$0xff] }
 0x380   :  { %1733 = vmatpush2.msra.mxu1 %v1582_v51  ;;  %v4721_v51 = vmov 0.0  }
 0x381   :  { %1734 = vmatprep.subr.mxu1 %v1577_v36  ;;  %v1442_v58 = vsub.f32 %v1349_v53, %v1440_v54  ;;  %3611 = vmatprep.subr.mxu0 %v4721_v51  ;;  %v1986_v36 = vld [vmem:[#allocation46 + $0x38] sm:$0xff]  ;;  %v1623_v53 = vld [vmem:[%s5764_s21 + $0x538] sm:$0xff]  ;;  %v1985_v54 = vld [vmem:[#allocation46 + $0x30] sm:$0xff] }
 0x382   :  { %1735 = vmatpush2.msra.mxu1 %v1576_v47  ;;  %v1622_v47 = vld [vmem:[%s5764_s21 + $0x530] sm:$0xff] }
 0x383   :  { %1736 = vmatprep.subr.mxu1 %v1571_v55  ;;  %v1451_v0 = vrot.slane %v1442_v58, %v5173_v44  ;;  %v1447_v5 = vrot.slane %v1442_v58, %v5145_v1  ;;  %v1617_v55 = vld [vmem:[%s5764_s21 + $0x508] sm:$0xff]  ;;  %v1984_v58 = vld [vmem:[#allocation46 + $0x28] sm:$0xff] }
 0x384   :  { %1737 = vmatpush2.msra.mxu1 %v1570_v56  ;;  %v1616_v56 = vld [vmem:[%s5764_s21 + $0x500] sm:$0xff] }
 0x385   :  { %1738 = vmatprep.subr.mxu1 %v1565_v60  ;;  %v1455_v7 = vadd.f32 %v1451_v0, %v1421_v63  ;;  %v5281_v8 = vadd.f32 %v1447_v5, %v1420_v3  ;;  %v1611_v60 = vld [vmem:[%s5764_s21 + $0x4d8] sm:$0xff]  ;;  %v1605_v0 = vld [vmem:[%s5764_s21 + $0x4a8] sm:$0xff]  ;;  %v1604_v3 = vld [vmem:[%s5764_s21 + $0x4a0] sm:$0xff] }
 0x386   :  { %1739 = vmatpush2.msra.mxu1 %v1564_v61  ;;  %v1610_v61 = vld [vmem:[%s5764_s21 + $0x4d0] sm:$0xff]  ;;  %v1983_v63 = vld [vmem:[#allocation46 + $0x20] sm:$0xff] }
 0x387   :  { %1740 = vmatprep.subr.mxu1 %v1559_v4  ;;  %1744 = vmatprep.mubr.f32.mxu1 %v1455_v7  ;;  %v1982_v5 = vld [vmem:[#allocation46 + $0x18] sm:$0xff]  ;;  %v1599_v4 = vld [vmem:[%s5764_s21 + $0x478] sm:$0xff] }
 0x388   :  { %1741 = vmatpush2.msra.mxu1 %v1558_v6  ;;  %1815 = vmatprep.mubr.f32.mxu0 %v1455_v7  ;;  %v1598_v6 = vld [vmem:[%s5764_s21 + $0x470] sm:$0xff] }
 0x389   :  { %1742 = vmatprep.subr.mxu1 %v1553_v9  ;;  %1816 = vmatmul.mubr.f32.vlgmr.msra.gmra.mxu0 %v5281_v8  ;;  %v1593_v9 = vld [vmem:[%s5764_s21 + $0x448] sm:$0xff] }
 0x38a   :  { %1743 = vmatpush2.msra.mxu1 %v1552_v2  ;;  %3612 = vmatpush3.msra.mxu0 %v1986_v36  ;;  %v1592_v2 = vld [vmem:[%s5764_s21 + $0x440] sm:$0xff] }
 0x38b   :  { %1745 = vmatmul.mubr.f32.vlgmr.msra.gmra.mxu1 %v5281_v8  ;;  %1822 = vmatprep.subr.mxu1 %v1551_v59  ;;  %v1980_v59 = vld [vmem:[#allocation46 + $0x8] sm:$0xff] }
 0x38c   :  { %1823 = vmatpush1.msra.mxu1 %v1550_v11  ;;  %1886 = vmatprep.mubr.f32.mxu1 %v1455_v7  ;;  %v1981_v7 = vld [vmem:[#allocation46 + $0x10] sm:$0xff]  ;;  %v1587_v11 = vld [vmem:[%s5764_s21 + $0x418] sm:$0xff] }
 0x38d   :  { %1824 = vmatprep.subr.mxu1 %v1545_v12  ;;  %3613 = vmatprep.subr.mxu0 %v4721_v51  ;;  %v1586_v12 = vld [vmem:[%s5764_s21 + $0x410] sm:$0xff] }
 0x38e   :  { %1825 = vmatpush1.msra.mxu1 %v1544_v15  ;;  %3614 = vmatpush3.msra.mxu0 %v1985_v54  ;;  %v1979_v15 = vld [vmem:[#allocation46] sm:$0xff] }
 0x38f   :  { %1826 = vmatprep.subr.mxu1 %v1539_v16  ;;  %3615 = vmatprep.subr.mxu0 %v4721_v51  ;;  %v1581_v16 = vld [vmem:[%s5764_s21 + $0x3e8] sm:$0xff] }
 0x390   :  { %1827 = vmatpush1.msra.mxu1 %v1538_v17  ;;  %3616 = vmatpush3.msra.mxu0 %v1984_v58  ;;  %v1580_v17 = vld [vmem:[%s5764_s21 + $0x3e0] sm:$0xff]  ;;  %v3326_v58 = vld [vmem:[#allocation22] ss:$0 sm:$0xff] }
 0x391   :  { %1828 = vmatprep.subr.mxu1 %v1533_v18  ;;  %3617 = vmatprep.subr.mxu0 %v4721_v51  ;;  %v1575_v18 = vld [vmem:[%s5764_s21 + $0x3b8] sm:$0xff] }
 0x392   :  { %1829 = vmatpush1.msra.mxu1 %v1532_v19  ;;  %3618 = vmatpush3.msra.mxu0 %v1983_v63  ;;  %v1574_v19 = vld [vmem:[%s5764_s21 + $0x3b0] sm:$0xff] }
 0x393   :  { %1830 = vmatprep.subr.mxu1 %v1527_v62  ;;  %3619 = vmatprep.subr.mxu0 %v4721_v51  ;;  %v1569_v62 = vld [vmem:[%s5764_s21 + $0x388] sm:$0xff] }
 0x394   :  { %1831 = vmatpush1.msra.mxu1 %v1526_v21  ;;  %3620 = vmatpush3.msra.mxu0 %v1982_v5  ;;  %v1568_v21 = vld [vmem:[%s5764_s21 + $0x380] sm:$0xff] }
 0x395   :  { %1832 = vmatprep.subr.mxu1 %v1521_v22  ;;  %3621 = vmatprep.subr.mxu0 %v4721_v51  ;;  %v1563_v22 = vld [vmem:[%s5764_s21 + $0x358] sm:$0xff] }
 0x396   :  { %1833 = vmatpush1.msra.mxu1 %v1520_v10  ;;  %3622 = vmatpush3.msra.mxu0 %v1981_v7  ;;  %v1562_v10 = vld [vmem:[%s5764_s21 + $0x350] sm:$0xff] }
 0x397   :  { %1834 = vmatprep.subr.mxu1 %v1515_v23  ;;  %3623 = vmatprep.subr.mxu0 %v4721_v51  ;;  %v1557_v23 = vld [vmem:[%s5764_s21 + $0x328] sm:$0xff] }
 0x398   :  { %1835 = vmatpush1.msra.mxu1 %v1514_v20  ;;  %3624 = vmatpush3.msra.mxu0 %v1980_v59  ;;  %v1556_v20 = vld [vmem:[%s5764_s21 + $0x320] sm:$0xff] }
 0x399   :  { %1836 = vmatprep.subr.mxu1 %v1509_v25  ;;  %3625 = vmatprep.subr.mxu0 %v4721_v51  ;;  %v2300_v25 = vld [vmem:[#allocation49 + $0x38] sm:$0xff] }
 0x39a   :  { %1837 = vmatpush1.msra.mxu1 %v1508_v14  ;;  %3626 = vmatpush3.msra.mxu0 %v1979_v15  ;;  %v2299_v14 = vld [vmem:[#allocation49 + $0x30] sm:$0xff] }
 0x39b   :  { %1838 = vmatprep.subr.mxu1 %v1503_v27  ;;  %3627 = vmatprep.mubr.msk.f32.mxu0 %vm4722_vm2, %v4721_v51  ;;  %v2298_v27 = vld [vmem:[#allocation49 + $0x28] sm:$0xff] }
 0x39c   :  { %1839 = vmatpush1.msra.mxu1 %v1502_v28  ;;  %3630 = vmatprep.subr.mxu0 %v4721_v51  ;;  %v2297_v28 = vld [vmem:[#allocation49 + $0x20] sm:$0xff] }
 0x39d   :  { %1840 = vmatprep.subr.mxu1 %v1497_v29  ;;  %v2296_v29 = vld [vmem:[#allocation49 + $0x18] sm:$0xff] }
 0x39e   :  { %1841 = vmatpush1.msra.mxu1 %v1496_v30  ;;  %v2294_v30 = vld [vmem:[#allocation49 + $0x8] sm:$0xff] }
 0x39f   :  { %1842 = vmatprep.subr.mxu1 %v1491_v26  ;;  %v2293_v26 = vld [vmem:[#allocation49] sm:$0xff] }
 0x3a0   :  { %1843 = vmatpush1.msra.mxu1 %v1490_v31 }
 0x3a1   :  { %1844 = vmatprep.subr.mxu1 %v1485_v32 }
 0x3a2   :  { %1845 = vmatpush1.msra.mxu1 %v1484_v33  ;;  %v3320_v33 = vld [vmem:[#allocation15] ss:$0 sm:$0xff] }
 0x3a3   :  { %1846 = vmatprep.subr.mxu1 %v1479_v34 }
 0x3a4   :  { %1847 = vmatpush1.msra.mxu1 %v1478_v35 }
 0x3a5   :  { %1848 = vmatprep.subr.mxu1 %v1473_v37 }
 0x3a6   :  { %1849 = vmatpush1.msra.mxu1 %v1472_v38 }
 0x3a7   :  { %1850 = vmatprep.subr.mxu1 %v1467_v39 }
 0x3a8   :  { %1851 = vmatpush1.msra.mxu1 %v1466_v40 }
 0x3a9   :  { %1852 = vmatprep.subr.mxu1 %v1461_v13 }
 0x3aa   :  { %1853 = vmatpush1.msra.mxu1 %v1460_v41 }
 0x3ab   :  { %1854 = vmatprep.subr.mxu1 %v1647_v42 }
 0x3ac   :  { %1855 = vmatpush2.msra.mxu1 %v1646_v43 }
 0x3ad   :  { %1856 = vmatprep.subr.mxu1 %v1641_v46 }
 0x3ae   :  { %1857 = vmatpush2.msra.mxu1 %v1640_v48 }
 0x3af   :  { %1858 = vmatprep.subr.mxu1 %v1635_v49 }
 0x3b0   :  { %1859 = vmatpush2.msra.mxu1 %v1634_v45 }
 0x3b1   :  { %1860 = vmatprep.subr.mxu1 %v1629_v50 }
 0x3b2   :  { %1861 = vmatpush2.msra.mxu1 %v1628_v52 }
 0x3b3   :  { %1862 = vmatprep.subr.mxu1 %v1623_v53 }
 0x3b4   :  { %1863 = vmatpush2.msra.mxu1 %v1622_v47 }
 0x3b5   :  { %1864 = vmatprep.subr.mxu1 %v1617_v55 }
 0x3b6   :  { %1865 = vmatpush2.msra.mxu1 %v1616_v56 }
 0x3b7   :  { %1866 = vmatprep.subr.mxu1 %v1611_v60 }
 0x3b8   :  { %1867 = vmatpush2.msra.mxu1 %v1610_v61 }
 0x3b9   :  { %1868 = vmatprep.subr.mxu1 %v1605_v0 }
 0x3ba   :  { %1869 = vmatpush2.msra.mxu1 %v1604_v3 }
 0x3bb   :  { %1870 = vmatprep.subr.mxu1 %v1599_v4 }
 0x3bc   :  { %1871 = vmatpush2.msra.mxu1 %v1598_v6 }
 0x3bd   :  { %1872 = vmatprep.subr.mxu1 %v1593_v9 }
 0x3be   :  { %1873 = vmatpush2.msra.mxu1 %v1592_v2 }
 0x3bf   :  { %1874 = vmatprep.subr.mxu1 %v1587_v11 }
 0x3c0   :  { %1875 = vmatpush2.msra.mxu1 %v1586_v12 }
 0x3c1   :  { %1876 = vmatprep.subr.mxu1 %v1581_v16 }
 0x3c2   :  { %1877 = vmatpush2.msra.mxu1 %v1580_v17 }
 0x3c3   :  { %1878 = vmatprep.subr.mxu1 %v1575_v18 }
 0x3c4   :  { %1879 = vmatpush2.msra.mxu1 %v1574_v19 }
 0x3c5   :  { %1880 = vmatprep.subr.mxu1 %v1569_v62 }
 0x3c6   :  { %1881 = vmatpush2.msra.mxu1 %v1568_v21 }
 0x3c7   :  { %1882 = vmatprep.subr.mxu1 %v1563_v22 }
 0x3c8   :  { %1883 = vmatpush2.msra.mxu1 %v1562_v10 }
 0x3c9   :  { %1884 = vmatprep.subr.mxu1 %v1557_v23 }
 0x3ca   :  { %1885 = vmatpush2.msra.mxu1 %v1556_v20 }
 0x3cb   :  { %1887 = vmatmul.mubr.f32.vlgmr.msra.gmra.mxu1 %v5281_v8  ;;  %3652 = vmatprep.subr.mxu1 %v4721_v51  ;;  %v2295_v8 = vld [vmem:[#allocation49 + $0x10] sm:$0xff] }
 0x3cc   :  { %3653 = vmatpush3.msra.mxu1 %v2300_v25  ;;  %3668 = vmatprep.mubr.msk.f32.mxu1 %vm4722_vm2, %v4721_v51 }
 0x3cd   :  { %3654 = vmatprep.subr.mxu1 %v4721_v51 }
 0x3ce   :  { %3655 = vmatpush3.msra.mxu1 %v2299_v14 }
 0x3cf   :  { %3656 = vmatprep.subr.mxu1 %v4721_v51 }
 0x3d0   :  { %3657 = vmatpush3.msra.mxu1 %v2298_v27 }
 0x3d1   :  { %3658 = vmatprep.subr.mxu1 %v4721_v51 }
 0x3d2   :  { %3659 = vmatpush3.msra.mxu1 %v2297_v28 }
 0x3d3   :  { %3660 = vmatprep.subr.mxu1 %v4721_v51 }
 0x3d4   :  { %3661 = vmatpush3.msra.mxu1 %v2296_v29 }
 0x3d5   :  { %3662 = vmatprep.subr.mxu1 %v4721_v51 }
 0x3d6   :  { %3663 = vmatpush3.msra.mxu1 %v2295_v8 }
 0x3d7   :  { %3664 = vmatprep.subr.mxu1 %v4721_v51 }
 0x3d8   :  { %3665 = vmatpush3.msra.mxu1 %v2294_v30 }
 0x3d9   :  { %3666 = vmatprep.subr.mxu1 %v4721_v51 }
 0x3da   :  { %3667 = vmatpush3.msra.mxu1 %v2293_v26 }
 0x3eb   :  { %v3556_v31 = vpop.f32.mrf.mxu1 }
 0x3ec   :  { %v5379_v38 = vadd.f32 %v3556_v31, %v3320_v33 }
 0x3ed   :  { %v914_v32 = vpop.f32.mrf.mxu1 }
 0x3ee   :  { %v5373_v34 = vadd.f32 %v3320_v33, %v914_v32  ;;  %v2135_v13 = vsel %vm661_vm0, %v5379_v38, 0.0  ;;  %v2143_v41 = vmul.f32 %v5379_v38, %v5379_v38 }
 0x3ef   :  { %v2136_v46 = vrot.slane %v2135_v13, 4 }
 0x3f0   :  { %v1895_v35 = vsel %vm661_vm0, %v5373_v34, 0.0  ;;  %v1903_v37 = vmul.f32 %v5373_v34, %v5373_v34  ;;  %v2144_v48 = vsel %vm661_vm0, %v2143_v41, 0.0 }
 0x3f1   :  { %v1896_v39 = vrot.slane %v1895_v35, 4  ;;  %v2137_v50 = vadd.f32 %v2136_v46, %v2135_v13  ;;  %v2145_v52 = vrot.slane %v2144_v48, 4 }
 0x3f2   :  { %v1904_v40 = vsel %vm661_vm0, %v1903_v37, 0.0 }
 0x3f3   :  { %v1897_v42 = vadd.f32 %v1896_v39, %v1895_v35  ;;  %v1905_v43 = vrot.slane %v1904_v40, 4  ;;  %v2138_v47 = vrot.slane %v2137_v50, 2  ;;  %v2146_v54 = vadd.f32 %v2145_v52, %v2144_v48 }
 0x3f5   :  { %v1898_v49 = vrot.slane %v1897_v42, 2  ;;  %v1906_v45 = vadd.f32 %v1905_v43, %v1904_v40  ;;  %v2139_v60 = vadd.f32 %v2138_v47, %v2137_v50  ;;  %v2147_v61 = vrot.slane %v2146_v54, 2 }
 0x3f7   :  { %v1899_v36 = vadd.f32 %v1898_v49, %v1897_v42  ;;  %v1907_v53 = vrot.slane %v1906_v45, 2  ;;  %v2140_v2 = vrot.slane %v2139_v60, 1  ;;  %v2148_v59 = vadd.f32 %v2147_v61, %v2146_v54 }
 0x3f9   :  { %v1900_v55 = vrot.slane %v1899_v36, 1  ;;  %v1908_v56 = vadd.f32 %v1907_v53, %v1906_v45  ;;  %v2141_v25 = vadd.f32 %v2140_v2, %v2139_v60  ;;  %v2149_v27 = vrot.slane %v2148_v59, 1 }
 0x3fb   :  { %v1901_v0 = vadd.f32 %v1900_v55, %v1899_v36  ;;  %v1909_v5 = vrot.slane %v1908_v56, 1  ;;  %v5405_v39 = vmul.f32 0.125, %v2141_v25  ;;  %v2150_v40 = vadd.f32 %v2149_v27, %v2148_v59  ;;  %v1939_v27 = vld [vmem:[#allocation40] sm:$0x1] }
 0x3fd   :  { %v5395_v12 = vmul.f32 0.125, %v1901_v0  ;;  %v1910_v18 = vadd.f32 %v1909_v5, %v1908_v56  ;;  %v2151_v52 = vmul.f32 0.125, %v2150_v40  ;;  %v2152_v36 = vmul.f32 %v5405_v39, %v5405_v39 }
 0x3ff   :  { %v1911_v28 = vmul.f32 0.125, %v1910_v18  ;;  %v1912_v29 = vmul.f32 %v5395_v12, %v5395_v12  ;;  %v2153_v0 = vsub.f32 %v2151_v52, %v2152_v36  ;;  %v1893_v18 = vld [vmem:[#allocation31] sm:$0x1]  ;;  %v2718_v52 = vld [vmem:[%s5765_s1 + $0x168] sm:$0xff] }
 0x401   :  { %v1913_v13 = vsub.f32 %v1911_v28, %v1912_v29  ;;  %v2154_v2 = vmax.f32 %v2153_v0, 0.0  ;;  %v2177_v0 = vld [vmem:[#allocation48 + $0x18] sm:$0xff] }
 0x403   :  { %v1914_v53 = vmax.f32 %v1913_v13, 0.0 }
 0x40b   :  { %v3610_v63 = vpop.f32.mrf.mxu1 }
 0x40c   :  { %v5387_v3 = vadd.f32 %v3610_v63, %v3326_v58  ;;  %v1915_v63 = vadd.f32 1e-05, %v1914_v53 }
 0x40d   :  { %v1188_v4 = vpop.f32.mrf.mxu1 }
 0x40e   :  { %v2254_v6 = vsel %vm747_vm1, %v5387_v3, 0.0  ;;  %v2262_v7 = vmul.f32 %v5387_v3, %v5387_v3  ;;  %v5393_v9 = vadd.f32 %v3326_v58, %v1188_v4  ;;  %3806 = vrsqrt.f32 %v1915_v63 }
 0x40f   :  { %v2255_v11 = vrot.slane %v2254_v6, 4 }
 0x410   :  { %v2263_v15 = vsel %vm747_vm1, %v2262_v7, 0.0  ;;  %v1940_v16 = vsel %vm747_vm1, %v5393_v9, 0.0  ;;  %v1948_v17 = vmul.f32 %v5393_v9, %v5393_v9 }
 0x411   :  { %v2256_v19 = vadd.f32 %v2255_v11, %v2254_v6  ;;  %v2264_v62 = vrot.slane %v2263_v15, 4  ;;  %v1941_v21 = vrot.slane %v1940_v16, 4  ;;  %v2155_v11 = vadd.f32 1e-05, %v2154_v2 }
 0x412   :  { %v1949_v22 = vsel %vm747_vm1, %v1948_v17, 0.0 }
 0x413   :  { %v2257_v10 = vrot.slane %v2256_v19, 2  ;;  %v2265_v23 = vadd.f32 %v2264_v62, %v2263_v15  ;;  %v1942_v20 = vadd.f32 %v1941_v21, %v1940_v16  ;;  %v1950_v14 = vrot.slane %v1949_v22, 4  ;;  %v2252_v15 = vld [vmem:[#allocation36] sm:$0x1]  ;;  %v2736_v21 = vld [vmem:[%s5765_s1 + $0x1f8] sm:$0xff] }
 0x414   :  { %3443 = vmatprep.subr.mxu1 %v2736_v21  ;;  %v2688_v21 = vld [vmem:[%s5765_s1 + $0x78] sm:$0xff] }
 0x415   :  { %v2258_v8 = vadd.f32 %v2257_v10, %v2256_v19  ;;  %v2266_v30 = vrot.slane %v2265_v23, 2  ;;  %v1943_v26 = vrot.slane %v1942_v20, 2  ;;  %v1951_v31 = vadd.f32 %v1950_v14, %v1949_v22  ;;  %v1938_v19 = vld [vmem:[#allocation33] sm:$0x1]  ;;  %v2253_v10 = vld [vmem:[#allocation43] sm:$0x1] }
 0x417   :  { %v2259_v32 = vrot.slane %v2258_v8, 1  ;;  %v2267_v33 = vadd.f32 %v2266_v30, %v2265_v23  ;;  %v1944_v35 = vadd.f32 %v1943_v26, %v1942_v20  ;;  %v1952_v37 = vrot.slane %v1951_v31, 2 }
 0x419   :  { %v2260_v41 = vadd.f32 %v2259_v32, %v2258_v8  ;;  %v2268_v42 = vrot.slane %v2267_v33, 1  ;;  %v1945_v43 = vrot.slane %v1944_v35, 1  ;;  %v1953_v46 = vadd.f32 %v1952_v37, %v1951_v31  ;;  %v1894_v37 = vld [vmem:[#allocation39] sm:$0x1] }
 0x41b   :  { %v2261_v48 = vmul.f32 0.125, %v2260_v41  ;;  %v2269_v49 = vadd.f32 %v2268_v42, %v2267_v33  ;;  %v1946_v45 = vadd.f32 %v1945_v43, %v1944_v35  ;;  %v1954_v50 = vrot.slane %v1953_v46, 1  ;;  %v3807_v16 = vpop.eup %3806  ;;  %v2133_v35 = vld [vmem:[#allocation34] sm:$0x1]  ;;  %v2720_v42 = vld [vmem:[%s5765_s1 + $0x178] sm:$0xff] }
 0x41c   :  { %v1917_v23 = vmul.f32 %v3807_v16, %v1893_v18  ;;  %v2729_v18 = vld [vmem:[%s5765_s1 + $0x1c0] sm:$0xff] }
 0x41d   :  { %v2270_v47 = vmul.f32 0.125, %v2269_v49  ;;  %v2271_v54 = vmul.f32 %v2261_v48, %v2261_v48  ;;  %v1947_v55 = vmul.f32 0.125, %v1946_v45  ;;  %v1955_v56 = vadd.f32 %v1954_v50, %v1953_v46  ;;  %v2719_v49 = vld [vmem:[%s5765_s1 + $0x170] sm:$0xff]  ;;  %v2734_v50 = vld [vmem:[%s5765_s1 + $0x1e8] sm:$0xff] }
 0x41e   :  { %v1925_v30 = vmul.f32 %v1917_v23, %v5395_v12  ;;  %v2735_v12 = vld [vmem:[%s5765_s1 + $0x1f0] sm:$0xff]  ;;  %v1922_v45 = vrot.slane %v1917_v23, %v5145_v1 }
 0x41f   :  { %v2272_v58 = vsub.f32 %v2270_v47, %v2271_v54  ;;  %v1956_v60 = vmul.f32 0.125, %v1955_v56  ;;  %v1957_v61 = vmul.f32 %v1947_v55, %v1947_v55  ;;  %v1935_v47 = vld [vmem:[%s5766_s2 + $0x8] sm:$0xff]  ;;  %v2733_v54 = vld [vmem:[%s5765_s1 + $0x1e0] sm:$0xff]  ;;  %v2687_v23 = vld [vmem:[%s5765_s1 + $0x70] sm:$0xff] }
 0x420   :  { %v1926_v46 = vsub.f32 %v1894_v37, %v1925_v30  ;;  %v2717_v56 = vld [vmem:[%s5765_s1 + $0x160] sm:$0xff]  ;;  %v2699_v37 = vld [vmem:[%s5765_s1 + $0xd0] sm:$0xff] }
 0x421   :  { %v2273_v5 = vmax.f32 %v2272_v58, 0.0  ;;  %v1958_v4 = vsub.f32 %v1956_v60, %v1957_v61  ;;  %v1924_v58 = vmul.f32 %v1922_v45, %v5373_v34  ;;  %v1934_v60 = vld [vmem:[%s5766_s2] sm:$0xff]  ;;  %v2706_v45 = vld [vmem:[%s5765_s1 + $0x108] sm:$0xff] }
 0x422   :  { %v1931_v53 = vrot.slane %v1926_v46, %v5145_v1  ;;  %v2685_v30 = vld [vmem:[%s5765_s1 + $0x60] sm:$0xff]  ;;  %v2707_v46 = vld [vmem:[%s5765_s1 + $0x110] sm:$0xff] }
 0x423   :  { %v2274_v6 = vadd.f32 1e-05, %v2273_v5  ;;  %v1959_v7 = vmax.f32 %v1958_v4, 0.0  ;;  %v2716_v5 = vld [vmem:[%s5765_s1 + $0x158] sm:$0xff]  ;;  %v2176_v4 = vld [vmem:[#allocation48 + $0x10] sm:$0xff] }
 0x424   :  { %v1933_v63 = vadd.f32 %v1931_v53, %v1924_v58  ;;  %v2695_v53 = vld [vmem:[%s5765_s1 + $0xb0] sm:$0xff] }
 0x425   :  { %3808 = vrsqrt.f32 %v2274_v6  ;;  %v1960_v59 = vadd.f32 1e-05, %v1959_v7  ;;  %v2731_v6 = vld [vmem:[%s5765_s1 + $0x1d0] sm:$0xff] }
 0x426   :  { %v2715_v7 = vld [vmem:[%s5765_s1 + $0x150] sm:$0xff] }
 0x427   :  { %3810 = vrsqrt.f32 %v1960_v59  ;;  %v2175_v59 = vld [vmem:[#allocation48 + $0x8] sm:$0xff] }
 0x428   :  { %3812 = vrsqrt.f32 %v2155_v11  ;;  %v2730_v11 = vld [vmem:[%s5765_s1 + $0x1c8] sm:$0xff] }
 0x432   :  { %v3809_v17 = vpop.eup %3808 }
 0x433   :  { %v2276_v62 = vmul.f32 %v3809_v17, %v2252_v15  ;;  %v2714_v15 = vld [vmem:[%s5765_s1 + $0x148] sm:$0xff]  ;;  %v2174_v17 = vld [vmem:[#allocation48] sm:$0xff] }
 0x434   :  { %v3811_v22 = vpop.eup %3810 }
 0x435   :  { %v2281_v20 = vrot.slane %v2276_v62, %v5145_v1  ;;  %v2284_v25 = vmul.f32 %v2276_v62, %v2261_v48  ;;  %v1962_v14 = vmul.f32 %v3811_v22, %v1938_v19  ;;  %v3813_v33 = vpop.eup %3812  ;;  %v1937_v48 = vld [vmem:[%s5766_s2 + $0x18] sm:$0xff]  ;;  %v2703_v22 = vld [vmem:[%s5765_s1 + $0xf0] sm:$0xff] }
 0x436   :  { %v2157_v43 = vmul.f32 %v3813_v33, %v2133_v35  ;;  %v2704_v19 = vld [vmem:[%s5765_s1 + $0xf8] sm:$0xff]  ;;  %v2709_v35 = vld [vmem:[%s5765_s1 + $0x120] sm:$0xff] }
 0x437   :  { %v2285_v28 = vsub.f32 %v2253_v10, %v2284_v25  ;;  %v1967_v29 = vrot.slane %v1962_v14, %v5145_v1  ;;  %v1970_v8 = vmul.f32 %v1962_v14, %v1947_v55  ;;  %v2283_v26 = vmul.f32 %v2281_v20, %v5387_v3  ;;  %v2134_v55 = vld [vmem:[#allocation42] sm:$0x1]  ;;  %v2728_v10 = vld [vmem:[%s5765_s1 + $0x1b8] sm:$0xff]  ;;  %v2727_v14 = vld [vmem:[%s5765_s1 + $0x1b0] sm:$0xff] }
 0x438   :  { %v2165_v36 = vmul.f32 %v2157_v43, %v5405_v39  ;;  %v2732_v39 = vld [vmem:[%s5765_s1 + $0x1d8] sm:$0xff]  ;;  %v2162_v34 = vrot.slane %v2157_v43, %v5145_v1  ;;  %v2702_v25 = vld [vmem:[%s5765_s1 + $0xe8] sm:$0xff] }
 0x439   :  { %v2290_v31 = vrot.slane %v2285_v28, %v5145_v1  ;;  %v1971_v32 = vsub.f32 %v1939_v27, %v1970_v8  ;;  %v1969_v13 = vmul.f32 %v1967_v29, %v5393_v9  ;;  %v1936_v9 = vld [vmem:[%s5766_s2 + $0x10] sm:$0xff]  ;;  %v2712_v20 = vld [vmem:[%s5765_s1 + $0x138] sm:$0xff]  ;;  %v2686_v27 = vld [vmem:[%s5765_s1 + $0x68] sm:$0xff] }
 0x43a   :  { %v2166_v61 = vsub.f32 %v2134_v55, %v2165_v36  ;;  %v2164_v16 = vmul.f32 %v2162_v34, %v5379_v38  ;;  %v2713_v38 = vld [vmem:[%s5765_s1 + $0x140] sm:$0xff]  ;;  %v2711_v28 = vld [vmem:[%s5765_s1 + $0x130] sm:$0xff]  ;;  %v2726_v8 = vld [vmem:[%s5765_s1 + $0x1a8] sm:$0xff]  ;;  %v5507_v34 = vsub.s32 2, %v5142_v57 }
 0x43b   :  { %v2292_v40 = vadd.f32 %v2290_v31, %v2283_v26  ;;  %v1976_v41 = vrot.slane %v1971_v32, %v5145_v1  ;;  %v2701_v29 = vld [vmem:[%s5765_s1 + $0xe0] sm:$0xff]  ;;  %v2710_v26 = vld [vmem:[%s5765_s1 + $0x128] sm:$0xff]  ;;  %v2700_v31 = vld [vmem:[%s5765_s1 + $0xd8] sm:$0xff] }
 0x43c   :  { %v2171_v2 = vrot.slane %v2166_v61, %v5145_v1  ;;  %v2725_v32 = vld [vmem:[%s5765_s1 + $0x1a0] sm:$0xff]  ;;  %v2684_v33 = vld [vmem:[%s5765_s1 + $0x58] sm:$0xff]  ;;  %v2682_v43 = vld [vmem:[%s5765_s1 + $0x48] sm:$0xff] }
 0x43d   :  { %v1978_v3 = vadd.f32 %v1976_v41, %v1969_v13  ;;  %3669 = vmatmul.mubr.msk.f32.vlgmr.msra.gmra.mxu1 %vm747_vm1, %v2292_v40  ;;  %v2724_v40 = vld [vmem:[%s5765_s1 + $0x198] sm:$0xff]  ;;  %v2683_v13 = vld [vmem:[%s5765_s1 + $0x50] sm:$0xff]  ;;  %v2705_v36 = vld [vmem:[%s5765_s1 + $0x100] sm:$0xff] }
 0x43e   :  { %3444 = vmatpush3.msra.mxu1 %v2720_v42  ;;  %v2173_v62 = vadd.f32 %v2171_v2, %v2164_v16  ;;  %v2708_v41 = vld [vmem:[%s5765_s1 + $0x118] sm:$0xff]  ;;  %v2698_v42 = vld [vmem:[%s5765_s1 + $0xc8] sm:$0xff]  ;;  %v2675_v2 = vld [vmem:[%s5765_s1 + $0x10] sm:$0xff] }
 0x43f   :  { %3628 = vmatmul.mubr.msk.f32.vlgmr.msra.gmra.mxu0 %vm747_vm1, %v1978_v3  ;;  %3445 = vmatprep.subr.mxu1 %v2735_v12  ;;  %v2723_v12 = vld [vmem:[%s5765_s1 + $0x190] sm:$0xff]  ;;  %v2697_v3 = vld [vmem:[%s5765_s1 + $0xc0] sm:$0xff]  ;;  %v2678_v55 = vld [vmem:[%s5765_s1 + $0x28] sm:$0xff] }
 0x440   :  { %3631 = vmatpush3.msra.mxu0 %v1937_v48  ;;  %3638 = vmatprep.mubr.msk.f32.mxu0 %vm4722_vm2, %v4721_v51  ;;  %v2722_v48 = vld [vmem:[%s5765_s1 + $0x188] sm:$0xff]  ;;  %v2692_v61 = vld [vmem:[%s5765_s1 + $0x98] sm:$0xff] }
 0x441   :  { %3632 = vmatprep.subr.mxu0 %v4721_v51  ;;  %3446 = vmatpush3.msra.mxu1 %v2719_v49  ;;  %v2681_v49 = vld [vmem:[%s5765_s1 + $0x40] sm:$0xff] }
 0x442   :  { %3633 = vmatpush3.msra.mxu0 %v1936_v9  ;;  %3447 = vmatprep.subr.mxu1 %v2734_v50  ;;  %v2696_v9 = vld [vmem:[%s5765_s1 + $0xb8] sm:$0xff]  ;;  %v2721_v50 = vld [vmem:[%s5765_s1 + $0x180] sm:$0xff] }
 0x443   :  { %3634 = vmatprep.subr.mxu0 %v4721_v51  ;;  %3448 = vmatpush3.msra.mxu1 %v2718_v52  ;;  %v2680_v52 = vld [vmem:[%s5765_s1 + $0x38] sm:$0xff] }
 0x444   :  { %3635 = vmatpush3.msra.mxu0 %v1935_v47  ;;  %3449 = vmatprep.subr.mxu1 %v2733_v54  ;;  %v2679_v47 = vld [vmem:[%s5765_s1 + $0x30] sm:$0xff]  ;;  %v2694_v54 = vld [vmem:[%s5765_s1 + $0xa8] sm:$0xff] }
 0x445   :  { %3636 = vmatprep.subr.mxu0 %v4721_v51  ;;  %3450 = vmatpush3.msra.mxu1 %v2717_v56  ;;  %v2693_v56 = vld [vmem:[%s5765_s1 + $0xa0] sm:$0xff] }
 0x446   :  { %3637 = vmatpush3.msra.mxu0 %v1934_v60  ;;  %3451 = vmatprep.subr.mxu1 %v2732_v39  ;;  %v2677_v60 = vld [vmem:[%s5765_s1 + $0x20] sm:$0xff]  ;;  %v5500_v39 = vsub.s32 3, %v5142_v57 }
 0x447   :  { %3639 = vmatmul.mubr.msk.f32.vlgmr.msra.gmra.mxu0 %vm661_vm0, %v1933_v63  ;;  %3641 = vmatprep.subr.mxu0 %v4721_v51  ;;  %v5503_v63 = vld [vmem:[#allocation30] sm:$0x3f] }
 0x448   :  { %3642 = vmatpush3.msra.mxu0 %v2177_v0  ;;  %3649 = vmatprep.mubr.msk.f32.mxu0 %vm4722_vm2, %v4721_v51 }
 0x449   :  { %3643 = vmatprep.subr.mxu0 %v4721_v51  ;;  %3452 = vmatpush3.msra.mxu1 %v2716_v5  ;;  %v1817_v0 = vpop.f32.mrf.mxu0  ;;  %v2676_v5 = vld [vmem:[%s5765_s1 + $0x18] sm:$0xff] }
 0x44a   :  { %3644 = vmatpush3.msra.mxu0 %v2176_v4  ;;  %3453 = vmatprep.subr.mxu1 %v2731_v6  ;;  %v1657_v4 = vrot.slane %v5503_v63, %v5173_v44  ;;  %v2691_v6 = vld [vmem:[%s5765_s1 + $0x90] sm:$0xff] }
 0x44b   :  { %3645 = vmatprep.subr.mxu0 %v4721_v51  ;;  %3454 = vmatpush3.msra.mxu1 %v2715_v7  ;;  %v1746_v58 = vpop.f32.mrf.mxu1  ;;  %v1819_v16 = vpop.f32.mrf.mxu0 }
 0x44c   :  { %3646 = vmatpush3.msra.mxu0 %v2175_v59  ;;  %3455 = vmatprep.subr.mxu1 %v2730_v11  ;;  %v1653_v59 = vrot.slane %v5503_v63, %v5145_v1  ;;  %v1665_v11 = vrot.slane %v5503_v63, %v5500_v39 }
 0x44d   :  { %3647 = vmatprep.subr.mxu0 %v4721_v51  ;;  %3456 = vmatpush3.msra.mxu1 %v2714_v15  ;;  %v1748_v7 = vpop.f32.mrf.mxu1  ;;  %v2690_v15 = vld [vmem:[%s5765_s1 + $0x88] sm:$0xff] }
 0x44e   :  { %3648 = vmatpush3.msra.mxu0 %v2174_v17  ;;  %3457 = vmatprep.subr.mxu1 %v2729_v18  ;;  %v2674_v17 = vld [vmem:[%s5765_s1 + $0x8] sm:$0xff]  ;;  %v1661_v18 = vrot.slane %v5503_v63, %v5507_v34 }
 0x44f   :  { %3650 = vmatmul.mubr.msk.f32.vlgmr.msra.gmra.mxu0 %vm661_vm0, %v2173_v62  ;;  %3408 = vmatprep.subr.mxu0 %v2704_v19  ;;  %v5521_v19 = vadd.f32 %v1748_v7, %v1657_v4  ;;  %v2689_v62 = vld [vmem:[%s5765_s1 + $0x80] sm:$0xff] }
 0x450   :  { %3409 = vmatpush3.msra.mxu0 %v2688_v21  ;;  %3458 = vmatpush3.msra.mxu1 %v2713_v38  ;;  %v2673_v21 = vld [vmem:[%s5765_s1] sm:$0xff]  ;;  %v5525_v38 = vadd.f32 %v1746_v58, %v1653_v59 }
 0x451   :  { %3410 = vmatprep.subr.mxu0 %v2703_v22  ;;  %3459 = vmatprep.subr.mxu1 %v2728_v10  ;;  %v5527_v22 = vadd.f32 %v1819_v16, %v1665_v11  ;;  %v2768_v10 = vld [vmem:[%s5765_s1 + $0x2f8] sm:$0xff] }
 0x452   :  { %3411 = vmatpush3.msra.mxu0 %v2687_v23  ;;  %3460 = vmatpush3.msra.mxu1 %v2712_v20  ;;  %v5530_v23 = vadd.f32 %v1817_v0, %v1661_v18  ;;  %v2383_v20 = vrot.slane %v5521_v19, 4 }
 0x453   :  { %3412 = vmatprep.subr.mxu0 %v2702_v25  ;;  %3461 = vmatprep.subr.mxu1 %v2727_v14  ;;  %v2420_v25 = vmul.f32 %v5521_v19, %v5521_v19  ;;  %v2377_v14 = vrot.slane %v5525_v38, 4 }
 0x454   :  { %3413 = vmatpush3.msra.mxu0 %v2686_v27  ;;  %3462 = vmatpush3.msra.mxu1 %v2711_v28  ;;  %v2419_v27 = vmul.f32 %v5525_v38, %v5525_v38  ;;  %v2395_v28 = vrot.slane %v5527_v22, 4 }
 0x455   :  { %3414 = vmatprep.subr.mxu0 %v2701_v29  ;;  %3463 = vmatprep.subr.mxu1 %v2726_v8  ;;  %v2422_v29 = vmul.f32 %v5527_v22, %v5527_v22  ;;  %v2389_v8 = vrot.slane %v5530_v23, 4 }
 0x456   :  { %3415 = vmatpush3.msra.mxu0 %v2685_v30  ;;  %3464 = vmatpush3.msra.mxu1 %v2710_v26  ;;  %v2421_v30 = vmul.f32 %v5530_v23, %v5530_v23  ;;  %v2384_v26 = vadd.f32 %v2383_v20, %v5521_v19 }
 0x457   :  { %3416 = vmatprep.subr.mxu0 %v2700_v31  ;;  %3465 = vmatprep.subr.mxu1 %v2725_v32  ;;  %v2431_v31 = vrot.slane %v2420_v25, 4  ;;  %v2378_v32 = vadd.f32 %v2377_v14, %v5525_v38 }
 0x458   :  { %3417 = vmatpush3.msra.mxu0 %v2684_v33  ;;  %3466 = vmatpush3.msra.mxu1 %v2709_v35  ;;  %v2425_v33 = vrot.slane %v2419_v27, 4  ;;  %v2396_v35 = vadd.f32 %v2395_v28, %v5527_v22 }
 0x459   :  { %3418 = vmatprep.subr.mxu0 %v2699_v37  ;;  %3467 = vmatprep.subr.mxu1 %v2724_v40  ;;  %v2443_v37 = vrot.slane %v2422_v29, 4  ;;  %v2390_v40 = vadd.f32 %v2389_v8, %v5530_v23 }
 0x45a   :  { %3419 = vmatpush3.msra.mxu0 %v2683_v13  ;;  %3468 = vmatpush3.msra.mxu1 %v2708_v41  ;;  %v2437_v13 = vrot.slane %v2421_v30, 4  ;;  %v2385_v41 = vrot.slane %v2384_v26, 2 }
 0x45b   :  { %3420 = vmatprep.subr.mxu0 %v2698_v42  ;;  %3469 = vmatprep.subr.mxu1 %v2723_v12  ;;  %v2432_v42 = vadd.f32 %v2431_v31, %v2420_v25  ;;  %v2379_v12 = vrot.slane %v2378_v32, 2 }
 0x45c   :  { %3421 = vmatpush3.msra.mxu0 %v2682_v43  ;;  %3470 = vmatpush3.msra.mxu1 %v2707_v46  ;;  %v2426_v43 = vadd.f32 %v2425_v33, %v2419_v27  ;;  %v2397_v46 = vrot.slane %v2396_v35, 2 }
 0x45d   :  { %3422 = vmatprep.subr.mxu0 %v2697_v3  ;;  %3471 = vmatprep.subr.mxu1 %v2722_v48  ;;  %v2444_v3 = vadd.f32 %v2443_v37, %v2422_v29  ;;  %v2391_v48 = vrot.slane %v2390_v40, 2 }
 0x45e   :  { %3423 = vmatpush3.msra.mxu0 %v2681_v49  ;;  %3472 = vmatpush3.msra.mxu1 %v2706_v45  ;;  %v2438_v49 = vadd.f32 %v2437_v13, %v2421_v30  ;;  %v2386_v45 = vadd.f32 %v2385_v41, %v2384_v26 }
 0x45f   :  { %3424 = vmatprep.subr.mxu0 %v2696_v9  ;;  %3473 = vmatprep.subr.mxu1 %v2721_v50  ;;  %v2433_v9 = vrot.slane %v2432_v42, 2  ;;  %v2380_v50 = vadd.f32 %v2379_v12, %v2378_v32 }
 0x460   :  { %3425 = vmatpush3.msra.mxu0 %v2680_v52  ;;  %3474 = vmatpush3.msra.mxu1 %v2705_v36  ;;  %v2427_v52 = vrot.slane %v2426_v43, 2  ;;  %v2398_v36 = vadd.f32 %v2397_v46, %v2396_v35 }
 0x461   :  { %3426 = vmatprep.subr.mxu0 %v2695_v53  ;;  %3671 = vmatprep.subr.mxu1 %v4721_v51  ;;  %v2445_v53 = vrot.slane %v2444_v3, 2  ;;  %v2381_v58 = vrot.slane %v2380_v50, 1 }
 0x462   :  { %3427 = vmatpush3.msra.mxu0 %v2679_v47  ;;  %v2392_v47 = vadd.f32 %v2391_v48, %v2390_v40 }
 0x463   :  { %3428 = vmatprep.subr.mxu0 %v2694_v54  ;;  %v2439_v54 = vrot.slane %v2438_v49, 2  ;;  %v2446_v0 = vadd.f32 %v2445_v53, %v2444_v3  ;;  %v2382_v59 = vadd.f32 %v2381_v58, %v2380_v50 }
 0x464   :  { %3429 = vmatpush3.msra.mxu0 %v2678_v55  ;;  %v2387_v55 = vrot.slane %v2386_v45, 1 }
 0x465   :  { %3430 = vmatprep.subr.mxu0 %v2693_v56  ;;  %v2434_v56 = vadd.f32 %v2433_v9, %v2432_v42  ;;  %v2440_v4 = vadd.f32 %v2439_v54, %v2438_v49  ;;  %v2447_v16 = vrot.slane %v2446_v0, 1  ;;  %v5558_v25 = vmul.f32 0.125, %v2382_v59 }
 0x466   :  { %3431 = vmatpush3.msra.mxu0 %v2677_v60  ;;  %v2428_v60 = vadd.f32 %v2427_v52, %v2426_v43 }
 0x467   :  { %3432 = vmatprep.subr.mxu0 %v2692_v61  ;;  %v2399_v61 = vrot.slane %v2398_v36, 1  ;;  %v2435_v7 = vrot.slane %v2434_v56, 1  ;;  %v2448_v28 = vadd.f32 %v2447_v16, %v2446_v0  ;;  %v2467_v35 = vmul.f32 %v5558_v25, %v5558_v25 }
 0x468   :  { %3433 = vmatpush3.msra.mxu0 %v2676_v5  ;;  %v2393_v5 = vrot.slane %v2392_v47, 1  ;;  %v2429_v11 = vrot.slane %v2428_v60, 1 }
 0x469   :  { %3434 = vmatprep.subr.mxu0 %v2691_v6  ;;  %v2388_v6 = vadd.f32 %v2387_v55, %v2386_v45  ;;  %v2464_v37 = vmul.f32 0.125, %v2448_v28 }
 0x46a   :  { %3435 = vmatpush3.msra.mxu0 %v2675_v2  ;;  %v5549_v2 = vsub.s32 4, %v5142_v57  ;;  %v2394_v18 = vadd.f32 %v2393_v5, %v2392_v47  ;;  %v2430_v14 = vadd.f32 %v2429_v11, %v2428_v60 }
 0x46b   :  { %3436 = vmatprep.subr.mxu0 %v2690_v15  ;;  %v2400_v15 = vadd.f32 %v2399_v61, %v2398_v36 }
 0x46c   :  { %3437 = vmatpush3.msra.mxu0 %v2674_v17  ;;  %v5552_v17 = vsub.s32 5, %v5142_v57  ;;  %v1669_v20 = vrot.slane %v5503_v63, %v5549_v2  ;;  %v5564_v8 = vmul.f32 0.125, %v2394_v18  ;;  %v2461_v33 = vmul.f32 0.125, %v2430_v14 }
 0x46d   :  { %3438 = vmatprep.subr.mxu0 %v2689_v62  ;;  %v2441_v62 = vrot.slane %v2440_v4, 1  ;;  %v5560_v27 = vmul.f32 0.125, %v2400_v15 }
 0x46e   :  { %3439 = vmatpush3.msra.mxu0 %v2673_v21  ;;  %v5554_v21 = vmul.f32 0.125, %v2388_v6  ;;  %v1673_v29 = vrot.slane %v5503_v63, %v5552_v17  ;;  %v2469_v43 = vmul.f32 %v5564_v8, %v5564_v8  ;;  %v2473_v9 = vsub.f32 %v2461_v33, %v2467_v35 }
 0x46f   :  { %3478 = vmatprep.subr.mxu0 %v2768_v10  ;;  %v2436_v10 = vadd.f32 %v2435_v7, %v2434_v56  ;;  %v2442_v57 = vadd.f32 %v2441_v62, %v2440_v4  ;;  %v2470_v40 = vmul.f32 %v5560_v27, %v5560_v27 }
 0x470   :  { %v2468_v26 = vmul.f32 %v5554_v21, %v5554_v21  ;;  %v2479_v0 = vmax.f32 %v2473_v9, 0.0 }
 0x471   :  { %v2462_v30 = vmul.f32 0.125, %v2436_v10  ;;  %v2463_v12 = vmul.f32 0.125, %v2442_v57  ;;  %v2476_v50 = vsub.f32 %v2464_v37, %v2470_v40 }
 0x473   :  { %v2474_v46 = vsub.f32 %v2462_v30, %v2468_v26  ;;  %v2475_v54 = vsub.f32 %v2463_v12, %v2469_v43  ;;  %v2482_v5 = vmax.f32 %v2476_v50, 0.0 }
 0x475   :  { %v2480_v55 = vmax.f32 %v2474_v46, 0.0  ;;  %v2481_v11 = vmax.f32 %v2475_v54, 0.0  ;;  %v2488_v14 = vadd.f32 1e-05, %v2482_v5 }
 0x477   :  { %v2486_v15 = vadd.f32 1e-05, %v2480_v55  ;;  %v2487_v26 = vadd.f32 1e-05, %v2481_v11 }
 0x479   :  { %3814 = vrsqrt.f32 %v2486_v15 }
 0x48b   :  { %v1888_v31 = vpop.f32.mrf.mxu1 }
 0x48c   :  { %v5568_v32 = vadd.f32 %v1888_v31, %v1669_v20  ;;  %v2485_v20 = vadd.f32 1e-05, %v2479_v0  ;;  %v2375_v0 = vld [vmem:[#allocation37] sm:$0x3f] }
 0x48d   :  { %v1890_v13 = vpop.f32.mrf.mxu1 }
 0x48e   :  { %v2401_v63 = vrot.slane %v5568_v32, 4  ;;  %v2423_v41 = vmul.f32 %v5568_v32, %v5568_v32  ;;  %v5577_v42 = vadd.f32 %v1890_v13, %v1673_v29  ;;  %3816 = vrsqrt.f32 %v2485_v20 }
 0x48f   :  { %3818 = vrsqrt.f32 %v2488_v14 }
 0x490   :  { %v2402_v3 = vadd.f32 %v2401_v63, %v5568_v32  ;;  %v2449_v48 = vrot.slane %v2423_v41, 4  ;;  %v2407_v49 = vrot.slane %v5577_v42, 4  ;;  %v2424_v45 = vmul.f32 %v5577_v42, %v5577_v42 }
 0x491   :  { %3820 = vrsqrt.f32 %v2487_v26 }
 0x492   :  { %v2403_v52 = vrot.slane %v2402_v3, 2  ;;  %v2450_v36 = vadd.f32 %v2449_v48, %v2423_v41  ;;  %v2408_v53 = vadd.f32 %v2407_v49, %v5577_v42  ;;  %v2455_v47 = vrot.slane %v2424_v45, 4  ;;  %v3815_v48 = vpop.eup %3814 }
 0x494   :  { %v2404_v56 = vadd.f32 %v2403_v52, %v2402_v3  ;;  %v2451_v58 = vrot.slane %v2450_v36, 2  ;;  %v2409_v60 = vrot.slane %v2408_v53, 2  ;;  %v2456_v61 = vadd.f32 %v2455_v47, %v2424_v45 }
 0x496   :  { %v2405_v4 = vrot.slane %v2404_v56, 1  ;;  %v2452_v6 = vadd.f32 %v2451_v58, %v2450_v36  ;;  %v2410_v7 = vadd.f32 %v2409_v60, %v2408_v53  ;;  %v2457_v59 = vrot.slane %v2456_v61, 2 }
 0x498   :  { %v2406_v16 = vadd.f32 %v2405_v4, %v2404_v56  ;;  %v2453_v18 = vrot.slane %v2452_v6, 1  ;;  %v2411_v62 = vrot.slane %v2410_v7, 1  ;;  %v2458_v10 = vadd.f32 %v2457_v59, %v2456_v61 }
 0x49a   :  { %v2417_v28 = vmul.f32 0.125, %v2406_v16  ;;  %v2454_v29 = vadd.f32 %v2453_v18, %v2452_v6  ;;  %v2412_v57 = vadd.f32 %v2411_v62, %v2410_v7  ;;  %v2459_v30 = vrot.slane %v2458_v10, 1 }
 0x49b   :  { %v3817_v49 = vpop.eup %3816 }
 0x49c   :  { %v2465_v31 = vmul.f32 0.125, %v2454_v29  ;;  %v2471_v33 = vmul.f32 %v2417_v28, %v2417_v28  ;;  %v2418_v35 = vmul.f32 0.125, %v2412_v57  ;;  %v2460_v37 = vadd.f32 %v2459_v30, %v2458_v10  ;;  %v3819_v45 = vpop.eup %3818 }
 0x49d   :  { %v2503_v9 = vcombine.low %v3817_v49, %v3815_v48  ;;  %v2767_v48 = vld [vmem:[%s5765_s1 + $0x2f0] sm:$0xff] }
 0x49e   :  { %v2477_v40 = vsub.f32 %v2465_v31, %v2471_v33  ;;  %v2466_v13 = vmul.f32 0.125, %v2460_v37  ;;  %v2472_v63 = vmul.f32 %v2418_v35, %v2418_v35  ;;  %v3821_v50 = vpop.eup %3820 }
 0x49f   :  { %v2504_v52 = vcombine.low %v3821_v50, %v3819_v45  ;;  %v2512_v36 = vrot.slane %v2503_v9, %v5243_v24  ;;  %v2765_v45 = vld [vmem:[%s5765_s1 + $0x2e0] sm:$0xff]  ;;  %v2764_v50 = vld [vmem:[%s5765_s1 + $0x2d8] sm:$0xff] }
 0x4a0   :  { %v2483_v41 = vmax.f32 %v2477_v40, 0.0  ;;  %v2478_v12 = vsub.f32 %v2466_v13, %v2472_v63  ;;  %v2749_v9 = vld [vmem:[%s5765_s1 + $0x260] sm:$0xff] }
 0x4a1   :  { %v2519_v47 = vrot.slane %v2504_v52, %v5243_v24  ;;  %v2748_v52 = vld [vmem:[%s5765_s1 + $0x258] sm:$0xff] }
 0x4a2   :  { %v2489_v43 = vadd.f32 1e-05, %v2483_v41  ;;  %v2484_v46 = vmax.f32 %v2478_v12, 0.0 }
 0x4a3   :  { %v2527_v56 = vcombine.low %v2512_v36, %v2519_v47  ;;  %v2763_v36 = vld [vmem:[%s5765_s1 + $0x2d0] sm:$0xff]  ;;  %v2762_v47 = vld [vmem:[%s5765_s1 + $0x2c8] sm:$0xff] }
 0x4a4   :  { %v2490_v3 = vadd.f32 1e-05, %v2484_v46  ;;  %3822 = vrsqrt.f32 %v2489_v43 }
 0x4a5   :  { %v2534_v60 = vrot.slane %v2527_v56, %v5243_v24  ;;  %v2745_v56 = vld [vmem:[%s5765_s1 + $0x240] sm:$0xff] }
 0x4a6   :  { %3824 = vrsqrt.f32 %v2490_v3 }
 0x4b1   :  { %v3823_v53 = vpop.eup %3822 }
 0x4b3   :  { %v3825_v54 = vpop.eup %3824 }
 0x4b4   :  { %v2505_v55 = vcombine.low %v3823_v53, %v3825_v54  ;;  %v2747_v53 = vld [vmem:[%s5765_s1 + $0x250] sm:$0xff]  ;;  %v2746_v54 = vld [vmem:[%s5765_s1 + $0x248] sm:$0xff] }
 0x4b6   :  { %v2526_v58 = vrot.slane %v2505_v55, %v5243_v24  ;;  %v2761_v55 = vld [vmem:[%s5765_s1 + $0x2c0] sm:$0xff] }
 0x4b8   :  { %v2541_v61 = vrot.slane %v2526_v58, %v5243_v24  ;;  %v2760_v58 = vld [vmem:[%s5765_s1 + $0x2b8] sm:$0xff] }
 0x4ba   :  { %v2542_v5 = vcombine.low %v2534_v60, %v2541_v61  ;;  %v2744_v60 = vld [vmem:[%s5765_s1 + $0x238] sm:$0xff]  ;;  %v2759_v61 = vld [vmem:[%s5765_s1 + $0x2b0] sm:$0xff] }
 0x4bc   :  { %v2544_v4 = vmul.f32 %v2542_v5, %v2375_v0  ;;  %v2743_v0 = vld [vmem:[%s5765_s1 + $0x230] sm:$0xff]  ;;  %v2758_v5 = vld [vmem:[%s5765_s1 + $0x2a8] sm:$0xff] }
 0x4be   :  { %v5592_v6 = vrot.slane %v2544_v4, %v5549_v2  ;;  %v2569_v7 = vrot.slane %v2544_v4, %v5552_v17  ;;  %v2549_v59 = vrot.slane %v2544_v4, %v5145_v1  ;;  %v2553_v11 = vrot.slane %v2544_v4, %v5173_v44 }
 0x4bf   :  { %v2557_v15 = vrot.slane %v2544_v4, %v5507_v34  ;;  %v2561_v16 = vrot.slane %v2544_v4, %v5500_v39  ;;  %v2742_v4 = vld [vmem:[%s5765_s1 + $0x228] sm:$0xff] }
 0x4c0   :  { %v2586_v18 = vmul.f32 %v5592_v6, %v2417_v28  ;;  %v2587_v62 = vmul.f32 %v2569_v7, %v2418_v35  ;;  %v2582_v10 = vmul.f32 %v2549_v59, %v5558_v25  ;;  %v2583_v20 = vmul.f32 %v2553_v11, %v5554_v21  ;;  %v2376_v35 = vld [vmem:[#allocation45] sm:$0x3f] }
 0x4c1   :  { %v2584_v14 = vmul.f32 %v2557_v15, %v5564_v8  ;;  %v2585_v29 = vmul.f32 %v2561_v16, %v5560_v27  ;;  %v2577_v27 = vmul.f32 %v2553_v11, %v5521_v19  ;;  %v2579_v13 = vmul.f32 %v2561_v16, %v5527_v22  ;;  %v2756_v11 = vld [vmem:[%s5765_s1 + $0x298] sm:$0xff]  ;;  %v2755_v16 = vld [vmem:[%s5765_s1 + $0x290] sm:$0xff] }
 0x4c2   :  { %v2596_v57 = vcombine.low %v2586_v18, %v2587_v62  ;;  %v2594_v30 = vcombine.low %v2582_v10, %v2583_v20  ;;  %v2576_v63 = vmul.f32 %v2549_v59, %v5525_v38  ;;  %v2578_v41 = vmul.f32 %v2557_v15, %v5530_v23  ;;  %v2741_v59 = vld [vmem:[%s5765_s1 + $0x220] sm:$0xff]  ;;  %v2740_v15 = vld [vmem:[%s5765_s1 + $0x218] sm:$0xff]  ;;  %v2739_v18 = vld [vmem:[%s5765_s1 + $0x210] sm:$0xff] }
 0x4c3   :  { %v2595_v26 = vcombine.low %v2584_v14, %v2585_v29  ;;  %v2581_v22 = vmul.f32 %v2569_v7, %v5577_v42  ;;  %v2750_v42 = vld [vmem:[%s5765_s1 + $0x268] sm:$0xff]  ;;  %v2757_v7 = vld [vmem:[%s5765_s1 + $0x2a0] sm:$0xff] }
 0x4c4   :  { %v2617_v31 = vrot.slane %v2596_v57, %v5243_v24  ;;  %v2603_v33 = vrot.slane %v2594_v30, %v5243_v24  ;;  %v2754_v62 = vld [vmem:[%s5765_s1 + $0x288] sm:$0xff]  ;;  %v2753_v14 = vld [vmem:[%s5765_s1 + $0x280] sm:$0xff]  ;;  %v2580_v57 = vmul.f32 %v5592_v6, %v5568_v32 }
 0x4c5   :  { %v2610_v37 = vrot.slane %v2595_v26, %v5243_v24  ;;  %v2738_v10 = vld [vmem:[%s5765_s1 + $0x208] sm:$0xff]  ;;  %v2737_v29 = vld [vmem:[%s5765_s1 + $0x200] sm:$0xff] }
 0x4c6   :  { %v2632_v28 = vrot.slane %v2617_v31, %v5243_v24 }
 0x4c7   :  { %v2618_v40 = vcombine.low %v2603_v33, %v2610_v37 }
 0x4c9   :  { %v2625_v25 = vrot.slane %v2618_v40, %v5243_v24 }
 0x4cb   :  { %v2633_v21 = vcombine.low %v2625_v25, %v2632_v28 }
 0x4cd   :  { %v5609_v8 = vsub.f32 %v2376_v35, %v2633_v21  ;;  %v3037_v21 = vld [vmem:[%s5767_s14 + $0x38] sm:$0xff] }
 0x4cf   :  { %v2644_v12 = vrot.slane %v5609_v8, %v5173_v44  ;;  %v2652_v24 = vrot.slane %v5609_v8, %v5500_v39  ;;  %v2640_v43 = vrot.slane %v5609_v8, %v5145_v1  ;;  %v2648_v19 = vrot.slane %v5609_v8, %v5507_v34  ;;  %v2752_v39 = vld [vmem:[%s5765_s1 + $0x278] sm:$0xff]  ;;  %v2751_v34 = vld [vmem:[%s5765_s1 + $0x270] sm:$0xff] }
 0x4d0   :  { %v2660_v38 = vrot.slane %v5609_v8, %v5552_v17  ;;  %v2766_v17 = vld [vmem:[%s5765_s1 + $0x2e8] sm:$0xff]  ;;  %v2656_v20 = vrot.slane %v5609_v8, %v5549_v2  ;;  %v3036_v8 = vld [vmem:[%s5767_s14 + $0x30] sm:$0xff] }
 0x4d1   :  { %v2668_v23 = vadd.f32 %v2644_v12, %v2577_v27  ;;  %v2670_v46 = vadd.f32 %v2652_v24, %v2579_v13  ;;  %v2667_v44 = vadd.f32 %v2640_v43, %v2576_v63  ;;  %v2669_v3 = vadd.f32 %v2648_v19, %v2578_v41  ;;  %v3035_v27 = vld [vmem:[%s5767_s14 + $0x28] sm:$0xff]  ;;  %v3034_v13 = vld [vmem:[%s5767_s14 + $0x20] sm:$0xff]  ;;  %v3033_v63 = vld [vmem:[%s5767_s14 + $0x18] sm:$0xff] }
 0x4d2   :  { %v2672_v49 = vadd.f32 %v2660_v38, %v2581_v22  ;;  %v2671_v30 = vadd.f32 %v2656_v20, %v2580_v57  ;;  %v3032_v41 = vld [vmem:[%s5767_s14 + $0x10] sm:$0xff]  ;;  %v3031_v12 = vld [vmem:[%s5767_s14 + $0x8] sm:$0xff]  ;;  %v3030_v24 = vld [vmem:[%s5767_s14] sm:$0xff] }
 0x4d3   :  { %2833 = vmatprep.mubr.f32.mxu0 %v2668_v23  ;;  %2903 = vmatprep.mubr.f32.mxu1 %v2670_v46 }
 0x4d4   :  { %2834 = vmatmul.mubr.f32.vlgmr.msra.gmra.mxu0 %v2667_v44  ;;  %2904 = vmatmul.mubr.f32.vlgmr.msra.gmra.mxu1 %v2669_v3 }
 0x4d5   :  { %3479 = vmatpush3.msra.mxu0 %v2752_v39  ;;  %2973 = vmatprep.mubr.f32.mxu0 %v2672_v49 }
 0x4d6   :  { %3480 = vmatprep.subr.mxu0 %v2767_v48  ;;  %3687 = vmatprep.mubr.msk.f32.mxu1 %vm4722_vm2, %v4721_v51 }
 0x4d7   :  { %3481 = vmatpush3.msra.mxu0 %v2751_v34  ;;  %3672 = vmatpush3.msra.mxu1 %v3037_v21  ;;  %v3331_v34 = vld [vmem:[%s5768_s10] ss:$0 sm:$0xff] }
 0x4d8   :  { %3482 = vmatprep.subr.mxu0 %v2766_v17  ;;  %3673 = vmatprep.subr.mxu1 %v4721_v51 }
 0x4d9   :  { %3483 = vmatpush3.msra.mxu0 %v2750_v42  ;;  %3674 = vmatpush3.msra.mxu1 %v3036_v8 }
 0x4da   :  { %3484 = vmatprep.subr.mxu0 %v2765_v45  ;;  %3675 = vmatprep.subr.mxu1 %v4721_v51 }
 0x4db   :  { %3485 = vmatpush3.msra.mxu0 %v2749_v9  ;;  %3676 = vmatpush3.msra.mxu1 %v3035_v27 }
 0x4dc   :  { %3486 = vmatprep.subr.mxu0 %v2764_v50  ;;  %3677 = vmatprep.subr.mxu1 %v4721_v51 }
 0x4dd   :  { %3487 = vmatpush3.msra.mxu0 %v2748_v52  ;;  %3678 = vmatpush3.msra.mxu1 %v3034_v13 }
 0x4de   :  { %3488 = vmatprep.subr.mxu0 %v2763_v36  ;;  %3679 = vmatprep.subr.mxu1 %v4721_v51 }
 0x4df   :  { %3489 = vmatpush3.msra.mxu0 %v2747_v53  ;;  %3680 = vmatpush3.msra.mxu1 %v3033_v63 }
 0x4e0   :  { %3490 = vmatprep.subr.mxu0 %v2762_v47  ;;  %3681 = vmatprep.subr.mxu1 %v4721_v51 }
 0x4e1   :  { %3491 = vmatpush3.msra.mxu0 %v2746_v54  ;;  %3682 = vmatpush3.msra.mxu1 %v3032_v41 }
 0x4e2   :  { %3492 = vmatprep.subr.mxu0 %v2761_v55  ;;  %3683 = vmatprep.subr.mxu1 %v4721_v51 }
 0x4e3   :  { %3493 = vmatpush3.msra.mxu0 %v2745_v56  ;;  %3684 = vmatpush3.msra.mxu1 %v3031_v12 }
 0x4e4   :  { %3494 = vmatprep.subr.mxu0 %v2760_v58  ;;  %3685 = vmatprep.subr.mxu1 %v4721_v51 }
 0x4e5   :  { %3495 = vmatpush3.msra.mxu0 %v2744_v60  ;;  %3686 = vmatpush3.msra.mxu1 %v3030_v24 }
 0x4e6   :  { %3496 = vmatprep.subr.mxu0 %v2759_v61  ;;  %3690 = vmatprep.subr.mxu1 %v4721_v51 }
 0x4e7   :  { %3497 = vmatpush3.msra.mxu0 %v2743_v0 }
 0x4e8   :  { %3498 = vmatprep.subr.mxu0 %v2758_v5 }
 0x4e9   :  { %3499 = vmatpush3.msra.mxu0 %v2742_v4 }
 0x4ea   :  { %3500 = vmatprep.subr.mxu0 %v2757_v7 }
 0x4eb   :  { %3501 = vmatpush3.msra.mxu0 %v2741_v59 }
 0x4ec   :  { %3502 = vmatprep.subr.mxu0 %v2756_v11 }
 0x4ed   :  { %3503 = vmatpush3.msra.mxu0 %v2740_v15 }
 0x4ee   :  { %3504 = vmatprep.subr.mxu0 %v2755_v16 }
 0x4ef   :  { %3505 = vmatpush3.msra.mxu0 %v2739_v18 }
 0x4f0   :  { %3506 = vmatprep.subr.mxu0 %v2754_v62  ;;  %v2989_v62 = vld [vmem:[#allocation51] sm:$0x1] }
 0x4f1   :  { %3507 = vmatpush3.msra.mxu0 %v2738_v10 }
 0x4f2   :  { %3508 = vmatprep.subr.mxu0 %v2753_v14  ;;  %v2990_v14 = vld [vmem:[#allocation52] sm:$0x1] }
 0x4f3   :  { %3509 = vmatpush3.msra.mxu0 %v2737_v29 }
 0x4f4   :  { %2974 = vmatmul.mubr.f32.vlgmr.msra.gmra.mxu0 %v2671_v30 }
 0x4fd   :  { %v2370_v26 = vpop.f32.mrf.mxu1 }
 0x4ff   :  { %v2056_v31 = vpop.f32.mrf.mxu0  ;;  %v3670_v33 = vpop.f32.mrf.mxu1 }
 0x501   :  { %v3629_v37 = vpop.f32.mrf.mxu0 }
 0x502   :  { %v3163_v37 = vld [vmem:[%s4961_s13 + $0x18] sm:$0xff] }
 0x507   :  { %v2129_v2 = vpop.f32.mrf.mxu0 }
 0x508   :  { %v2130_v40 = vadd.f32 %v2129_v2, %v2056_v31  ;;  %v3162_v2 = vld [vmem:[%s4961_s13 + $0x10] sm:$0xff] }
 0x509   :  { %v3640_v28 = vpop.f32.mrf.mxu0 }
 0x50a   :  { %v3160_v28 = vld [vmem:[%s4961_s13] sm:$0xff] }
 0x50f   :  { %v2247_v25 = vpop.f32.mrf.mxu0 }
 0x510   :  { %v2251_v35 = vadd.f32 %v2247_v25, %v2130_v40  ;;  %v3161_v40 = vld [vmem:[%s4961_s13 + $0x8] sm:$0xff]  ;;  %v3332_v25 = vld [vmem:[#allocation54] ss:$0 sm:$0xff] }
 0x511   :  { %v3651_v32 = vpop.f32.mrf.mxu0 }
 0x512   :  { %v2374_v6 = vadd.f32 %v2370_v26, %v2251_v35 }
 0x594   :  { %v3440_v43 = vpop.f32.mrf.mxu0  ;;  %v3475_v19 = vpop.f32.mrf.mxu1 }
 0x596   :  { %v3441_v22 = vpop.f32.mrf.mxu0  ;;  %v3476_v38 = vpop.f32.mrf.mxu1 }
 0x597   :  { %v3442_v23 = vadd.f32 %v3441_v22, %v3440_v43  ;;  %v3477_v46 = vadd.f32 %v3476_v38, %v3475_v19 }
 0x599   :  { %v2906_v39 = vadd.f32 %v3477_v46, %v3442_v23 }
 0x5b4   :  { %v3510_v44 = vpop.f32.mrf.mxu0 }
 0x5b6   :  { %v3511_v3 = vpop.f32.mrf.mxu0 }
 0x5b7   :  { %v3512_v48 = vadd.f32 %v3511_v3, %v3510_v44 }
 0x5b9   :  { %v2976_v49 = vadd.f32 %v3512_v48, %v2906_v39 }
 0x5bb   :  { %v2979_v17 = vadd.f32 %v2976_v49, %v2374_v6 }
 0x5bd   :  { %v2987_v42 = vadd.f32 %v3331_v34, %v2979_v17 }
 0x5bf   :  { %v2988_v45 = vmax.f32 %v2987_v42, 0.0  ;;  %v3119_v42 = vld [vmem:[#allocation55] sm:$0x1] }
 0x5c1   :  { %v2991_v9 = vsel %vm747_vm1, %v2988_v45, 0.0  ;;  %v2999_v50 = vmul.f32 %v2988_v45, %v2988_v45 }
 0x5c2   :  { %v2992_v52 = vrot.slane %v2991_v9, 4 }
 0x5c3   :  { %v3000_v36 = vsel %vm747_vm1, %v2999_v50, 0.0  ;;  %v3120_v50 = vld [vmem:[#allocation57] sm:$0x1] }
 0x5c4   :  { %v2993_v53 = vadd.f32 %v2992_v52, %v2991_v9  ;;  %v3001_v47 = vrot.slane %v3000_v36, 4 }
 0x5c6   :  { %v2994_v54 = vrot.slane %v2993_v53, 2  ;;  %v3002_v55 = vadd.f32 %v3001_v47, %v3000_v36 }
 0x5c8   :  { %v2995_v56 = vadd.f32 %v2994_v54, %v2993_v53  ;;  %v3003_v58 = vrot.slane %v3002_v55, 2 }
 0x5ca   :  { %v2996_v60 = vrot.slane %v2995_v56, 1  ;;  %v3004_v61 = vadd.f32 %v3003_v58, %v3002_v55 }
 0x5cc   :  { %v2997_v0 = vadd.f32 %v2996_v60, %v2995_v56  ;;  %v3005_v5 = vrot.slane %v3004_v61, 1  ;;  %v3334_v56 = vld [vmem:[#allocation58] ss:$0 sm:$0xff] }
 0x5ce   :  { %v2998_v4 = vmul.f32 0.125, %v2997_v0  ;;  %v3006_v7 = vadd.f32 %v3005_v5, %v3004_v61 }
 0x5d0   :  { %v3007_v59 = vmul.f32 0.125, %v3006_v7  ;;  %v3008_v11 = vmul.f32 %v2998_v4, %v2998_v4 }
 0x5d2   :  { %v3009_v15 = vsub.f32 %v3007_v59, %v3008_v11 }
 0x5d4   :  { %v3010_v16 = vmax.f32 %v3009_v15, 0.0 }
 0x5d6   :  { %v3011_v18 = vadd.f32 1e-05, %v3010_v16 }
 0x5d8   :  { %3826 = vrsqrt.f32 %v3011_v18 }
 0x5e5   :  { %v3827_v10 = vpop.eup %3826 }
 0x5e6   :  { %v3013_v20 = vmul.f32 %v3827_v10, %v2989_v62 }
 0x5e8   :  { %v3018_v29 = vrot.slane %v3013_v20, %v5145_v1  ;;  %v3021_v57 = vmul.f32 %v3013_v20, %v2998_v4 }
 0x5ea   :  { %v3022_v30 = vsub.f32 %v2990_v14, %v3021_v57  ;;  %v3020_v26 = vmul.f32 %v3018_v29, %v2988_v45 }
 0x5ec   :  { %v3027_v31 = vrot.slane %v3022_v30, %v5145_v1 }
 0x5ee   :  { %v3029_v33 = vadd.f32 %v3027_v31, %v3020_v26 }
 0x5f0   :  { %3688 = vmatmul.mubr.msk.f32.vlgmr.msra.gmra.mxu1 %vm747_vm1, %v3029_v33 }
 0x5f1   :  { %3698 = vmatprep.mubr.msk.f32.mxu1 %vm4722_vm2, %v4721_v51  ;;  %3691 = vmatpush3.msra.mxu1 %v3163_v37 }
 0x5f2   :  { %3692 = vmatprep.subr.mxu1 %v4721_v51 }
 0x5f3   :  { %3693 = vmatpush3.msra.mxu1 %v3162_v2 }
 0x5f4   :  { %3694 = vmatprep.subr.mxu1 %v4721_v51 }
 0x5f5   :  { %3695 = vmatpush3.msra.mxu1 %v3161_v40 }
 0x5f6   :  { %3696 = vmatprep.subr.mxu1 %v4721_v51 }
 0x5f7   :  { %3697 = vmatpush3.msra.mxu1 %v3160_v28 }
 0x6b0   :  { %v3114_v35 = vpop.f32.mrf.mxu1 }
 0x6b1   :  { %v3115_v32 = vadd.f32 %v3332_v25, %v3114_v35 }
 0x6b2   :  { %v3689_v6 = vpop.f32.mrf.mxu1 }
 0x6b3   :  { %v3118_v21 = vmax.f32 %v3115_v32, 0.0 }
 0x6b5   :  { %v3121_v8 = vsel %vm661_vm0, %v3118_v21, 0.0  ;;  %v3129_v27 = vmul.f32 %v3118_v21, %v3118_v21 }
 0x6b6   :  { %v3122_v13 = vrot.slane %v3121_v8, 4 }
 0x6b7   :  { %v3130_v63 = vsel %vm661_vm0, %v3129_v27, 0.0 }
 0x6b8   :  { %v3123_v41 = vadd.f32 %v3122_v13, %v3121_v8  ;;  %v3131_v12 = vrot.slane %v3130_v63, 4 }
 0x6ba   :  { %v3124_v24 = vrot.slane %v3123_v41, 2  ;;  %v3132_v43 = vadd.f32 %v3131_v12, %v3130_v63 }
 0x6bc   :  { %v3125_v19 = vadd.f32 %v3124_v24, %v3123_v41  ;;  %v3133_v22 = vrot.slane %v3132_v43, 2 }
 0x6be   :  { %v3126_v38 = vrot.slane %v3125_v19, 1  ;;  %v3134_v51 = vadd.f32 %v3133_v22, %v3132_v43 }
 0x6c0   :  { %v3127_v23 = vadd.f32 %v3126_v38, %v3125_v19  ;;  %v3135_v46 = vrot.slane %v3134_v51, 1 }
 0x6c2   :  { %v3128_v44 = vmul.f32 0.125, %v3127_v23  ;;  %v3136_v3 = vadd.f32 %v3135_v46, %v3134_v51 }
 0x6c4   :  { %v3137_v39 = vmul.f32 0.125, %v3136_v3  ;;  %v3138_v48 = vmul.f32 %v3128_v44, %v3128_v44 }
 0x6c6   :  { %v3139_v49 = vsub.f32 %v3137_v39, %v3138_v48 }
 0x6c8   :  { %v3140_v34 = vmax.f32 %v3139_v49, 0.0 }
 0x6ca   :  { %v3141_v17 = vadd.f32 1e-05, %v3140_v34 }
 0x6cc   :  { %3828 = vrsqrt.f32 %v3141_v17 }
 0x6d9   :  { %v3829_v45 = vpop.eup %3828 }
 0x6da   :  { %v3143_v9 = vmul.f32 %v3829_v45, %v3119_v42 }
 0x6dc   :  { %v3148_v52 = vrot.slane %v3143_v9, %v5145_v1  ;;  %v3151_v36 = vmul.f32 %v3143_v9, %v3128_v44 }
 0x6de   :  { %v3152_v53 = vsub.f32 %v3120_v50, %v3151_v36  ;;  %v3150_v47 = vmul.f32 %v3148_v52, %v3118_v21 }
 0x6e0   :  { %v3157_v54 = vrot.slane %v3152_v53, %v5145_v1 }
 0x6e2   :  { %v3159_v55 = vadd.f32 %v3157_v54, %v3150_v47 }
 0x6e4   :  { %3699 = vmatmul.mubr.msk.f32.vlgmr.msra.gmra.mxu1 %vm661_vm0, %v3159_v55 }
 0x7a4   :  { %v3240_v58 = vpop.f32.mrf.mxu1 }
 0x7a5   :  { %v3241_v60 = vadd.f32 %v3334_v56, %v3240_v58 }
 0x7a6   :  { %v3700_v61 = vpop.f32.mrf.mxu1 }
 0x7a7   :  { %3244 = vst [vmem:[%s4971_s5] sm:$0xff] %v3241_v60 }
 0x7a8   :  { %3249 = vsyncpa [#allocation3], 1 }
 0x7a9   :  { %3250 = vsyncpa [#allocation5], 1 }
 0x7aa   :  { %3251 = vsyncpa [#allocation8], 1 }
 0x7ab   :  { %3252 = vsyncpa [#allocation11], 1 }
 0x7ac   :  { %3253 = vsyncpa [#allocation14], 1 }
 0x7ad   :  { %3254 = vsyncpa [#allocation17], 1 }
 0x7ae   :  { %3255 = vsyncpa [#allocation20], 1 }
 0x7af   :  { %3256 = vsyncpa [#allocation23], 1 }
 0x7b0   :  { %3257 = vsyncpa [#allocation26], 1 }
 0x7b1   :  { %3258 = vsyncpa [#allocation29], 1 }
 0x7b2   :  { %3259 = vsyncpa [#allocation32], 1 }
 0x7b3   :  { %3260 = vsyncpa [#allocation35], 1 }
 0x7b4   :  { %3261 = vsyncpa [#allocation38], 1 }
 0x7b5   :  { %3262 = vsyncpa [#allocation41], 1 }
 0x7b6   :  { %3263 = vsyncpa [#allocation44], 1 }
 0x7b7   :  { %3264 = vsyncpa [#allocation47], 1 }
 0x7b8   :  { %3265 = vsyncpa [#allocation50], 1 }
 0x7b9   :  { %3266 = vsyncpa [#allocation53], 1 }
 0x7ba   :  { %3267 = vsyncpa [#allocation56], 1 }
 0x7bb   :  { %3268 = vsyncpa [#allocation59], 1 }

</bundles_post_ra>
